<compile_context>
chip_gen: v6e
topology: v6e:2x2x1
jax: 0.10.0
libtpu: 0.0.40
codegen_flags: <defaults>
</compile_context>

<pallas_src>
import functools
import math

import jax
import jax.numpy as jnp
from jax.experimental import pallas as pl
from jax.experimental.pallas import tpu as pltpu


def _pick_q_tile(n, heads, m):
    """Largest lane-dense query tile dividing N whose f32 softmax working set
    (scores + exp + probs ~ 3 * heads * t * m * 4B) stays well inside scoped
    VMEM on every generation (v5e 16 MiB default, v7x 64 MiB physical)."""
    budget = 8 << 20
    cands = [t for t in (512, 256, 128) if n % t == 0]
    for t in cands:
        if 3 * heads * t * m * 4 <= budget:
            return t
    return cands[-1] if cands else n


# ---------------------------------------------------------------------------
# Fused kernel: depthwise strided conv -> projections -> attention -> out proj
# All activations channels-first (channels on sublanes, tokens on lanes).
# ---------------------------------------------------------------------------
def fused_lmha_kernel(xq_ref, xf_ref, wexp_ref, pool_ref, bdw_ref,
                      wq_ref, bq_ref, wkv_ref, bkv_ref, wo_ref, bo_ref,
                      o_ref, kh_sc, vh_sc, *, heads):
    # xq_ref : (1, C, TN)  bf16  query tokens (transposed), current tile
    # xf_ref : (1, C, N)   bf16  full image tokens (transposed), conv source
    # wexp_ref: (C, N)     bf16  per-token depthwise tap weight
    # pool_ref: (N, M)     bf16  0/1 patch-pooling matrix
    # bdw_ref : (C, 1)     f32   conv bias
    # wq_ref  : (C, C)  bf16 (scale-folded), bq_ref: (C, 1) f32 (scale-folded)
    # wkv_ref : (2C, C) bf16 stacked [Wk; Wv], bkv_ref: (2C, 1) f32
    # wo_ref  : (C, C)  bf16, bo_ref: (C, 1) f32
    # o_ref   : (1, C, TN) output (transposed, lane-dense)
    # kh_sc/vh_sc : (heads, dk, M) bf16 VMEM scratch (cached K / V heads)
    C, TN = xq_ref.shape[1], xq_ref.shape[2]
    dk = C // heads
    M = pool_ref.shape[1]

    # ---- conv + K/V projections: computed once per image, cached in scratch ---
    @pl.when(pl.program_id(1) == 0)
    def _():
        # depthwise k x k, stride k conv as (x * tap-weight) @ pooling-matrix:
        # kv[c, m] = sum_n x[c, n] * wexp[c, n] * pool[n, m]
        xw = xf_ref[0] * wexp_ref[...]                                 # (C, N) bf16
        kvT = jnp.dot(xw, pool_ref[...],
                      preferred_element_type=jnp.float32) + bdw_ref[...]  # (C, M) f32
        kvT_b = kvT.astype(jnp.bfloat16)
        # fused K & V projection: single MXU launch on the stacked (2C, C) weight
        kvp = jnp.dot(wkv_ref[...], kvT_b,
                      preferred_element_type=jnp.float32) + bkv_ref[...]  # (2C, M) f32
        kvp_b = kvp.astype(jnp.bfloat16)                               # one full-tile cast
        kh_sc[...] = kvp_b[:C].reshape(heads, dk, M)
        vh_sc[...] = kvp_b[C:].reshape(heads, dk, M)

    # ---- per-query-tile path ---------------------------------------------------
    xT = xq_ref[0]                                                     # (C, TN) bf16
    # 1/sqrt(dk) already folded into wq / bq by the wrapper.
    qT = jnp.dot(wq_ref[...], xT, preferred_element_type=jnp.float32) + bq_ref[...]
    qh = qT.astype(jnp.bfloat16).reshape(heads, dk, TN)                # (h, dk, TN)

    # scores[h, n, m] = sum_d q[h, d, n] * k[h, d, m]
    s = jnp.einsum("hdn,hdm->hnm", qh, kh_sc[...],
                   preferred_element_type=jnp.float32)                 # (h, TN, M) f32
    s = s - jnp.max(s, axis=-1, keepdims=True)                         # stable softmax
    e = jnp.exp(s)
    p = e * (1.0 / jnp.sum(e, axis=-1, keepdims=True))                 # exact recip (tiny)

    # ctx^T[h, d, n] = sum_m v[h, d, m] * p[h, n, m]
    ctxT = jnp.einsum("hdm,hnm->hdn", vh_sc[...], p.astype(jnp.bfloat16),
                      preferred_element_type=jnp.float32)
    ctxT = ctxT.reshape(C, TN).astype(jnp.bfloat16)
    outT = jnp.dot(wo_ref[...], ctxT, preferred_element_type=jnp.float32) + bo_ref[...]
    o_ref[0] = outT.astype(o_ref.dtype)
    # TODO(synk): attention dropout omitted (identity in eval mode).


# ---------------------------------------------------------------------------
# Wrapper
# ---------------------------------------------------------------------------
def lightweight_mha(x, params, *, heads, k):
    B, C, H, W = x.shape
    assert C % heads == 0 and H % k == 0 and W % k == 0
    Hk, Wk = H // k, W // k
    N, M = H * W, Hk * Wk
    dk = C // heads
    scale = 1.0 / math.sqrt(dk)
    bf = jnp.bfloat16

    tn = _pick_q_tile(N, heads, M)

    # Query / conv source tokens, channels-first: a free reshape (no HBM relayout).
    xq = x.reshape(B, C, N).astype(bf)

    # Depthwise strided conv auxiliaries (tiny, batch-independent):
    #   wexp[c, n] = conv weight tap for token n's (h%k, w%k) position
    #   pool[n, m] = 1 iff token n lies inside k x k patch m
    cw = params["conv_w"].reshape(C, k, k)
    wexp = jnp.broadcast_to(cw[:, None, :, None, :],
                            (C, Hk, k, Wk, k)).reshape(C, N).astype(bf)
    patch = ((jnp.arange(H)[:, None] // k) * Wk
             + (jnp.arange(W)[None, :] // k)).reshape(N)
    pool = (patch[:, None] == jnp.arange(M)[None, :]).astype(bf)       # (N, M)
    b_dw = params["conv_b"].reshape(C, 1)

    # nn.Linear params stored as (in, out); pre-transpose to (out, in) so the kernel
    # computes W^T @ X^T.  1/sqrt(dk) is folded into Wq / bq (free on the wrapper).
    wq_t = (params["wq"].T * scale).astype(bf)
    bq = (params["bq"] * scale).reshape(C, 1)
    wkv_t = jnp.concatenate([params["wk"].T, params["wv"].T], axis=0).astype(bf)
    bkv = jnp.concatenate([params["bk"], params["bv"]]).reshape(2 * C, 1)
    wo_t = params["wo"].T.astype(bf)
    bo = params["bo"].reshape(C, 1)

    const2 = lambda b, n: (0, 0)

    out = pl.pallas_call(
        functools.partial(fused_lmha_kernel, heads=heads),
        # NOTE: output kept f32 to match the PyTorch module; switch to bf16 here if
        # downstream tolerates it (halves the dominant remaining HBM writeback).
        out_shape=jax.ShapeDtypeStruct((B, C, N), jnp.float32),
        grid=(B, N // tn),
        in_specs=[
            pl.BlockSpec((1, C, tn), lambda b, n: (b, 0, n)),          # query^T tile
            pl.BlockSpec((1, C, N), lambda b, n: (b, 0, 0)),           # full image (conv)
            pl.BlockSpec((C, N), const2),                              # wexp
            pl.BlockSpec((N, M), const2),                              # pool
            pl.BlockSpec((C, 1), const2),                              # conv bias
            pl.BlockSpec((C, C), const2), pl.BlockSpec((C, 1), const2),        # Wq, bq
            pl.BlockSpec((2 * C, C), const2), pl.BlockSpec((2 * C, 1), const2),  # Wkv, bkv
            pl.BlockSpec((C, C), const2), pl.BlockSpec((C, 1), const2),        # Wo, bo
        ],
        out_specs=pl.BlockSpec((1, C, tn), lambda b, n: (b, 0, n)),
        scratch_shapes=[pltpu.VMEM((heads, dk, M), bf),                # cached K heads
                        pltpu.VMEM((heads, dk, M), bf)],               # cached V heads
        compiler_params=pltpu.CompilerParams(
            # n-tile axis must be sequential so the cached K/V scratch stays valid.
            dimension_semantics=("parallel", "arbitrary"),
            vmem_limit_bytes=32 * 1024 * 1024),
    )(xq, xq, wexp, pool, b_dw, wq_t, bq, wkv_t, bkv, wo_t, bo)

    # (B, C, N) -> (B, C, H, W) is a free reshape (no transpose needed).
    return out.reshape(B, C, H, W)


# ---------------------------------------------------------------------------
# Pure-JAX reference (mirrors PyTorch semantics) for correctness check.
# ---------------------------------------------------------------------------
def reference(x, params, *, heads, k):
    B, C, H, W = x.shape
    Hk, Wk = H // k, W // k
    dk = C // heads
    xp = x.reshape(B, C, Hk, k, Wk, k)
    w = params["conv_w"].reshape(C, k, k)
    kv = jnp.einsum("bchiwj,cij->bchw", xp, w) + params["conv_b"][None, :, None, None]
    q = jnp.transpose(x.reshape(B, C, H * W), (0, 2, 1))
    kv = jnp.transpose(kv.reshape(B, C, Hk * Wk), (0, 2, 1))
    qp = q @ params["wq"] + params["bq"]
    kp = kv @ params["wk"] + params["bk"]
    vp = kv @ params["wv"] + params["bv"]
    qh = qp.reshape(B, -1, heads, dk).transpose(0, 2, 1, 3)
    kh = kp.reshape(B, -1, heads, dk).transpose(0, 2, 1, 3)
    vh = vp.reshape(B, -1, heads, dk).transpose(0, 2, 1, 3)
    s = jnp.einsum("bhnd,bhmd->bhnm", qh, kh) / math.sqrt(dk)
    p = jax.nn.softmax(s, axis=-1)
    ctx = jnp.einsum("bhnm,bhmd->bhnd", p, vh).transpose(0, 2, 1, 3).reshape(B, -1, C)
    out = ctx @ params["wo"] + params["bo"]
    return jnp.transpose(out, (0, 2, 1)).reshape(B, C, H, W)


if __name__ == "__main__":
    B, C, H, W = 2, 32, 16, 16     # dim=32, N=256 tokens (lane-dense)
    heads, k = 4, 2

    key = jax.random.PRNGKey(0)
    keys = jax.random.split(key, 11)
    x = jax.random.normal(keys[0], (B, C, H, W), jnp.float32)

    # Deterministic synthetic parameters (nn.Linear weights stored as (in, out)).
    params = {
        "conv_w": 0.1 * jax.random.normal(keys[1], (C, 1, k, k), jnp.float32),
        "conv_b": 0.1 * jax.random.normal(keys[2], (C,), jnp.float32),
        "wq": 0.05 * jax.random.normal(keys[3], (C, C), jnp.float32),
        "bq": 0.05 * jax.random.normal(keys[4], (C,), jnp.float32),
        "wk": 0.05 * jax.random.normal(keys[5], (C, C), jnp.float32),
        "bk": 0.05 * jax.random.normal(keys[6], (C,), jnp.float32),
        "wv": 0.05 * jax.random.normal(keys[7], (C, C), jnp.float32),
        "bv": 0.05 * jax.random.normal(keys[8], (C,), jnp.float32),
        "wo": 0.05 * jax.random.normal(keys[9], (C, C), jnp.float32),
        "bo": 0.05 * jax.random.normal(keys[10], (C,), jnp.float32),
    }

    out = lightweight_mha(x, params, heads=heads, k=k)
    out = jax.block_until_ready(out)

    ref = reference(x, params, heads=heads, k=k)
    assert out.shape == (B, C, H, W)
    # bf16 MXU operands (f32 accumulation) -> relaxed tolerance vs f32 reference.
    assert jnp.allclose(out, ref, atol=2e-2, rtol=2e-2), (
        f"mismatch: max abs diff {jnp.max(jnp.abs(out - ref))}")

    print("KERNEL_OK")
</pallas_src>

<mosaic_0001>
module attributes {stable_mosaic.version = 11 : i64} {
  func.func @fused_lmha_kernel(%arg0: i32, %arg1: i32, %arg2: memref<1x32x256xbf16, #tpu.memory_space<vmem>>, %arg3: memref<1x32x256xbf16, #tpu.memory_space<vmem>>, %arg4: memref<32x256xbf16, #tpu.memory_space<vmem>>, %arg5: memref<256x64xbf16, #tpu.memory_space<vmem>>, %arg6: memref<32x1xf32, #tpu.memory_space<vmem>>, %arg7: memref<32x32xbf16, #tpu.memory_space<vmem>>, %arg8: memref<32x1xf32, #tpu.memory_space<vmem>>, %arg9: memref<64x32xbf16, #tpu.memory_space<vmem>>, %arg10: memref<64x1xf32, #tpu.memory_space<vmem>>, %arg11: memref<32x32xbf16, #tpu.memory_space<vmem>>, %arg12: memref<32x1xf32, #tpu.memory_space<vmem>>, %arg13: memref<1x32x256xf32, #tpu.memory_space<vmem>>, %arg14: memref<4x8x64xbf16, #tpu.memory_space<vmem>>, %arg15: memref<4x8x64xbf16, #tpu.memory_space<vmem>>) attributes {dimension_semantics = [#tpu.dimension_semantics<parallel>, #tpu.dimension_semantics<arbitrary>], iteration_bounds = array<i64: 2, 1>, scalar_prefetch = 0 : i64, scratch_operands = 2 : i64, tpu.core_type = #tpu.core_type<tc>, window_params = [{transform_indices = @transform_0, window_bounds = array<i64: 1, 32, 256>}, {transform_indices = @transform_1, window_bounds = array<i64: 1, 32, 256>}, {pipeline_mode = #tpu.pipeline_mode<synchronous>, transform_indices = @transform_2, window_bounds = array<i64: 32, 256>}, {pipeline_mode = #tpu.pipeline_mode<synchronous>, transform_indices = @transform_3, window_bounds = array<i64: 256, 64>}, {pipeline_mode = #tpu.pipeline_mode<synchronous>, transform_indices = @transform_4, window_bounds = array<i64: 32, 1>}, {pipeline_mode = #tpu.pipeline_mode<synchronous>, transform_indices = @transform_5, window_bounds = array<i64: 32, 32>}, {pipeline_mode = #tpu.pipeline_mode<synchronous>, transform_indices = @transform_6, window_bounds = array<i64: 32, 1>}, {pipeline_mode = #tpu.pipeline_mode<synchronous>, transform_indices = @transform_7, window_bounds = array<i64: 64, 32>}, {pipeline_mode = #tpu.pipeline_mode<synchronous>, transform_indices = @transform_8, window_bounds = array<i64: 64, 1>}, {pipeline_mode = #tpu.pipeline_mode<synchronous>, transform_indices = @transform_9, window_bounds = array<i64: 32, 32>}, {pipeline_mode = #tpu.pipeline_mode<synchronous>, transform_indices = @transform_10, window_bounds = array<i64: 32, 1>}, {transform_indices = @transform_11, window_bounds = array<i64: 1, 32, 256>}]} {
    %c0_i32 = arith.constant 0 : i32
    %0 = arith.cmpi eq, %arg1, %c0_i32 : i32
    %1 = arith.extui %0 : i1 to i32
    %c0_i32_0 = arith.constant 0 : i32
    %2 = arith.cmpi ne, %1, %c0_i32_0 : i32
    scf.if %2 {
      %c0_26 = arith.constant 0 : index
      %c0_27 = arith.constant 0 : index
      %c0_28 = arith.constant 0 : index
      %38 = vector.load %arg3[%c0_26, %c0_27, %c0_28] : memref<1x32x256xbf16, #tpu.memory_space<vmem>>, vector<1x32x256xbf16>
      %39 = vector.shape_cast %38 : vector<1x32x256xbf16> to vector<32x256xbf16>
      %c0_29 = arith.constant 0 : index
      %c0_30 = arith.constant 0 : index
      %40 = vector.load %arg4[%c0_29, %c0_30] : memref<32x256xbf16, #tpu.memory_space<vmem>>, vector<32x256xbf16>
      %41 = arith.mulf %39, %40 : vector<32x256xbf16>
      %c0_31 = arith.constant 0 : index
      %c0_32 = arith.constant 0 : index
      %42 = vector.load %arg5[%c0_31, %c0_32] : memref<256x64xbf16, #tpu.memory_space<vmem>>, vector<256x64xbf16>
      %cst_33 = arith.constant dense<0.000000e+00> : vector<32x64xf32>
      %43 = tpu.matmul %41, %42, %cst_33 {dimension_numbers = #tpu.dot_dimension_numbers<[1], [0], [0], [1], [0, 0, 1, 1], [], []>} : vector<32x256xbf16>, vector<256x64xbf16>, vector<32x64xf32> -> vector<32x64xf32>
      %c0_34 = arith.constant 0 : index
      %c0_35 = arith.constant 0 : index
      %44 = vector.load %arg6[%c0_34, %c0_35] : memref<32x1xf32, #tpu.memory_space<vmem>>, vector<32x1xf32>
      %45 = vector.broadcast %44 : vector<32x1xf32> to vector<32x64xf32>
      %46 = arith.addf %43, %45 : vector<32x64xf32>
      %47 = arith.truncf %46 : vector<32x64xf32> to vector<32x64xbf16>
      %c0_36 = arith.constant 0 : index
      %c0_37 = arith.constant 0 : index
      %48 = vector.load %arg9[%c0_36, %c0_37] : memref<64x32xbf16, #tpu.memory_space<vmem>>, vector<64x32xbf16>
      %cst_38 = arith.constant dense<0.000000e+00> : vector<64x64xf32>
      %49 = tpu.matmul %48, %47, %cst_38 {dimension_numbers = #tpu.dot_dimension_numbers<[1], [0], [0], [1], [0, 0, 1, 1], [], []>} : vector<64x32xbf16>, vector<32x64xbf16>, vector<64x64xf32> -> vector<64x64xf32>
      %c0_39 = arith.constant 0 : index
      %c0_40 = arith.constant 0 : index
      %50 = vector.load %arg10[%c0_39, %c0_40] : memref<64x1xf32, #tpu.memory_space<vmem>>, vector<64x1xf32>
      %51 = vector.broadcast %50 : vector<64x1xf32> to vector<64x64xf32>
      %52 = arith.addf %49, %51 : vector<64x64xf32>
      %53 = arith.truncf %52 : vector<64x64xf32> to vector<64x64xbf16>
      %54 = vector.extract_strided_slice %53 {offsets = [0, 0], sizes = [32, 64], strides = [1, 1]} : vector<64x64xbf16> to vector<32x64xbf16>
      %55 = vector.shape_cast %54 : vector<32x64xbf16> to vector<4x8x64xbf16>
      %c0_41 = arith.constant 0 : index
      %c0_42 = arith.constant 0 : index
      %c0_43 = arith.constant 0 : index
      %56 = vector.load %arg14[%c0_41, %c0_42, %c0_43] : memref<4x8x64xbf16, #tpu.memory_space<vmem>>, vector<4x8x64xbf16>
      tpu.vector_store %arg14[%c0_41, %c0_42, %c0_43], %55 {strides = array<i32>} : memref<4x8x64xbf16, #tpu.memory_space<vmem>>, vector<4x8x64xbf16>,
      %57 = vector.extract_strided_slice %53 {offsets = [32, 0], sizes = [32, 64], strides = [1, 1]} : vector<64x64xbf16> to vector<32x64xbf16>
      %58 = vector.shape_cast %57 : vector<32x64xbf16> to vector<4x8x64xbf16>
      %c0_44 = arith.constant 0 : index
      %c0_45 = arith.constant 0 : index
      %c0_46 = arith.constant 0 : index
      %59 = vector.load %arg15[%c0_44, %c0_45, %c0_46] : memref<4x8x64xbf16, #tpu.memory_space<vmem>>, vector<4x8x64xbf16>
      tpu.vector_store %arg15[%c0_44, %c0_45, %c0_46], %58 {strides = array<i32>} : memref<4x8x64xbf16, #tpu.memory_space<vmem>>, vector<4x8x64xbf16>,
    } else {
    }
    %c0 = arith.constant 0 : index
    %c0_1 = arith.constant 0 : index
    %c0_2 = arith.constant 0 : index
    %3 = vector.load %arg2[%c0, %c0_1, %c0_2] : memref<1x32x256xbf16, #tpu.memory_space<vmem>>, vector<1x32x256xbf16>
    %4 = vector.shape_cast %3 : vector<1x32x256xbf16> to vector<32x256xbf16>
    %c0_3 = arith.constant 0 : index
    %c0_4 = arith.constant 0 : index
    %5 = vector.load %arg7[%c0_3, %c0_4] : memref<32x32xbf16, #tpu.memory_space<vmem>>, vector<32x32xbf16>
    %cst = arith.constant dense<0.000000e+00> : vector<32x256xf32>
    %6 = tpu.matmul %5, %4, %cst {dimension_numbers = #tpu.dot_dimension_numbers<[1], [0], [0], [1], [0, 0, 1, 1], [], []>} : vector<32x32xbf16>, vector<32x256xbf16>, vector<32x256xf32> -> vector<32x256xf32>
    %c0_5 = arith.constant 0 : index
    %c0_6 = arith.constant 0 : index
    %7 = vector.load %arg8[%c0_5, %c0_6] : memref<32x1xf32, #tpu.memory_space<vmem>>, vector<32x1xf32>
    %8 = vector.broadcast %7 : vector<32x1xf32> to vector<32x256xf32>
    %9 = arith.addf %6, %8 : vector<32x256xf32>
    %10 = arith.truncf %9 : vector<32x256xf32> to vector<32x256xbf16>
    %11 = vector.shape_cast %10 : vector<32x256xbf16> to vector<4x8x256xbf16>
    %c0_7 = arith.constant 0 : index
    %c0_8 = arith.constant 0 : index
    %c0_9 = arith.constant 0 : index
    %12 = vector.load %arg14[%c0_7, %c0_8, %c0_9] : memref<4x8x64xbf16, #tpu.memory_space<vmem>>, vector<4x8x64xbf16>
    "tpu.trace_start"() <{level = 10 : i32, message = "hdn,hdm->hnm"}> : () -> ()
    %cst_10 = arith.constant dense<0.000000e+00> : vector<4x256x64xf32>
    %13 = tpu.matmul %11, %12, %cst_10 {dimension_numbers = #tpu.dot_dimension_numbers<[1], [1], [2], [2], [0, 0, 0, 2, 1, 2], [0], [0]>} : vector<4x8x256xbf16>, vector<4x8x64xbf16>, vector<4x256x64xf32> -> vector<4x256x64xf32>
    "tpu.trace_stop"() : () -> ()
    %cst_11 = arith.constant dense<0xFF800000> : vector<4x256xf32>
    %14 = vector.multi_reduction <maximumf>, %13, %cst_11 [2] : vector<4x256x64xf32> to vector<4x256xf32>
    %15 = vector.shape_cast %14 : vector<4x256xf32> to vector<4x256x1xf32>
    %16 = vector.broadcast %15 : vector<4x256x1xf32> to vector<4x256x64xf32>
    %17 = arith.subf %13, %16 : vector<4x256x64xf32>
    %18 = math.exp %17 : vector<4x256x64xf32>
    %cst_12 = arith.constant dense<0.000000e+00> : vector<4x256xf32>
    %19 = vector.multi_reduction <add>, %18, %cst_12 [2] : vector<4x256x64xf32> to vector<4x256xf32>
    %20 = vector.shape_cast %19 : vector<4x256xf32> to vector<4x256x1xf32>
    %cst_13 = arith.constant 1.000000e+00 : f32
    %21 = vector.broadcast %cst_13 : f32 to vector<4x256x1xf32>
    %22 = arith.divf %21, %20 : vector<4x256x1xf32>
    %23 = vector.broadcast %22 : vector<4x256x1xf32> to vector<4x256x64xf32>
    %24 = arith.mulf %18, %23 : vector<4x256x64xf32>
    %c0_14 = arith.constant 0 : index
    %c0_15 = arith.constant 0 : index
    %c0_16 = arith.constant 0 : index
    %25 = vector.load %arg15[%c0_14, %c0_15, %c0_16] : memref<4x8x64xbf16, #tpu.memory_space<vmem>>, vector<4x8x64xbf16>
    %26 = arith.truncf %24 : vector<4x256x64xf32> to vector<4x256x64xbf16>
    "tpu.trace_start"() <{level = 10 : i32, message = "hdm,hnm->hdn"}> : () -> ()
    %cst_17 = arith.constant dense<0.000000e+00> : vector<4x8x256xf32>
    %27 = tpu.matmul %25, %26, %cst_17 {dimension_numbers = #tpu.dot_dimension_numbers<[2], [2], [1], [1], [0, 0, 0, 1, 1, 1], [0], [0]>} : vector<4x8x64xbf16>, vector<4x256x64xbf16>, vector<4x8x256xf32> -> vector<4x8x256xf32>
    "tpu.trace_stop"() : () -> ()
    %28 = vector.shape_cast %27 : vector<4x8x256xf32> to vector<32x256xf32>
    %29 = arith.truncf %28 : vector<32x256xf32> to vector<32x256xbf16>
    %c0_18 = arith.constant 0 : index
    %c0_19 = arith.constant 0 : index
    %30 = vector.load %arg11[%c0_18, %c0_19] : memref<32x32xbf16, #tpu.memory_space<vmem>>, vector<32x32xbf16>
    %cst_20 = arith.constant dense<0.000000e+00> : vector<32x256xf32>
    %31 = tpu.matmul %30, %29, %cst_20 {dimension_numbers = #tpu.dot_dimension_numbers<[1], [0], [0], [1], [0, 0, 1, 1], [], []>} : vector<32x32xbf16>, vector<32x256xbf16>, vector<32x256xf32> -> vector<32x256xf32>
    %c0_21 = arith.constant 0 : index
    %c0_22 = arith.constant 0 : index
    %32 = vector.load %arg12[%c0_21, %c0_22] : memref<32x1xf32, #tpu.memory_space<vmem>>, vector<32x1xf32>
    %33 = vector.broadcast %32 : vector<32x1xf32> to vector<32x256xf32>
    %34 = arith.addf %31, %33 : vector<32x256xf32>
    %c0_23 = arith.constant 0 : index
    %c0_24 = arith.constant 0 : index
    %c0_25 = arith.constant 0 : index
    %35 = vector.load %arg13[%c0_23, %c0_24, %c0_25] : memref<1x32x256xf32, #tpu.memory_space<vmem>>, vector<1x32x256xf32>
    %36 = vector.shape_cast %35 : vector<1x32x256xf32> to vector<32x256xf32>
    %37 = vector.shape_cast %34 : vector<32x256xf32> to vector<1x32x256xf32>
    tpu.vector_store %arg13[%c0_23, %c0_24, %c0_25], %37 {strides = array<i32>} : memref<1x32x256xf32, #tpu.memory_space<vmem>>, vector<1x32x256xf32>,
    return
  }
  func.func @transform_0(%arg0: i32, %arg1: i32) -> (i32, i32, i32) {
    %c0_i32 = arith.constant 0 : i32
    %c0_i32_0 = arith.constant 0 : i32
    return %arg0, %c0_i32, %arg1 : i32, i32, i32
  }
  func.func @transform_1(%arg0: i32, %arg1: i32) -> (i32, i32, i32) {
    %c0_i32 = arith.constant 0 : i32
    %c0_i32_0 = arith.constant 0 : i32
    %c0_i32_1 = arith.constant 0 : i32
    return %arg0, %c0_i32, %c0_i32_0 : i32, i32, i32
  }
  func.func @transform_2(%arg0: i32, %arg1: i32) -> (i32, i32) {
    %c0_i32 = arith.constant 0 : i32
    %c0_i32_0 = arith.constant 0 : i32
    %c0_i32_1 = arith.constant 0 : i32
    return %c0_i32, %c0_i32_0 : i32, i32
  }
  func.func @transform_3(%arg0: i32, %arg1: i32) -> (i32, i32) {
    %c0_i32 = arith.constant 0 : i32
    %c0_i32_0 = arith.constant 0 : i32
    %c0_i32_1 = arith.constant 0 : i32
    return %c0_i32, %c0_i32_0 : i32, i32
  }
  func.func @transform_4(%arg0: i32, %arg1: i32) -> (i32, i32) {
    %c0_i32 = arith.constant 0 : i32
    %c0_i32_0 = arith.constant 0 : i32
    %c0_i32_1 = arith.constant 0 : i32
    return %c0_i32, %c0_i32_0 : i32, i32
  }
  func.func @transform_5(%arg0: i32, %arg1: i32) -> (i32, i32) {
    %c0_i32 = arith.constant 0 : i32
    %c0_i32_0 = arith.constant 0 : i32
    %c0_i32_1 = arith.constant 0 : i32
    return %c0_i32, %c0_i32_0 : i32, i32
  }
  func.func @transform_6(%arg0: i32, %arg1: i32) -> (i32, i32) {
    %c0_i32 = arith.constant 0 : i32
    %c0_i32_0 = arith.constant 0 : i32
    %c0_i32_1 = arith.constant 0 : i32
    return %c0_i32, %c0_i32_0 : i32, i32
  }
  func.func @transform_7(%arg0: i32, %arg1: i32) -> (i32, i32) {
    %c0_i32 = arith.constant 0 : i32
    %c0_i32_0 = arith.constant 0 : i32
    %c0_i32_1 = arith.constant 0 : i32
    return %c0_i32, %c0_i32_0 : i32, i32
  }
  func.func @transform_8(%arg0: i32, %arg1: i32) -> (i32, i32) {
    %c0_i32 = arith.constant 0 : i32
    %c0_i32_0 = arith.constant 0 : i32
    %c0_i32_1 = arith.constant 0 : i32
    return %c0_i32, %c0_i32_0 : i32, i32
  }
  func.func @transform_9(%arg0: i32, %arg1: i32) -> (i32, i32) {
    %c0_i32 = arith.constant 0 : i32
    %c0_i32_0 = arith.constant 0 : i32
    %c0_i32_1 = arith.constant 0 : i32
    return %c0_i32, %c0_i32_0 : i32, i32
  }
  func.func @transform_10(%arg0: i32, %arg1: i32) -> (i32, i32) {
    %c0_i32 = arith.constant 0 : i32
    %c0_i32_0 = arith.constant 0 : i32
    %c0_i32_1 = arith.constant 0 : i32
    return %c0_i32, %c0_i32_0 : i32, i32
  }
  func.func @transform_11(%arg0: i32, %arg1: i32) -> (i32, i32, i32) {
    %c0_i32 = arith.constant 0 : i32
    %c0_i32_0 = arith.constant 0 : i32
    return %arg0, %c0_i32, %arg1 : i32, i32, i32
  }
}

</mosaic_0001>

<bundles_post_ra>
// kernel: tpu_custom_call.1
= control target key start
LH: loop header
LB: loop body
LE: loop exit
PB: predicated region body
PF: predicated region fallthrough
CT: control target
= control target key end

     0   :  { %16 = vsyncpa [#allocation5], 0  ;;  %s7938_s0 = inlined_call_operand.vmem [shape: bf16[2,32,256], index: 0, kind: input, shape index: {}]   ;;  %s7939_s1 = inlined_call_operand.vmem [shape: bf16[2,32,256], index: 1, kind: input, shape index: {}]   ;;  %s7940_s2 = inlined_call_operand.vmem [shape: bf16[32,256], index: 2, kind: input, shape index: {}]   ;;  %s7941_s3 = inlined_call_operand.vmem [shape: bf16[256,64], index: 3, kind: input, shape index: {}]   ;;  %s7942_s4 = inlined_call_operand.vmem [shape: f32[32,1], index: 4, kind: input, shape index: {}]   ;;  %s7943_s5 = inlined_call_operand.vmem [shape: bf16[32,32], index: 5, kind: input, shape index: {}]   ;;  %s7944_s6 = inlined_call_operand.vmem [shape: f32[32,1], index: 6, kind: input, shape index: {}]   ;;  %s7945_s7 = inlined_call_operand.vmem [shape: bf16[64,32], index: 7, kind: input, shape index: {}]   ;;  %s7946_s8 = inlined_call_operand.vmem [shape: f32[64,1], index: 8, kind: input, shape index: {}]   ;;  %s7947_s9 = inlined_call_operand.vmem [shape: bf16[32,32], index: 9, kind: input, shape index: {}]   ;;  %s7948_s10 = inlined_call_operand.vmem [shape: f32[32,1], index: 10, kind: input, shape index: {}]   ;;  %s7949_s11 = inlined_call_operand.hbm [shape: f32[2,32,256], index: 11, kind: output, shape index: {}]  }
   0x1   :  { %18 = vsyncpa [#allocation5 + $0x1], 0  ;;  %s5458_s17 = smov 0   ;;  %s5460_s18 = smov 0  }
   0x2   :  { %s5462_s19 = smov 0   ;;  %s5464_s20 = smov 0  }
   0x3   :  { %s5466_s21 = smov 0   ;;  %s5468_s22 = smov 0  }
   0x4 LB: > { %8178 = sst [smem:[#allocation7_spill]] %s5380_s19  ;;  %s4196_s23 = sadd.s32 4294967295, %s5392_s22   ;;  %s5392_s22 = sphi %s5468_s22, %s24_s22   ;;  %s5388_s21 = sphi %s5466_s21, %s8718_s21   ;;  %s5384_s20 = sphi %s5464_s20, %s8717_s20   ;;  %s5380_s19 = sphi %s5462_s19, %s8716_s19   ;;  %s5376_s18 = sphi %s5460_s18, %s8720_s18   ;;  %s5372_s17 = sphi %s5458_s17, %s8719_s17  }
   0x5   : > { %8179 = sst [smem:[#allocation8_spill]] %s5388_s21  ;;  %s4197_s24 = sadd.s32 4294967294, %s5392_s22  }
   0x6   : > { %s36_s25 = sadd.s32 1, %s5388_s21  ;;  %s288_s26 = sadd.s32 1, %s5380_s19 }
   0x7   : > { %p38_p0 = scmp.ge.s32.totalorder %s36_s25, 2  ;;  %p298_p1 = scmp.ne.s32.totalorder %s5380_s19, %s5376_s18 }
   0x8   : > { %p299_p2 = scmp.eq.s32.totalorder %s4196_s23, 1  ;;  %p304_p3 = scmp.ne.s32.totalorder %s5376_s18, %s5372_s17 }
   0x9   : > { %s8722_s25 = smov (%p38_p0, %s36_s25), 0  ;;  %p305_p5 = scmp.eq.s32.totalorder %s4197_s24, 1 }
   0xa   : > { %8180 = sst [smem:[#allocation9_spill]] %s8722_s25  ;;  %p5498_p4 = por %p299_p2, %p298_p1 }
   0xb   : > { %s283_s28 = ssub.s32 %s5388_s21, %s8722_s25  ;;  %p4200_p6 = scmp.ge.s32.totalorder %s5392_s22, 1 }
   0xc   : > { %p286_p7 = scmp.eq.s32.totalorder %s283_s28, 0  ;;  %p5505_p8 = por %p305_p5, %p304_p3 }
   0xd   : > { %p371_p9 = scmp.lt.s32.totalorder %s5392_s22, 3 }
   0xe   : > { %s5511_s30 = scalar_select %p286_p7, %s5380_s19, %s288_s26  }
   0xf   : > { %p372_p10 = pnand %p4200_p6, %p371_p9 }
  0x10   : > { %8183 = sst [smem:[#allocation10_spill]] %s5511_s30 }
  0x11   : > { %375 = sbr.rel (%p372_p10) target bundleno = 1903 (0x76f), region = 64 }
  0x16   : > { %v4772_v0 = vld [vmem:[%s7941_s3 + $0x78] sm:$0xff]   ;;  %v4774_v2 = vld [vmem:[%s7941_s3 + $0x70] sm:$0xff]   ;;  %p421_p11 = scmp.lt.s32.totalorder %s5384_s20, 1  ;;  %v7953_v3 = vmov 0   ;;  %v4776_v5 = vld [vmem:[%s7941_s3 + $0x68] sm:$0xff]   ;;  %vm752_vm0 = vcmask 261120  }
  0x17   : > { %v4773_v1 = vld [vmem:[%s7941_s3 + $0x38] sm:$0xff]   ;;  %4354 = vmatprep.subr.bf16.mxu0 %v4772_v0  ;;  %4770 = vset.pattern.permute.xlu0 %v7953_v3  ;;  %v4775_v4 = vld [vmem:[%s7941_s3 + $0x30] sm:$0xff]   ;;  %v4777_v6 = vld [vmem:[%s7941_s3 + $0x28] sm:$0xff]   ;;  %vm848_vm1 = vcmask 519168   ;;  %vm1098_vm2 = vcmask 1043456   ;;  %vm1049_vm3 = vcmask 64512  }
  0x18   : > { %4355 = vmatpush3.bf16.msra.mxu0 %v4773_v1  ;;  %4771 = vset.pattern.permute.xlu1 %v7953_v3  ;;  %s5532_s13 = scalar_select %p421_p11, %s5384_s20, 1  ;;  %v4778_v7 = vld [vmem:[%s7941_s3 + $0x60] sm:$0xff]   ;;  %v4780_v9 = vld [vmem:[%s7941_s3 + $0x58] sm:$0xff]   ;;  %v4782_v11 = vld [vmem:[%s7941_s3 + $0x50] sm:$0xff]   ;;  %vm2007_vm4 = vcmask 523264  }
  0x19   : > { %4356 = vmatprep.subr.bf16.mxu0 %v4774_v2  ;;  %v4779_v8 = vld [vmem:[%s7941_s3 + $0x20] sm:$0xff]   ;;  %v4781_v10 = vld [vmem:[%s7941_s3 + $0x18] sm:$0xff]   ;;  %v446_v15 = vld [vmem:[%s7940_s2 + $0x8] sm:$0xff]  ;;  %s4353_s23 = sshll.u32 %s5384_s20, 10  ;;  %s5395_s21 = smov [#allocation4]  }
  0x1a   : > { %s4335_s24 = sshll.u32 %s5532_s13, 5  ;;  %v445_v14 = vld [vmem:[%s7940_s2] sm:$0xff]  ;;  %v487_v18 = vld [vmem:[%s7942_s4 + $0x10] sm:$0xff]  ;;  %v4784_v21 = vld [vmem:[%s7941_s3 + $0x48] sm:$0xff]   ;;  %s417_s13 = sand.u32 1, %s5376_s18  }
  0x1b   : > { %s434_s15 = scalar_lea.vmem %s7939_s1, %s4335_s24  ;;  %v4783_v19 = vld [vmem:[%s7941_s3 + $0x10] sm:$0xff]   ;;  %501 = vperm.xlu0 %4770, %v487_v18   ;;  %v485_v20 = vld [vmem:[%s7942_s4] sm:$0xff]  ;;  %v488_v23 = vld [vmem:[%s7942_s4 + $0x18] sm:$0xff]  ;;  %s7887_s12 = scalar_lea.hbm %s7949_s11, %s4353_s23 }
  0x1c   : > { %4357 = vmatpush3.bf16.msra.mxu0 %v4775_v4  ;;  %v441_v12 = vld [vmem:[%s434_s15] sm:$0xff]  ;;  %v442_v13 = vld [vmem:[%s434_s15 + $0x8] sm:$0xff]  ;;  %491 = vperm.xlu1 %4771, %v485_v20   ;;  %v443_v27 = vld [vmem:[%s434_s15 + $0x10] sm:$0xff]  ;;  %s7893_s20 = scalar_lea.sflag [#allocation5], %s417_s13  ;;  %s5320_s30 = sshll.u32 %s5395_s21, 4  ;;  %s5321_s30 = int_to_ptr.vmem [resolvable:$false] %s5320_s30 }
  0x1d   : > { %4358 = vmatprep.subr.bf16.mxu0 %v4776_v5  ;;  %v449_v16 = vmul.bf16 %v445_v14, %v441_v12  ;;  %v450_v17 = vmul.bf16 %v446_v15, %v442_v13  ;;  %v4785_v24 = vld [vmem:[%s7941_s3 + $0x8] sm:$0xff]   ;;  %v4786_v26 = vld [vmem:[%s7941_s3 + $0x40] sm:$0xff]   ;;  %v444_v28 = vld [vmem:[%s434_s15 + $0x18] sm:$0xff]  ;;  %s5636_s15 = scalar_lea.vmem %s7938_s0, %s4335_s24  ;;  %s4201_s24 = sshll.u32 %s417_s13, 6 }
  0x1e   : > { %v486_v25 = vld [vmem:[%s7942_s4 + $0x8] sm:$0xff]  ;;  %v447_v29 = vld [vmem:[%s7940_s2 + $0x10] sm:$0xff]  ;;  %v448_v30 = vld [vmem:[%s7940_s2 + $0x18] sm:$0xff]  ;;  %s419_s16 = scalar_lea.vmem [#allocation4], %s4201_s24  ;;  %s5322_s14 = scalar_lea.vmem %s5321_s30, 2048 }
  0x1f   : > { %v4207_v22 = vcombine.high %v449_v16, %v450_v17  ;;  %v879_v31 = vld [vmem:[%s7944_s6] sm:$0xff]  ;;  %506 = vperm.xlu0 %4770, %v488_v23   ;;  %v880_v32 = vld [vmem:[%s7944_s6 + $0x8] sm:$0xff]  ;;  %v451_v34 = vmul.bf16 %v447_v29, %v443_v27  ;;  %v452_v35 = vmul.bf16 %v448_v30, %v444_v28  ;;  %v4206_v38 = vcombine.low %v449_v16, %v450_v17  ;;  %v881_v40 = vld [vmem:[%s7944_s6 + $0x10] sm:$0xff]  ;;  %s4105_s25 = sshll.u32 %s419_s16, 4  ;;  %s7889_s25 = int_to_ptr.vmem [resolvable:$true] %s4105_s25 }
  0x20   : > { %4359 = vmatpush3.bf16.msra.mxu0 %v4777_v6  ;;  %496 = vperm.xlu1 %4771, %v486_v25   ;;  %v4787_v33 = vld [vmem:[%s7941_s3] sm:$0xff]   ;;  %v685_v37 = vld [vmem:[%s7946_s8 + $0x8] sm:$0xff]  ;;  %v882_v41 = vld [vmem:[%s7944_s6 + $0x18] sm:$0xff]  ;;  %s5316_s19 = scalar_lea.vmem %s7889_s25, 1024  ;;  %p5323_p1 = scmp.lt.s32.totalorder %s7889_s25, %s5321_s30 }
  0x21   : > { %4360 = vmatprep.subr.bf16.mxu0 %v4778_v7  ;;  %657 = vmatprep.mubr.bf16.mxu0 %v4207_v22  ;;  %v684_v36 = vld [vmem:[%s7946_s8] sm:$0xff]  ;;  %v4209_v39 = vcombine.high %v451_v34, %v452_v35  ;;  %v686_v42 = vld [vmem:[%s7946_s8 + $0x10] sm:$0xff]  ;;  %v687_v43 = vld [vmem:[%s7946_s8 + $0x18] sm:$0xff]  ;;  %v4208_v44 = vcombine.low %v451_v34, %v452_v35  ;;  %p5317_p12 = scmp.ne.s32.totalorder %s7889_s25, %s5316_s19  ;;  %p5324_p2 = scmp.lt.s32.totalorder %s5322_s14, %s5316_s19 }
  0x22   : > { %v689_v45 = vld [vmem:[%s7946_s8 + $0x28] sm:$0xff]  ;;  %v688_v46 = vld [vmem:[%s7946_s8 + $0x20] sm:$0xff]  ;;  %v4792_v7 = vld [vmem:[%s5636_s15 + $0x14] ss:$8 sps:$4 sm:$0xff]  }
  0x23   : > { %885 = vperm.xlu0 %4770, %v879_v31   ;;  %v4788_v47 = vld [vmem:[%s7945_s7] sm:$0xff]   ;;  %v4794_v13 = vld [vmem:[%s7945_s7 + $0x18] sm:$0xff]   ;;  %v4799_v15 = vld [vmem:[%s7943_s5 + $0x8] sm:$0xff]   ;;  %p5318_p13 = pnand %p5317_p12, %p5498_p4  ;;  %p5325_p3 = por %p5324_p2, %p5323_p1 }
  0x24   : > { %4361 = vmatpush3.bf16.msra.mxu0 %v4779_v8  ;;  %890 = vperm.xlu1 %4771, %v880_v32   ;;  %v4789_v8 = vld [vmem:[%s7945_s7 + $0x8] sm:$0xff]   ;;  %v4798_v14 = vld [vmem:[%s7943_s5] sm:$0xff]  }
  0x25   : > { %4362 = vmatprep.subr.bf16.mxu0 %v4780_v9  ;;  %4532 = vmatprep.mubr.msk.bf16.mxu1 %vm752_vm0, %v4788_v47  ;;  %v4790_v9 = vld [vmem:[%s5636_s15 + $0x10] ss:$8 sps:$4 sm:$0xff]   ;;  %v4795_v12 = vld [vmem:[%s5636_s15] ss:$8 sps:$4 sm:$0xff]   ;;  %p5319_p0 = pneg %p5318_p13 }
  0x27   : > { %694 = vperm.xlu0 %4770, %v684_v36   ;;  %p5326_p5 = pnand %p5325_p3, %p5319_p0 }
  0x28   : > { %4363 = vmatpush3.bf16.msra.mxu0 %v4781_v10  ;;  %699 = vperm.xlu1 %4771, %v685_v37   ;;  %v4793_v10 = vld [vmem:[%s7945_s7 + $0x10] sm:$0xff]  }
  0x29   : > { %4364 = vmatprep.subr.bf16.mxu0 %v4782_v11  ;;  %v4797_v11 = vld [vmem:[%s5636_s15 + $0x4] ss:$8 sps:$4 sm:$0xff]  }
  0x2b   : > { %895 = vperm.xlu0 %4770, %v881_v40  }
  0x2c   : > { %4365 = vmatpush3.bf16.msra.mxu0 %v4783_v19  ;;  %900 = vperm.xlu1 %4771, %v882_v41  }
  0x2d   : > { %4366 = vmatprep.subr.bf16.mxu0 %v4784_v21 }
  0x2f   : > { %704 = vperm.xlu0 %4770, %v686_v42  }
  0x30   : > { %4367 = vmatpush3.bf16.msra.mxu0 %v4785_v24  ;;  %709 = vperm.xlu1 %4771, %v687_v43  }
  0x31   : > { %4368 = vmatprep.subr.bf16.mxu0 %v4786_v26 }
  0x33   : > { %719 = vperm.xlu0 %4770, %v689_v45  }
  0x34   : > { %4369 = vmatpush3.bf16.msra.mxu0 %v4787_v33  ;;  %714 = vperm.xlu1 %4771, %v688_v46  }
  0x37   : > { %658 = vmatmul.mubr.bf16.vlgmr.msra.gmra.mxu0 %v4206_v38 }
  0x38   : > { %665 = vmatprep.mubr.bf16.mxu0 %v4209_v39 }
  0x3f   : > { %666 = vmatmul.mubr.bf16.gmra.mxu0 %v4208_v44 }
  0x96   : > { %v502_v53 = vpop.permute.xlu0 %501 }
  0x97   : > { %v492_v54 = vpop.permute.xlu1 %491 }
  0x9a   : > { %v507_v62 = vpop.permute.xlu0 %506 }
  0x9b   : > { %v497_v63 = vpop.permute.xlu1 %496 }
  0x9e   : > { %v886_v16 = vpop.permute.xlu0 %885 }
  0x9f   : > { %v5664_v17 = vpop.permute.xlu1 %890 }
  0xa2   : > { %v695_v18 = vpop.permute.xlu0 %694 }
  0xa3   : > { %v700_v19 = vpop.permute.xlu1 %699 }
  0xa6   : > { %v5666_v20 = vpop.permute.xlu0 %895 }
  0xa7   : > { %v5668_v21 = vpop.permute.xlu1 %900 }
  0xaa   : > { %v705_v22 = vpop.permute.xlu0 %704 }
  0xab   : > { %v710_v28 = vpop.permute.xlu1 %709 }
  0xae   : > { %v720_v44 = vpop.permute.xlu0 %719 }
  0xaf   : > { %v715_v37 = vpop.permute.xlu1 %714 }
  0xf7   : > { %v4370_v48 = vpop.f32.mrf.mxu0 }
  0xf9   : > { %v4371_v49 = vpop.f32.mrf.mxu0 }
  0xfa   : > { %v4372_v60 = vadd.f32 %v4371_v49, %v4370_v48 }
  0xfb   : > { %v4373_v50 = vpop.f32.mrf.mxu0 }
  0xfc   : > { %v660_v4 = vadd.f32 %v4372_v60, %v492_v54 }
  0xfd   : > { %v4374_v51 = vpop.f32.mrf.mxu0 }
  0xfe   : > { %v4375_v57 = vadd.f32 %v4374_v51, %v4373_v50 }
  0xff   : > { %v4376_v52 = vpop.f32.mrf.mxu0 }
 0x100   : > { %v663_v0 = vadd.f32 %v4375_v57, %v497_v63 }
 0x101   : > { %v4377_v55 = vpop.f32.mrf.mxu0 }
 0x102   : > { %v4378_v58 = vadd.f32 %v4377_v55, %v4376_v52  ;;  %v674_v6 = vpack.c.bf16 %v663_v0, %v660_v4 }
 0x103   : > { %v4379_v56 = vpop.f32.mrf.mxu0 }
 0x104   : > { %v668_v1 = vadd.f32 %v4378_v58, %v502_v53 }
 0x105   : > { %v4380_v59 = vpop.f32.mrf.mxu0 }
 0x106   : > { %v4381_v61 = vadd.f32 %v4380_v59, %v4379_v56 }
 0x108   : > { %v671_v2 = vadd.f32 %v4381_v61, %v507_v62 }
 0x10a   : > { %v675_v5 = vpack.c.bf16 %v671_v2, %v668_v1 }
 0x10c   : > { %4528 = vmatprep.subr.bf16.mxu1 %v675_v5 }
 0x10d   : > { %4529 = vmatpush3.bf16.msra.mxu1 %v675_v5 }
 0x10e   : > { %4530 = vmatprep.subr.bf16.mxu1 %v674_v6 }
 0x111   : > { %4531 = vmatpush3.bf16.msra.mxu1 %v674_v6 }
 0x112   : > { %952 = vmatprep.subr.bf16.mxu1 %v4792_v7 }
 0x114   : > { %4533 = vmatmul.mubr.msk.bf16.vlgmr.msra.gmra.mxu1 %vm752_vm0, %v4789_v8 }
 0x115   : > { %953 = vmatpush1.bf16.msra.mxu1 %v4790_v9  ;;  %4536 = vmatprep.mubr.msk.bf16.mxu1 %vm752_vm0, %v4793_v10 }
 0x116   : > { %954 = vmatprep.subr.bf16.mxu1 %v4797_v11 }
 0x119   : > { %955 = vmatpush1.bf16.msra.mxu1 %v4795_v12 }
 0x11c   : > { %4537 = vmatmul.mubr.msk.bf16.gmra.mxu1 %vm752_vm0, %v4794_v13 }
 0x11d   : > { %972 = vmatprep.mubr.bf16.mxu1 %v7953_v3 }
 0x124   : > { %4248 = vmatmul.mubr.msk.bf16.vlgmr.msra.gmra.mxu1 %vm752_vm0, %v4798_v14 }
 0x125   : > { %982 = vmatprep.mubr.bf16.mxu1 %v7953_v3 }
 0x12c   : > { %4249 = vmatmul.mubr.msk.bf16.gmra.mxu1 %vm752_vm0, %v4799_v15 }
 0x1d4   : > { %v4534_v23 = vpop.f32.mrf.mxu1 }
 0x1d5   : > { %v808_v24 = vadd.f32 %v4534_v23, %v705_v22 }
 0x1d6   : > { %v799_v25 = vpop.f32.mrf.mxu1 }
 0x1d7   : > { %v4339_v26 = vpack.c.bf16 %v808_v24, %v808_v24  ;;  %v800_v27 = vadd.f32 %v799_v25, %v695_v18 }
 0x1d8   : > { %v4535_v29 = vpop.f32.mrf.mxu1 }
 0x1d9   : > { %851 = vst.msk [vmem:[#allocation2 + $0x8] sm:$0xf] %vm848_vm1, %v4339_v26  ;;  %v4337_v30 = vpack.c.bf16 %v800_v27, %v800_v27  ;;  %v811_v31 = vadd.f32 %v4535_v29, %v710_v28 }
 0x1da   : > { %v802_v32 = vpop.f32.mrf.mxu1 }
 0x1db   : > { %849 = vst.msk [vmem:[#allocation2] sm:$0xf] %vm848_vm1, %v4337_v30  ;;  %v4340_v33 = vpack.c.bf16 %v811_v31, %v811_v31  ;;  %v803_v34 = vadd.f32 %v802_v32, %v700_v19 }
 0x1dc   : > { %v5672_v35 = vpop.f32.mrf.mxu1 }
 0x1dd   : > { %8184 = vst [vmem:[#allocation11_spill] sm:$0xff] %v5672_v35  ;;  %852 = vst.msk [vmem:[#allocation2 + $0xc] sm:$0xf] %vm848_vm1, %v4340_v33  ;;  %v4338_v36 = vpack.c.bf16 %v803_v34, %v803_v34 }
 0x1de   : > { %v815_v38 = vpop.f32.mrf.mxu1 }
 0x1df   : > { %850 = vst.msk [vmem:[#allocation2 + $0x4] sm:$0xf] %vm848_vm1, %v4338_v36  ;;  %v816_v39 = vadd.f32 %v815_v38, %v715_v37 }
 0x1e0   : > { %v5676_v40 = vpop.f32.mrf.mxu1  ;;  %v1011_v41 = vld [vmem:[#allocation2 + $0x8] sm:$0xf] }
 0x1e1   : > { %8185 = vst [vmem:[#allocation12_spill] sm:$0xff] %v5676_v40  ;;  %v4341_v42 = vpack.c.bf16 %v816_v39, %v816_v39  ;;  %v1596_v43 = vsel %vm1098_vm2, %v1011_v41, 0 }
 0x1e2   : > { %v818_v45 = vpop.f32.mrf.mxu1  ;;  %v1009_v46 = vld [vmem:[#allocation2] sm:$0xf] }
 0x1e3   : > { %867 = vst.msk [vmem:[#allocation3] sm:$0xf] %vm848_vm1, %v4341_v42  ;;  %v819_v47 = vadd.f32 %v818_v45, %v720_v44  ;;  %4676 = vmatprep.subr.msk.bf16.mxu1 %vm1098_vm2, %v1009_v46  ;;  %v1100_v48 = vsel %vm1098_vm2, %v1009_v46, 0 }
 0x1e4   : > { %v974_v49 = vpop.f32.mrf.mxu1  ;;  %4541 = vmatpush3.bf16.msra.mxu1 %v1100_v48  ;;  %v1012_v50 = vld [vmem:[#allocation2 + $0xc] sm:$0xf] }
 0x1e5   : > { %v4342_v51 = vpack.c.bf16 %v819_v47, %v819_v47  ;;  %v975_v52 = vadd.f32 %v974_v49, %v886_v16  ;;  %4678 = vmatprep.subr.msk.bf16.mxu1 %vm1098_vm2, %v1011_v41  ;;  %v1844_v53 = vsel %vm1098_vm2, %v1012_v50, 0 }
 0x1e6   : > { %v976_v54 = vpop.f32.mrf.mxu1  ;;  %v1010_v55 = vld [vmem:[#allocation2 + $0x4] sm:$0xf] }
 0x1e7   : > { %868 = vst.msk [vmem:[#allocation3 + $0x4] sm:$0xf] %vm848_vm1, %v4342_v51  ;;  %v4345_v56 = vpack.c.bf16 %v975_v52, %v975_v52  ;;  %4677 = vmatprep.subr.msk.bf16.mxu0 %vm1098_vm2, %v1010_v55  ;;  %v1348_v57 = vsel %vm1098_vm2, %v1010_v55, 0  ;;  %v977_v61 = vadd.f32 %v976_v54, %v886_v16 }
 0x1e8   : > { %v978_v58 = vpop.f32.mrf.mxu1  ;;  %4575 = vmatpush3.bf16.msra.mxu0 %v1348_v57 }
 0x1e9   : > { %v979_v59 = vadd.f32 %v978_v58, %v5664_v17  ;;  %4679 = vmatprep.subr.msk.bf16.mxu0 %vm1098_vm2, %v1012_v50  ;;  %1017 = vxpose.xlu0.c.b16.start.end [1/1] (short) %v4345_v56, 128  ;;  %v4346_v63 = vpack.c.bf16 %v977_v61, %v977_v61 }
 0x1ea   : > { %v980_v62 = vpop.f32.mrf.mxu1 }
 0x1eb   : > { %v4347_v60 = vpack.c.bf16 %v979_v59, %v979_v59  ;;  %v981_v0 = vadd.f32 %v980_v62, %v5664_v17 }
 0x1ec   : > { %v984_v2 = vpop.f32.mrf.mxu1 }
 0x1ed   : > { %1267 = vxpose.xlu1.c.b16.start.end [1/1] (short) %v4347_v60, 128  ;;  %v4348_v1 = vpack.c.bf16 %v981_v0, %v981_v0  ;;  %v985_v5 = vadd.f32 %v984_v2, %v5666_v20 }
 0x1ee   : > { %v986_v4 = vpop.f32.mrf.mxu1 }
 0x1ef   : > { %v4349_v7 = vpack.c.bf16 %v985_v5, %v985_v5  ;;  %v987_v10 = vadd.f32 %v986_v4, %v5666_v20 }
 0x1f0   : > { %v988_v6 = vpop.f32.mrf.mxu1 }
 0x1f1   : > { %v989_v8 = vadd.f32 %v988_v6, %v5668_v21  ;;  %v4350_v12 = vpack.c.bf16 %v987_v10, %v987_v10 }
 0x1f2   : > { %v990_v11 = vpop.f32.mrf.mxu1 }
 0x1f3   : > { %v4351_v9 = vpack.c.bf16 %v989_v8, %v989_v8  ;;  %v991_v13 = vadd.f32 %v990_v11, %v5668_v21 }
 0x1f5   : > { %v4352_v14 = vpack.c.bf16 %v991_v13, %v991_v13 }
 0x206   : > { %1033 = vxpose.xlu0.c.b16.start.end [1/1] (short) %v4346_v63, 128 }
 0x20a   : > { %1283 = vxpose.xlu1.c.b16.start.end [1/1] (short) %v4348_v1, 128 }
 0x223   : > { %1515 = vxpose.xlu0.c.b16.start.end [1/1] (short) %v4349_v7, 128 }
 0x227   : > { %1763 = vxpose.xlu1.c.b16.start.end [1/1] (short) %v4351_v9, 128 }
 0x240   : > { %1531 = vxpose.xlu0.c.b16.start.end [1/1] (short) %v4350_v12, 128 }
 0x244   : > { %1779 = vxpose.xlu1.c.b16.start.end [1/1] (short) %v4352_v14, 128 }
 0x24b   : > { %v1025_v15 = vpop.trf.xlu0 }
 0x24c   : > { %4542 = vmatprep.mubr.msk.bf16.mxu1 %vm1049_vm3, %v1025_v15 }
 0x24f   : > { %v1275_v16 = vpop.trf.xlu1  ;;  %v1026_v17 = vpop.trf.xlu0 }
 0x250   : > { %4543 = vmatmul.mubr.msk.bf16.vlgmr.msra.gmra.mxu1 %vm1049_vm3, %v1026_v17  ;;  %4576 = vmatprep.mubr.msk.bf16.mxu0 %vm1049_vm3, %v1275_v16  ;;  %v3544_v17 = vld [vmem:[#allocation3] sm:$0xf] }
 0x251   : > { %4609 = vmatpush3.bf16.msra.mxu1 %v1596_v43 }
 0x253   : > { %v1276_v18 = vpop.trf.xlu1  ;;  %v1027_v19 = vpop.trf.xlu0 }
 0x254   : > { %4577 = vmatmul.mubr.msk.bf16.vlgmr.msra.gmra.mxu0 %vm1049_vm3, %v1276_v18  ;;  %4546 = vmatprep.mubr.msk.bf16.mxu1 %vm1049_vm3, %v1027_v19  ;;  %v3545_v19 = vld [vmem:[#allocation3 + $0x4] sm:$0xf] }
 0x255   : > { %4643 = vmatpush3.bf16.msra.mxu0 %v1844_v53 }
 0x257   : > { %v1277_v20 = vpop.trf.xlu1  ;;  %v1028_v21 = vpop.trf.xlu0 }
 0x258   : > { %4547 = vmatmul.mubr.msk.bf16.gmra.mxu1 %vm1049_vm3, %v1028_v21  ;;  %4580 = vmatprep.mubr.msk.bf16.mxu0 %vm1049_vm3, %v1277_v20 }
 0x25b   : > { %v1278_v22 = vpop.trf.xlu1  ;;  %v1029_v23 = vpop.trf.xlu0 }
 0x25c   : > { %4581 = vmatmul.mubr.msk.bf16.gmra.mxu0 %vm1049_vm3, %v1278_v22  ;;  %4550 = vmatprep.mubr.msk.bf16.mxu1 %vm1049_vm3, %v1029_v23 }
 0x25f   : > { %v1279_v24 = vpop.trf.xlu1  ;;  %v1030_v25 = vpop.trf.xlu0 }
 0x260   : > { %4551 = vmatmul.mubr.msk.bf16.gmra.mxu1 %vm1049_vm3, %v1030_v25  ;;  %4584 = vmatprep.mubr.msk.bf16.mxu0 %vm1049_vm3, %v1279_v24 }
 0x263   : > { %v1280_v26 = vpop.trf.xlu1  ;;  %v1031_v27 = vpop.trf.xlu0 }
 0x264   : > { %4585 = vmatmul.mubr.msk.bf16.gmra.mxu0 %vm1049_vm3, %v1280_v26  ;;  %4554 = vmatprep.mubr.msk.bf16.mxu1 %vm1049_vm3, %v1031_v27 }
 0x267   : > { %v1281_v28 = vpop.trf.xlu1  ;;  %v1032_v29 = vpop.trf.xlu0 }
 0x268   : > { %4555 = vmatmul.mubr.msk.bf16.gmra.mxu1 %vm1049_vm3, %v1032_v29  ;;  %4588 = vmatprep.mubr.msk.bf16.mxu0 %vm1049_vm3, %v1281_v28 }
 0x26b   : > { %v1282_v30 = vpop.trf.xlu1  ;;  %v1041_v31 = vpop.trf.xlu0 }
 0x26c   : > { %4589 = vmatmul.mubr.msk.bf16.gmra.mxu0 %vm1049_vm3, %v1282_v30  ;;  %4558 = vmatprep.mubr.msk.bf16.mxu1 %vm1049_vm3, %v1041_v31 }
 0x26f   : > { %v1291_v32 = vpop.trf.xlu1  ;;  %v1042_v33 = vpop.trf.xlu0 }
 0x270   : > { %4559 = vmatmul.mubr.msk.bf16.gmra.mxu1 %vm1049_vm3, %v1042_v33  ;;  %4592 = vmatprep.mubr.msk.bf16.mxu0 %vm1049_vm3, %v1291_v32 }
 0x273   : > { %v1292_v34 = vpop.trf.xlu1  ;;  %v1043_v36 = vpop.trf.xlu0 }
 0x274   : > { %4593 = vmatmul.mubr.msk.bf16.gmra.mxu0 %vm1049_vm3, %v1292_v34  ;;  %4562 = vmatprep.mubr.msk.bf16.mxu1 %vm1049_vm3, %v1043_v36 }
 0x277   : > { %v1293_v37 = vpop.trf.xlu1  ;;  %v1044_v38 = vpop.trf.xlu0 }
 0x278   : > { %4563 = vmatmul.mubr.msk.bf16.gmra.mxu1 %vm1049_vm3, %v1044_v38  ;;  %4596 = vmatprep.mubr.msk.bf16.mxu0 %vm1049_vm3, %v1293_v37 }
 0x27b   : > { %v1294_v39 = vpop.trf.xlu1  ;;  %v1045_v41 = vpop.trf.xlu0 }
 0x27c   : > { %4597 = vmatmul.mubr.msk.bf16.gmra.mxu0 %vm1049_vm3, %v1294_v39  ;;  %4566 = vmatprep.mubr.msk.bf16.mxu1 %vm1049_vm3, %v1045_v41 }
 0x27f   : > { %v1295_v42 = vpop.trf.xlu1  ;;  %v1046_v43 = vpop.trf.xlu0 }
 0x280   : > { %4567 = vmatmul.mubr.msk.bf16.gmra.mxu1 %vm1049_vm3, %v1046_v43  ;;  %4600 = vmatprep.mubr.msk.bf16.mxu0 %vm1049_vm3, %v1295_v42 }
 0x283   : > { %v1296_v44 = vpop.trf.xlu1  ;;  %v1047_v45 = vpop.trf.xlu0 }
 0x284   : > { %4601 = vmatmul.mubr.msk.bf16.gmra.mxu0 %vm1049_vm3, %v1296_v44  ;;  %4570 = vmatprep.mubr.msk.bf16.mxu1 %vm1049_vm3, %v1047_v45 }
 0x287   : > { %v1297_v46 = vpop.trf.xlu1  ;;  %v1048_v47 = vpop.trf.xlu0 }
 0x288   : > { %4571 = vmatmul.mubr.msk.bf16.gmra.mxu1 %vm1049_vm3, %v1048_v47  ;;  %4604 = vmatprep.mubr.msk.bf16.mxu0 %vm1049_vm3, %v1297_v46 }
 0x28b   : > { %v1298_v48 = vpop.trf.xlu1  ;;  %v1523_v49 = vpop.trf.xlu0 }
 0x28c   : > { %4605 = vmatmul.mubr.msk.bf16.gmra.mxu0 %vm1049_vm3, %v1298_v48  ;;  %4610 = vmatprep.mubr.msk.bf16.mxu1 %vm1049_vm3, %v1523_v49 }
 0x28f   : > { %v1771_v50 = vpop.trf.xlu1  ;;  %v1524_v51 = vpop.trf.xlu0 }
 0x290   : > { %4611 = vmatmul.mubr.msk.bf16.vlgmr.msra.gmra.mxu1 %vm1049_vm3, %v1524_v51  ;;  %4644 = vmatprep.mubr.msk.bf16.mxu0 %vm1049_vm3, %v1771_v50 }
 0x293   : > { %v1772_v52 = vpop.trf.xlu1  ;;  %v1525_v53 = vpop.trf.xlu0 }
 0x294   : > { %4645 = vmatmul.mubr.msk.bf16.vlgmr.msra.gmra.mxu0 %vm1049_vm3, %v1772_v52  ;;  %4614 = vmatprep.mubr.msk.bf16.mxu1 %vm1049_vm3, %v1525_v53 }
 0x297   : > { %v1773_v54 = vpop.trf.xlu1  ;;  %v1526_v55 = vpop.trf.xlu0 }
 0x298   : > { %4615 = vmatmul.mubr.msk.bf16.gmra.mxu1 %vm1049_vm3, %v1526_v55  ;;  %4648 = vmatprep.mubr.msk.bf16.mxu0 %vm1049_vm3, %v1773_v54 }
 0x29b   : > { %v1774_v56 = vpop.trf.xlu1  ;;  %v1527_v57 = vpop.trf.xlu0 }
 0x29c   : > { %4649 = vmatmul.mubr.msk.bf16.gmra.mxu0 %vm1049_vm3, %v1774_v56  ;;  %4618 = vmatprep.mubr.msk.bf16.mxu1 %vm1049_vm3, %v1527_v57 }
 0x29f   : > { %v1775_v58 = vpop.trf.xlu1  ;;  %v1528_v59 = vpop.trf.xlu0 }
 0x2a0   : > { %4619 = vmatmul.mubr.msk.bf16.gmra.mxu1 %vm1049_vm3, %v1528_v59  ;;  %4652 = vmatprep.mubr.msk.bf16.mxu0 %vm1049_vm3, %v1775_v58 }
 0x2a3   : > { %v1776_v60 = vpop.trf.xlu1  ;;  %v1529_v61 = vpop.trf.xlu0 }
 0x2a4   : > { %4653 = vmatmul.mubr.msk.bf16.gmra.mxu0 %vm1049_vm3, %v1776_v60  ;;  %4622 = vmatprep.mubr.msk.bf16.mxu1 %vm1049_vm3, %v1529_v61 }
 0x2a7   : > { %v1777_v62 = vpop.trf.xlu1  ;;  %v1530_v63 = vpop.trf.xlu0 }
 0x2a8   : > { %4623 = vmatmul.mubr.msk.bf16.gmra.mxu1 %vm1049_vm3, %v1530_v63  ;;  %4656 = vmatprep.mubr.msk.bf16.mxu0 %vm1049_vm3, %v1777_v62 }
 0x2ab   : > { %v1778_v0 = vpop.trf.xlu1  ;;  %v1539_v1 = vpop.trf.xlu0 }
 0x2ac   : > { %4657 = vmatmul.mubr.msk.bf16.gmra.mxu0 %vm1049_vm3, %v1778_v0  ;;  %4626 = vmatprep.mubr.msk.bf16.mxu1 %vm1049_vm3, %v1539_v1 }
 0x2af   : > { %v1787_v2 = vpop.trf.xlu1  ;;  %v1540_v4 = vpop.trf.xlu0 }
 0x2b0   : > { %4627 = vmatmul.mubr.msk.bf16.gmra.mxu1 %vm1049_vm3, %v1540_v4  ;;  %4660 = vmatprep.mubr.msk.bf16.mxu0 %vm1049_vm3, %v1787_v2 }
 0x2b3   : > { %v1788_v5 = vpop.trf.xlu1  ;;  %v1541_v6 = vpop.trf.xlu0 }
 0x2b4   : > { %4661 = vmatmul.mubr.msk.bf16.gmra.mxu0 %vm1049_vm3, %v1788_v5  ;;  %4630 = vmatprep.mubr.msk.bf16.mxu1 %vm1049_vm3, %v1541_v6 }
 0x2b7   : > { %v1789_v7 = vpop.trf.xlu1  ;;  %v1542_v8 = vpop.trf.xlu0 }
 0x2b8   : > { %4631 = vmatmul.mubr.msk.bf16.gmra.mxu1 %vm1049_vm3, %v1542_v8  ;;  %4664 = vmatprep.mubr.msk.bf16.mxu0 %vm1049_vm3, %v1789_v7 }
 0x2bb   : > { %v1790_v9 = vpop.trf.xlu1  ;;  %v1543_v10 = vpop.trf.xlu0 }
 0x2bc   : > { %4665 = vmatmul.mubr.msk.bf16.gmra.mxu0 %vm1049_vm3, %v1790_v9  ;;  %4634 = vmatprep.mubr.msk.bf16.mxu1 %vm1049_vm3, %v1543_v10 }
 0x2bf   : > { %v1791_v11 = vpop.trf.xlu1  ;;  %v1544_v12 = vpop.trf.xlu0 }
 0x2c0   : > { %4635 = vmatmul.mubr.msk.bf16.gmra.mxu1 %vm1049_vm3, %v1544_v12  ;;  %4668 = vmatprep.mubr.msk.bf16.mxu0 %vm1049_vm3, %v1791_v11 }
 0x2c3   : > { %v1792_v13 = vpop.trf.xlu1  ;;  %v1545_v14 = vpop.trf.xlu0 }
 0x2c4   : > { %4669 = vmatmul.mubr.msk.bf16.gmra.mxu0 %vm1049_vm3, %v1792_v13  ;;  %4638 = vmatprep.mubr.msk.bf16.mxu1 %vm1049_vm3, %v1545_v14 }
 0x2c7   : > { %v1793_v15 = vpop.trf.xlu1  ;;  %v1546_v16 = vpop.trf.xlu0 }
 0x2c8   : > { %4639 = vmatmul.mubr.msk.bf16.gmra.mxu1 %vm1049_vm3, %v1546_v16  ;;  %4672 = vmatprep.mubr.msk.bf16.mxu0 %vm1049_vm3, %v1793_v15 }
 0x2c9   : > { %4472 = vmatprep.mubr.msk.bf16.mxu1 %vm2007_vm4, %v3544_v17 }
 0x2cb   : > { %v1794_v18 = vpop.trf.xlu1 }
 0x2cc   : > { %4673 = vmatmul.mubr.msk.bf16.gmra.mxu0 %vm1049_vm3, %v1794_v18 }
 0x2cd   : > { %4490 = vmatprep.mubr.msk.bf16.mxu0 %vm2007_vm4, %v3545_v19 }
 0x310   : > { %v5760_v20 = vpop.f32.mrf.mxu1 }
 0x311   : > { %v2014_v21 = vsel %vm2007_vm4, %v5760_v20, -inf }
 0x312   : > { %2015 = vmax.xlane.f32.xlu1 %v2014_v21  ;;  %v5764_v22 = vpop.f32.mrf.mxu1 }
 0x313   : > { %v2008_v25 = vsel %vm2007_vm4, %v5764_v22, -inf }
 0x314   : > { %v5766_v23 = vpop.f32.mrf.mxu1  ;;  %v5768_v24 = vpop.f32.mrf.mxu0 }
 0x315   : > { %v2017_v26 = vsel %vm2007_vm4, %v5766_v23, -inf  ;;  %v2110_v29 = vsel %vm2007_vm4, %v5768_v24, -inf }
 0x316   : > { %v5774_v27 = vpop.f32.mrf.mxu0  ;;  %2009 = vmax.xlane.f32.xlu1 %v2008_v25  ;;  %2018 = vmax.xlane.f32.xlu0 %v2017_v26  ;;  %v5776_v28 = vpop.f32.mrf.mxu1 }
 0x317   : > { %v2011_v30 = vsel %vm2007_vm4, %v5776_v28, -inf  ;;  %v2104_v33 = vsel %vm2007_vm4, %v5774_v27, -inf }
 0x318   : > { %v5782_v31 = vpop.f32.mrf.mxu0  ;;  %v5784_v32 = vpop.f32.mrf.mxu1 }
 0x319   : > { %v2113_v34 = vsel %vm2007_vm4, %v5782_v31, -inf  ;;  %v2026_v38 = vsel %vm2007_vm4, %v5784_v32, -inf }
 0x31a   : > { %2111 = vmax.xlane.f32.xlu1 %v2110_v29  ;;  %2012 = vmax.xlane.f32.xlu0 %v2011_v30  ;;  %v5790_v36 = vpop.f32.mrf.mxu0  ;;  %v5792_v37 = vpop.f32.mrf.mxu1 }
 0x31b   : > { %v2107_v39 = vsel %vm2007_vm4, %v5790_v36, -inf  ;;  %v2020_v43 = vsel %vm2007_vm4, %v5792_v37, -inf }
 0x31c   : > { %v5798_v41 = vpop.f32.mrf.mxu1  ;;  %v5800_v42 = vpop.f32.mrf.mxu0 }
 0x31d   : > { %v2029_v44 = vsel %vm2007_vm4, %v5798_v41, -inf  ;;  %v2122_v47 = vsel %vm2007_vm4, %v5800_v42, -inf }
 0x31e   : > { %2105 = vmax.xlane.f32.xlu1 %v2104_v33  ;;  %2114 = vmax.xlane.f32.xlu0 %v2113_v34  ;;  %v5806_v45 = vpop.f32.mrf.mxu1  ;;  %v5808_v46 = vpop.f32.mrf.mxu0 }
 0x31f   : > { %v2023_v48 = vsel %vm2007_vm4, %v5806_v45, -inf  ;;  %v2116_v51 = vsel %vm2007_vm4, %v5808_v46, -inf }
 0x320   : > { %v5814_v49 = vpop.f32.mrf.mxu0  ;;  %v5816_v50 = vpop.f32.mrf.mxu1 }
 0x321   : > { %v2125_v52 = vsel %vm2007_vm4, %v5814_v49, -inf  ;;  %v2038_v55 = vsel %vm2007_vm4, %v5816_v50, -inf }
 0x322   : > { %2108 = vmax.xlane.f32.xlu0 %v2107_v39  ;;  %2027 = vmax.xlane.f32.xlu1 %v2026_v38  ;;  %v5822_v53 = vpop.f32.mrf.mxu0  ;;  %v5824_v54 = vpop.f32.mrf.mxu1 }
 0x323   : > { %v2119_v56 = vsel %vm2007_vm4, %v5822_v53, -inf  ;;  %v2032_v59 = vsel %vm2007_vm4, %v5824_v54, -inf }
 0x324   : > { %v5830_v57 = vpop.f32.mrf.mxu1  ;;  %v5832_v58 = vpop.f32.mrf.mxu0 }
 0x325   : > { %v2041_v60 = vsel %vm2007_vm4, %v5830_v57, -inf  ;;  %v2134_v62 = vsel %vm2007_vm4, %v5832_v58, -inf }
 0x326   : > { %2021 = vmax.xlane.f32.xlu1 %v2020_v43  ;;  %2030 = vmax.xlane.f32.xlu0 %v2029_v44  ;;  %v5838_v61 = vpop.f32.mrf.mxu1  ;;  %v5842_v63 = vpop.f32.mrf.mxu0 }
 0x327   : > { %v2035_v0 = vsel %vm2007_vm4, %v5838_v61, -inf  ;;  %v2128_v2 = vsel %vm2007_vm4, %v5842_v63, -inf }
 0x328   : > { %v5846_v1 = vpop.f32.mrf.mxu1  ;;  %v5852_v5 = vpop.f32.mrf.mxu0 }
 0x329   : > { %v2050_v4 = vsel %vm2007_vm4, %v5846_v1, -inf  ;;  %v2137_v8 = vsel %vm2007_vm4, %v5852_v5, -inf }
 0x32a   : > { %2123 = vmax.xlane.f32.xlu1 %v2122_v47  ;;  %2024 = vmax.xlane.f32.xlu0 %v2023_v48  ;;  %v5854_v6 = vpop.f32.mrf.mxu1  ;;  %v5856_v7 = vpop.f32.mrf.mxu0 }
 0x32b   : > { %v2044_v9 = vsel %vm2007_vm4, %v5854_v6, -inf  ;;  %v2131_v12 = vsel %vm2007_vm4, %v5856_v7, -inf }
 0x32c   : > { %v5862_v10 = vpop.f32.mrf.mxu1  ;;  %v5864_v11 = vpop.f32.mrf.mxu0 }
 0x32d   : > { %8186 = vst [vmem:[#allocation13_spill] sm:$0xff] %v5862_v10  ;;  %8187 = vst [vmem:[#allocation14_spill] sm:$0xff] %v5864_v11  ;;  %v2053_v13 = vsel %vm2007_vm4, %v5862_v10, -inf  ;;  %v2146_v16 = vsel %vm2007_vm4, %v5864_v11, -inf }
 0x32e   : > { %2117 = vmax.xlane.f32.xlu1 %v2116_v51  ;;  %2126 = vmax.xlane.f32.xlu0 %v2125_v52  ;;  %v5870_v14 = vpop.f32.mrf.mxu1  ;;  %v5872_v15 = vpop.f32.mrf.mxu0 }
 0x32f   : > { %8188 = vst [vmem:[#allocation15_spill] sm:$0xff] %v5870_v14  ;;  %8189 = vst [vmem:[#allocation16_spill] sm:$0xff] %v5872_v15  ;;  %v2047_v17 = vsel %vm2007_vm4, %v5870_v14, -inf  ;;  %v2140_v21 = vsel %vm2007_vm4, %v5872_v15, -inf }
 0x330   : > { %v5878_v18 = vpop.f32.mrf.mxu0  ;;  %v5880_v19 = vpop.f32.mrf.mxu1 }
 0x331   : > { %8190 = vst [vmem:[#allocation17_spill] sm:$0xff] %v5878_v18  ;;  %8191 = vst [vmem:[#allocation18_spill] sm:$0xff] %v5880_v19  ;;  %v2149_v25 = vsel %vm2007_vm4, %v5878_v18, -inf  ;;  %v2062_v30 = vsel %vm2007_vm4, %v5880_v19, -inf }
 0x332   : > { %2120 = vmax.xlane.f32.xlu0 %v2119_v56  ;;  %2039 = vmax.xlane.f32.xlu1 %v2038_v55  ;;  %v5886_v26 = vpop.f32.mrf.mxu0  ;;  %v5888_v29 = vpop.f32.mrf.mxu1 }
 0x333   : > { %8192 = vst [vmem:[#allocation19_spill] sm:$0xff] %v5886_v26  ;;  %8193 = vst [vmem:[#allocation20_spill] sm:$0xff] %v5888_v29  ;;  %v2143_v33 = vsel %vm2007_vm4, %v5886_v26, -inf  ;;  %v2056_v39 = vsel %vm2007_vm4, %v5888_v29, -inf }
 0x334   : > { %v5894_v34 = vpop.f32.mrf.mxu1  ;;  %v5896_v38 = vpop.f32.mrf.mxu0 }
 0x335   : > { %8194 = vst [vmem:[#allocation21_spill] sm:$0xff] %v5894_v34  ;;  %8195 = vst [vmem:[#allocation22_spill] sm:$0xff] %v5896_v38  ;;  %v2065_v43 = vsel %vm2007_vm4, %v5894_v34, -inf  ;;  %v2158_v48 = vsel %vm2007_vm4, %v5896_v38, -inf }
 0x336   : > { %2033 = vmax.xlane.f32.xlu1 %v2032_v59  ;;  %2042 = vmax.xlane.f32.xlu0 %v2041_v60  ;;  %v5902_v44 = vpop.f32.mrf.mxu1  ;;  %v5904_v47 = vpop.f32.mrf.mxu0 }
 0x337   : > { %8196 = vst [vmem:[#allocation23_spill] sm:$0xff] %v5902_v44  ;;  %8197 = vst [vmem:[#allocation24_spill] sm:$0xff] %v5904_v47  ;;  %v2059_v51 = vsel %vm2007_vm4, %v5902_v44, -inf  ;;  %v2152_v56 = vsel %vm2007_vm4, %v5904_v47, -inf }
 0x338   : > { %v5910_v52 = vpop.f32.mrf.mxu0  ;;  %v5912_v55 = vpop.f32.mrf.mxu1 }
 0x339   : > { %8198 = vst [vmem:[#allocation25_spill] sm:$0xff] %v5910_v52  ;;  %8199 = vst [vmem:[#allocation26_spill] sm:$0xff] %v5912_v55  ;;  %v2161_v59 = vsel %vm2007_vm4, %v5910_v52, -inf }
 0x33a   : > { %2135 = vmax.xlane.f32.xlu1 %v2134_v62  ;;  %2036 = vmax.xlane.f32.xlu0 %v2035_v0  ;;  %v5918_v60 = vpop.f32.mrf.mxu0  ;;  %v5920_v62 = vpop.f32.mrf.mxu1  ;;  %v2074_v0 = vsel %vm2007_vm4, %v5912_v55, -inf }
 0x33b   : > { %8200 = vst [vmem:[#allocation27_spill] sm:$0xff] %v5918_v60  ;;  %8201 = vst [vmem:[#allocation28_spill] sm:$0xff] %v5920_v62 }
 0x33e   : > { %2129 = vmax.xlane.f32.xlu1 %v2128_v2  ;;  %2051 = vmax.xlane.f32.xlu0 %v2050_v4  ;;  %v2155_v2 = vsel %vm2007_vm4, %v5918_v60, -inf  ;;  %v5926_v4 = vpop.f32.mrf.mxu1 }
 0x33f   : > { %8202 = vst [vmem:[#allocation29_spill] sm:$0xff] %v5926_v4 }
 0x342   : > { %2138 = vmax.xlane.f32.xlu0 %v2137_v8  ;;  %2045 = vmax.xlane.f32.xlu1 %v2044_v9  ;;  %v5928_v8 = vpop.f32.mrf.mxu0  ;;  %v2068_v9 = vsel %vm2007_vm4, %v5920_v62, -inf }
 0x343   : > { %8203 = vst [vmem:[#allocation30_spill] sm:$0xff] %v5928_v8 }
 0x346   : > { %2132 = vmax.xlane.f32.xlu0 %v2131_v12  ;;  %2054 = vmax.xlane.f32.xlu1 %v2053_v13  ;;  %v2077_v12 = vsel %vm2007_vm4, %v5926_v4, -inf  ;;  %v5934_v13 = vpop.f32.mrf.mxu1 }
 0x347   : > { %8204 = vst [vmem:[#allocation31_spill] sm:$0xff] %v5934_v13 }
 0x34a   : > { %2147 = vmax.xlane.f32.xlu1 %v2146_v16  ;;  %2048 = vmax.xlane.f32.xlu0 %v2047_v17  ;;  %v5936_v16 = vpop.f32.mrf.mxu0  ;;  %v2170_v17 = vsel %vm2007_vm4, %v5928_v8, -inf }
 0x34b   : > { %8205 = vst [vmem:[#allocation32_spill] sm:$0xff] %v5936_v16 }
 0x34e   : > { %2141 = vmax.xlane.f32.xlu1 %v2140_v21  ;;  %2150 = vmax.xlane.f32.xlu0 %v2149_v25  ;;  %v2071_v21 = vsel %vm2007_vm4, %v5934_v13, -inf  ;;  %v5942_v25 = vpop.f32.mrf.mxu0 }
 0x34f   : > { %8206 = vst [vmem:[#allocation33_spill] sm:$0xff] %v5942_v25 }
 0x352   : > { %2144 = vmax.xlane.f32.xlu0 %v2143_v33  ;;  %2063 = vmax.xlane.f32.xlu1 %v2062_v30  ;;  %v5944_v30 = vpop.f32.mrf.mxu1  ;;  %v2164_v33 = vsel %vm2007_vm4, %v5936_v16, -inf }
 0x353   : > { %8207 = vst [vmem:[#allocation34_spill] sm:$0xff] %v5944_v30 }
 0x356   : > { %2057 = vmax.xlane.f32.xlu1 %v2056_v39  ;;  %2066 = vmax.xlane.f32.xlu0 %v2065_v43  ;;  %v2173_v39 = vsel %vm2007_vm4, %v5942_v25, -inf  ;;  %v5950_v43 = vpop.f32.mrf.mxu0 }
 0x357   : > { %8208 = vst [vmem:[#allocation35_spill] sm:$0xff] %v5950_v43 }
 0x35a   : > { %2159 = vmax.xlane.f32.xlu1 %v2158_v48  ;;  %2060 = vmax.xlane.f32.xlu0 %v2059_v51  ;;  %v5952_v48 = vpop.f32.mrf.mxu1  ;;  %v2086_v51 = vsel %vm2007_vm4, %v5944_v30, -inf }
 0x35b   : > { %8209 = vst [vmem:[#allocation36_spill] sm:$0xff] %v5952_v48 }
 0x35e   : > { %2153 = vmax.xlane.f32.xlu1 %v2152_v56  ;;  %2162 = vmax.xlane.f32.xlu0 %v2161_v59  ;;  %v2167_v56 = vsel %vm2007_vm4, %v5950_v43, -inf  ;;  %v5958_v59 = vpop.f32.mrf.mxu1 }
 0x35f   : > { %8210 = vst [vmem:[#allocation37_spill] sm:$0xff] %v5958_v59 }
 0x362   : > { %2156 = vmax.xlane.f32.xlu0 %v2155_v2  ;;  %2075 = vmax.xlane.f32.xlu1 %v2074_v0  ;;  %v5960_v0 = vpop.f32.mrf.mxu0  ;;  %v2080_v2 = vsel %vm2007_vm4, %v5952_v48, -inf }
 0x363   : > { %8211 = vst [vmem:[#allocation38_spill] sm:$0xff] %v5960_v0 }
 0x366   : > { %2069 = vmax.xlane.f32.xlu1 %v2068_v9  ;;  %2078 = vmax.xlane.f32.xlu0 %v2077_v12  ;;  %v2089_v9 = vsel %vm2007_vm4, %v5958_v59, -inf  ;;  %v5966_v12 = vpop.f32.mrf.mxu1 }
 0x367   : > { %8212 = vst [vmem:[#allocation39_spill] sm:$0xff] %v5966_v12 }
 0x36a   : > { %2171 = vmax.xlane.f32.xlu1 %v2170_v17  ;;  %2072 = vmax.xlane.f32.xlu0 %v2071_v21  ;;  %v5968_v17 = vpop.f32.mrf.mxu0  ;;  %v2182_v21 = vsel %vm2007_vm4, %v5960_v0, -inf }
 0x36b   : > { %8213 = vst [vmem:[#allocation40_spill] sm:$0xff] %v5968_v17 }
 0x36e   : > { %2165 = vmax.xlane.f32.xlu1 %v2164_v33  ;;  %2174 = vmax.xlane.f32.xlu0 %v2173_v39  ;;  %v2083_v33 = vsel %vm2007_vm4, %v5966_v12, -inf  ;;  %v5974_v39 = vpop.f32.mrf.mxu1 }
 0x36f   : > { %8214 = vst [vmem:[#allocation41_spill] sm:$0xff] %v5974_v39 }
 0x372   : > { %2168 = vmax.xlane.f32.xlu0 %v2167_v56  ;;  %2087 = vmax.xlane.f32.xlu1 %v2086_v51  ;;  %v5976_v51 = vpop.f32.mrf.mxu0  ;;  %v2176_v56 = vsel %vm2007_vm4, %v5968_v17, -inf }
 0x373   : > { %8215 = vst [vmem:[#allocation42_spill] sm:$0xff] %v5976_v51  ;;  %v2185_v35 = vsel %vm2007_vm4, %v5976_v51, -inf }
 0x374   : > { %v5984_v3 = vpop.f32.mrf.mxu0 }
 0x375   : > { %8217 = vst [vmem:[#allocation44_spill] sm:$0xff] %v5984_v3 }
 0x376   : > { %2081 = vmax.xlane.f32.xlu1 %v2080_v2  ;;  %2090 = vmax.xlane.f32.xlu0 %v2089_v9  ;;  %v2098_v2 = vsel %vm2007_vm4, %v5974_v39, -inf  ;;  %v5982_v9 = vpop.f32.mrf.mxu1  ;;  %v5986_v40 = vpop.f32.mrf.mxu0 }
 0x377   : > { %8216 = vst [vmem:[#allocation43_spill] sm:$0xff] %v5982_v9  ;;  %8218 = vst [vmem:[#allocation45_spill] sm:$0xff] %v5986_v40  ;;  %v2194_v39 = vsel %vm2007_vm4, %v5986_v40, -inf }
 0x378   : > { %v5996_v12 = vpop.f32.mrf.mxu0 }
 0x379   : > { %8220 = vst [vmem:[#allocation47_spill] sm:$0xff] %v5996_v12  ;;  %v2188_v51 = vsel %vm2007_vm4, %v5996_v12, -inf }
 0x37a   : > { %2183 = vmax.xlane.f32.xlu1 %v2182_v21  ;;  %2084 = vmax.xlane.f32.xlu0 %v2083_v33  ;;  %v2092_v21 = vsel %vm2007_vm4, %v5982_v9, -inf  ;;  %v5992_v33 = vpop.f32.mrf.mxu1 }
 0x37b   : > { %8219 = vst [vmem:[#allocation46_spill] sm:$0xff] %v5992_v33 }
 0x37e   : > { %2177 = vmax.xlane.f32.xlu1 %v2176_v56  ;;  %2099 = vmax.xlane.f32.xlu0 %v2098_v2  ;;  %v2179_v56 = vsel %vm2007_vm4, %v5984_v3, -inf  ;;  %v6000_v2 = vpop.f32.mrf.mxu1 }
 0x37f   : > { %8221 = vst [vmem:[#allocation48_spill] sm:$0xff] %v6000_v2 }
 0x380   : > { %v6004_v9 = vpop.f32.mrf.mxu1 }
 0x381   : > { %8222 = vst [vmem:[#allocation49_spill] sm:$0xff] %v6004_v9  ;;  %v2206_v40 = vsel %vm2007_vm4, %v6004_v9, -inf }
 0x382   : > { %2186 = vmax.xlane.f32.xlu0 %v2185_v35  ;;  %2093 = vmax.xlane.f32.xlu1 %v2092_v21  ;;  %v2101_v35 = vsel %vm2007_vm4, %v5992_v33, -inf  ;;  %v6008_v21 = vpop.f32.mrf.mxu0  ;;  %v6012_v3 = vpop.f32.mrf.mxu1 }
 0x383   : > { %8223 = vst [vmem:[#allocation50_spill] sm:$0xff] %v6008_v21  ;;  %8224 = vst [vmem:[#allocation51_spill] sm:$0xff] %v6012_v3  ;;  %v2200_v12 = vsel %vm2007_vm4, %v6012_v3, -inf }
 0x386   : > { %2180 = vmax.xlane.f32.xlu0 %v2179_v56  ;;  %2195 = vmax.xlane.f32.xlu1 %v2194_v39  ;;  %v2095_v39 = vsel %vm2007_vm4, %v6000_v2, -inf  ;;  %v6016_v56 = vpop.f32.mrf.mxu0 }
 0x387   : > { %8225 = vst [vmem:[#allocation52_spill] sm:$0xff] %v6016_v56 }
 0x388   : > { %v6020_v33 = vpop.f32.mrf.mxu0 }
 0x389   : > { %8226 = vst [vmem:[#allocation53_spill] sm:$0xff] %v6020_v33  ;;  %v2302_v9 = vsel %vm2007_vm4, %v6020_v33, -inf }
 0x38a   : > { %2189 = vmax.xlane.f32.xlu1 %v2188_v51  ;;  %2102 = vmax.xlane.f32.xlu0 %v2101_v35  ;;  %v2197_v51 = vsel %vm2007_vm4, %v6008_v21, -inf  ;;  %v6024_v35 = vpop.f32.mrf.mxu1  ;;  %v6028_v2 = vpop.f32.mrf.mxu0 }
 0x38b   : > { %8227 = vst [vmem:[#allocation54_spill] sm:$0xff] %v6024_v35  ;;  %8228 = vst [vmem:[#allocation55_spill] sm:$0xff] %v6028_v2  ;;  %v2296_v3 = vsel %vm2007_vm4, %v6028_v2, -inf }
 0x38e   : > { %2096 = vmax.xlane.f32.xlu0 %v2095_v39  ;;  %2207 = vmax.xlane.f32.xlu1 %v2206_v40  ;;  %v2191_v40 = vsel %vm2007_vm4, %v6016_v56, -inf  ;;  %v6032_v39 = vpop.f32.mrf.mxu1 }
 0x38f   : > { %8229 = vst [vmem:[#allocation56_spill] sm:$0xff] %v6032_v39 }
 0x390   : > { %v6036_v21 = vpop.f32.mrf.mxu1 }
 0x391   : > { %8230 = vst [vmem:[#allocation57_spill] sm:$0xff] %v6036_v21  ;;  %v2218_v56 = vsel %vm2007_vm4, %v6036_v21, -inf }
 0x392   : > { %2198 = vmax.xlane.f32.xlu0 %v2197_v51  ;;  %2201 = vmax.xlane.f32.xlu1 %v2200_v12  ;;  %v2209_v12 = vsel %vm2007_vm4, %v6024_v35, -inf  ;;  %v6040_v51 = vpop.f32.mrf.mxu0  ;;  %v6046_v17 = vpop.f32.mrf.mxu1 }
 0x393   : > { %8231 = vst [vmem:[#allocation58_spill] sm:$0xff] %v6040_v51  ;;  %8232 = vst [vmem:[#allocation59_spill] sm:$0xff] %v6046_v17  ;;  %v2305_v21 = vsel %vm2007_vm4, %v6040_v51, -inf }
 0x394   : > { %v6062_v59 = vpop.f32.mrf.mxu1 }
 0x395   : > { %8235 = vst [vmem:[#allocation62_spill] sm:$0xff] %v6062_v59 }
 0x396   : > { %2192 = vmax.xlane.f32.xlu0 %v2191_v40  ;;  %2303 = vmax.xlane.f32.xlu1 %v2302_v9  ;;  %v2203_v9 = vsel %vm2007_vm4, %v6032_v39, -inf  ;;  %v6050_v40 = vpop.f32.mrf.mxu0  ;;  %v6074_v43 = vpop.f32.mrf.mxu1 }
 0x397   : > { %8233 = vst [vmem:[#allocation60_spill] sm:$0xff] %v6050_v40  ;;  %8237 = vst [vmem:[#allocation64_spill] sm:$0xff] %v6074_v43 }
 0x398   : > { %v6082_v48 = vpop.f32.mrf.mxu1 }
 0x399   : > { %8238 = vst [vmem:[#allocation65_spill] sm:$0xff] %v6082_v48 }
 0x39a   : > { %2297 = vmax.xlane.f32.xlu1 %v2296_v3  ;;  %2210 = vmax.xlane.f32.xlu0 %v2209_v12  ;;  %v2212_v3 = vsel %vm2007_vm4, %v6046_v17, -inf  ;;  %v6058_v12 = vpop.f32.mrf.mxu0  ;;  %v2299_v17 = vsel %vm2007_vm4, %v6050_v40, -inf  ;;  %v6094_v30 = vpop.f32.mrf.mxu1 }
 0x39b   : > { %v6042_v33 = vpop.xlane.xlu1 %2015  ;;  %8234 = vst [vmem:[#allocation61_spill] sm:$0xff] %v6058_v12  ;;  %8240 = vst [vmem:[#allocation67_spill] sm:$0xff] %v6094_v30 }
 0x39c   : > { %v6070_v0 = vpop.f32.mrf.mxu0  ;;  %v6110_v4 = vpop.f32.mrf.mxu1 }
 0x39d   : > { %8236 = vst [vmem:[#allocation63_spill] sm:$0xff] %v6070_v0  ;;  %v2308_v51 = vsel %vm2007_vm4, %v6070_v0, -inf  ;;  %v2215_v0 = vsel %vm2007_vm4, %v6074_v43, -inf  ;;  %8243 = vst [vmem:[#allocation70_spill] sm:$0xff] %v6110_v4 }
 0x39e   : > { %2204 = vmax.xlane.f32.xlu0 %v2203_v9  ;;  %2219 = vmax.xlane.f32.xlu1 %v2218_v56  ;;  %v2314_v56 = vsel %vm2007_vm4, %v6058_v12, -inf  ;;  %v2221_v12 = vsel %vm2007_vm4, %v6062_v59, -inf  ;;  %v6086_v25 = vpop.f32.mrf.mxu0  ;;  %v6122_v60 = vpop.f32.mrf.mxu1 }
 0x39f   : > { %v6052_v2 = vpop.xlane.xlu1 %2009  ;;  %v6054_v35 = vpop.xlane.xlu0 %2018  ;;  %8239 = vst [vmem:[#allocation66_spill] sm:$0xff] %v6086_v25  ;;  %8245 = vst [vmem:[#allocation72_spill] sm:$0xff] %v6122_v60 }
 0x3a0   : > { %v6098_v13 = vpop.f32.mrf.mxu0  ;;  %v6130_v62 = vpop.f32.mrf.mxu1 }
 0x3a1   : > { %8241 = vst [vmem:[#allocation68_spill] sm:$0xff] %v6098_v13  ;;  %8246 = vst [vmem:[#allocation73_spill] sm:$0xff] %v6130_v62 }
 0x3a2   : > { %2306 = vmax.xlane.f32.xlu0 %v2305_v21  ;;  %2213 = vmax.xlane.f32.xlu1 %v2212_v3  ;;  %v6106_v16 = vpop.f32.mrf.mxu0  ;;  %v6142_v55 = vpop.f32.mrf.mxu1 }
 0x3a3   : > { %v6064_v39 = vpop.xlane.xlu1 %2111  ;;  %v6066_v9 = vpop.xlane.xlu0 %2012  ;;  %8242 = vst [vmem:[#allocation69_spill] sm:$0xff] %v6106_v16  ;;  %8248 = vst [vmem:[#allocation75_spill] sm:$0xff] %v6142_v55 }
 0x3a4   : > { %v6118_v8 = vpop.f32.mrf.mxu0  ;;  %v6158_v34 = vpop.f32.mrf.mxu1 }
 0x3a5   : > { %8244 = vst [vmem:[#allocation71_spill] sm:$0xff] %v6118_v8  ;;  %8251 = vst [vmem:[#allocation78_spill] sm:$0xff] %v6158_v34 }
 0x3a6   : > { %2315 = vmax.xlane.f32.xlu1 %v2314_v56  ;;  %2300 = vmax.xlane.f32.xlu0 %v2299_v17  ;;  %v2230_v17 = vsel %vm2007_vm4, %v6082_v48, -inf  ;;  %v2317_v48 = vsel %vm2007_vm4, %v6086_v25, -inf  ;;  %v6134_v52 = vpop.f32.mrf.mxu0  ;;  %v6170_v26 = vpop.f32.mrf.mxu1 }
 0x3a7   : > { %v6076_v21 = vpop.xlane.xlu1 %2105  ;;  %v6078_v3 = vpop.xlane.xlu0 %2114  ;;  %8247 = vst [vmem:[#allocation74_spill] sm:$0xff] %v6134_v52  ;;  %8253 = vst [vmem:[#allocation80_spill] sm:$0xff] %v6170_v26 }
 0x3a8   : > { %v6146_v44 = vpop.f32.mrf.mxu0  ;;  %v6178_v29 = vpop.f32.mrf.mxu1 }
 0x3a9   : > { %8249 = vst [vmem:[#allocation76_spill] sm:$0xff] %v6146_v44  ;;  %8254 = vst [vmem:[#allocation81_spill] sm:$0xff] %v6178_v29 }
 0x3aa   : > { %2309 = vmax.xlane.f32.xlu1 %v2308_v51  ;;  %2222 = vmax.xlane.f32.xlu0 %v2221_v12  ;;  %v2224_v12 = vsel %vm2007_vm4, %v6094_v30, -inf  ;;  %v2311_v30 = vsel %vm2007_vm4, %v6098_v13, -inf  ;;  %v6154_v47 = vpop.f32.mrf.mxu0  ;;  %v6190_v19 = vpop.f32.mrf.mxu1 }
 0x3ab   : > { %v6088_v40 = vpop.xlane.xlu1 %2027  ;;  %v6090_v56 = vpop.xlane.xlu0 %2108  ;;  %8250 = vst [vmem:[#allocation77_spill] sm:$0xff] %v6154_v47  ;;  %8256 = vst [vmem:[#allocation83_spill] sm:$0xff] %v6190_v19 }
 0x3ac   : > { %v6166_v38 = vpop.f32.mrf.mxu0  ;;  %v6206_v10 = vpop.f32.mrf.mxu1 }
 0x3ad   : > { %8252 = vst [vmem:[#allocation79_spill] sm:$0xff] %v6166_v38  ;;  %8260 = vst [vmem:[#allocation87_spill] sm:$0xff] %v6206_v10 }
 0x3ae   : > { %2231 = vmax.xlane.f32.xlu1 %v2230_v17  ;;  %2216 = vmax.xlane.f32.xlu0 %v2215_v0  ;;  %v2326_v0 = vsel %vm2007_vm4, %v6106_v16, -inf  ;;  %v2233_v16 = vsel %vm2007_vm4, %v6110_v4, -inf  ;;  %v6182_v18 = vpop.f32.mrf.mxu0  ;;  %v6218_v11 = vpop.f32.mrf.mxu1 }
 0x3af   : > { %v6100_v59 = vpop.xlane.xlu1 %2021  ;;  %v6102_v51 = vpop.xlane.xlu0 %2030  ;;  %8255 = vst [vmem:[#allocation82_spill] sm:$0xff] %v6182_v18  ;;  %8264 = vst [vmem:[#allocation91_spill] sm:$0xff] %v6218_v11 }
 0x3b0   : > { %v6194_v14 = vpop.f32.mrf.mxu0 }
 0x3b1   : > { %8257 = vst [vmem:[#allocation84_spill] sm:$0xff] %v6194_v14 }
 0x3b2   : > { %2225 = vmax.xlane.f32.xlu1 %v2224_v12  ;;  %2318 = vmax.xlane.f32.xlu0 %v2317_v48  ;;  %v2320_v48 = vsel %vm2007_vm4, %v6118_v8, -inf  ;;  %v2227_v8 = vsel %vm2007_vm4, %v6122_v60, -inf  ;;  %v6202_v15 = vpop.f32.mrf.mxu0 }
 0x3b3   : > { %v6112_v43 = vpop.xlane.xlu1 %2123  ;;  %v6114_v17 = vpop.xlane.xlu0 %2024  ;;  %8259 = vst [vmem:[#allocation86_spill] sm:$0xff] %v6202_v15 }
 0x3b6   : > { %2327 = vmax.xlane.f32.xlu1 %v2326_v0  ;;  %2312 = vmax.xlane.f32.xlu0 %v2311_v30  ;;  %v2242_v30 = vsel %vm2007_vm4, %v6130_v62, -inf  ;;  %v2329_v62 = vsel %vm2007_vm4, %v6134_v52, -inf }
 0x3b7   : > { %v6124_v12 = vpop.xlane.xlu1 %2117  ;;  %v6126_v25 = vpop.xlane.xlu0 %2126 }
 0x3ba   : > { %2321 = vmax.xlane.f32.xlu1 %v2320_v48  ;;  %2234 = vmax.xlane.f32.xlu0 %v2233_v16  ;;  %v2236_v16 = vsel %vm2007_vm4, %v6142_v55, -inf  ;;  %v2323_v55 = vsel %vm2007_vm4, %v6146_v44, -inf }
 0x3bb   : > { %v6136_v13 = vpop.xlane.xlu1 %2039  ;;  %v6138_v0 = vpop.xlane.xlu0 %2120 }
 0x3be   : > { %2243 = vmax.xlane.f32.xlu1 %v2242_v30  ;;  %2228 = vmax.xlane.f32.xlu0 %v2227_v8  ;;  %v2338_v8 = vsel %vm2007_vm4, %v6154_v47, -inf  ;;  %v2245_v47 = vsel %vm2007_vm4, %v6158_v34, -inf }
 0x3bf   : > { %v6148_v4 = vpop.xlane.xlu1 %2033  ;;  %v6150_v48 = vpop.xlane.xlu0 %2042 }
 0x3c2   : > { %2237 = vmax.xlane.f32.xlu1 %v2236_v16  ;;  %2330 = vmax.xlane.f32.xlu0 %v2329_v62  ;;  %v2332_v62 = vsel %vm2007_vm4, %v6166_v38, -inf  ;;  %v2239_v38 = vsel %vm2007_vm4, %v6170_v26, -inf }
 0x3c3   : > { %v6160_v60 = vpop.xlane.xlu1 %2135  ;;  %v6162_v30 = vpop.xlane.xlu0 %2036 }
 0x3c6   : > { %2339 = vmax.xlane.f32.xlu1 %v2338_v8  ;;  %2324 = vmax.xlane.f32.xlu0 %v2323_v55  ;;  %v2254_v55 = vsel %vm2007_vm4, %v6178_v29, -inf  ;;  %v2341_v29 = vsel %vm2007_vm4, %v6182_v18, -inf }
 0x3c7   : > { %v6172_v16 = vpop.xlane.xlu1 %2129  ;;  %v6174_v52 = vpop.xlane.xlu0 %2051 }
 0x3ca   : > { %2333 = vmax.xlane.f32.xlu1 %v2332_v62  ;;  %2246 = vmax.xlane.f32.xlu0 %v2245_v47  ;;  %v2248_v47 = vsel %vm2007_vm4, %v6190_v19, -inf  ;;  %v2335_v19 = vsel %vm2007_vm4, %v6194_v14, -inf }
 0x3cb   : > { %v6184_v44 = vpop.xlane.xlu1 %2045  ;;  %v6186_v8 = vpop.xlane.xlu0 %2138 }
 0x3ce   : > { %2255 = vmax.xlane.f32.xlu1 %v2254_v55  ;;  %2240 = vmax.xlane.f32.xlu0 %v2239_v38  ;;  %v2350_v38 = vsel %vm2007_vm4, %v6202_v15, -inf  ;;  %v2257_v15 = vsel %vm2007_vm4, %v6206_v10, -inf }
 0x3cf   : > { %v6196_v34 = vpop.xlane.xlu1 %2054  ;;  %v6198_v62 = vpop.xlane.xlu0 %2132 }
 0x3d0   : > { %8258 = vst [vmem:[#allocation85_spill] sm:$0xff] %v6196_v34  ;;  %v6214_v34 = vpop.f32.mrf.mxu0 }
 0x3d1   : > { %8263 = vst [vmem:[#allocation90_spill] sm:$0xff] %v6214_v34 }
 0x3d2   : > { %2249 = vmax.xlane.f32.xlu1 %v2248_v47  ;;  %2342 = vmax.xlane.f32.xlu0 %v2341_v29  ;;  %v2344_v29 = vsel %vm2007_vm4, %v6214_v34, -inf  ;;  %v2251_v34 = vsel %vm2007_vm4, %v6218_v11, -inf }
 0x3d3   : > { %v6208_v26 = vpop.xlane.xlu1 %2147  ;;  %v6210_v55 = vpop.xlane.xlu0 %2048 }
 0x3d4   : > { %8261 = vst [vmem:[#allocation88_spill] sm:$0xff] %v6208_v26  ;;  %8262 = vst [vmem:[#allocation89_spill] sm:$0xff] %v6210_v55  ;;  %v6226_v55 = vpop.f32.mrf.mxu1  ;;  %v6230_v26 = vpop.f32.mrf.mxu0 }
 0x3d5   : > { %8267 = vst [vmem:[#allocation94_spill] sm:$0xff] %v6226_v55  ;;  %8268 = vst [vmem:[#allocation95_spill] sm:$0xff] %v6230_v26 }
 0x3d6   : > { %2351 = vmax.xlane.f32.xlu1 %v2350_v38  ;;  %2336 = vmax.xlane.f32.xlu0 %v2335_v19  ;;  %v2266_v19 = vsel %vm2007_vm4, %v6226_v55, -inf  ;;  %v2353_v55 = vsel %vm2007_vm4, %v6230_v26, -inf }
 0x3d7   : > { %v6220_v47 = vpop.xlane.xlu1 %2141  ;;  %v6222_v18 = vpop.xlane.xlu0 %2150 }
 0x3d8   : > { %8265 = vst [vmem:[#allocation92_spill] sm:$0xff] %v6220_v47  ;;  %8266 = vst [vmem:[#allocation93_spill] sm:$0xff] %v6222_v18  ;;  %v6238_v18 = vpop.f32.mrf.mxu1  ;;  %v6242_v47 = vpop.f32.mrf.mxu0 }
 0x3d9   : > { %8271 = vst [vmem:[#allocation98_spill] sm:$0xff] %v6238_v18  ;;  %8272 = vst [vmem:[#allocation99_spill] sm:$0xff] %v6242_v47 }
 0x3da   : > { %2345 = vmax.xlane.f32.xlu1 %v2344_v29  ;;  %2258 = vmax.xlane.f32.xlu0 %v2257_v15  ;;  %v2260_v15 = vsel %vm2007_vm4, %v6238_v18, -inf  ;;  %v2347_v18 = vsel %vm2007_vm4, %v6242_v47, -inf }
 0x3db   : > { %v6232_v14 = vpop.xlane.xlu1 %2063  ;;  %v6234_v38 = vpop.xlane.xlu0 %2144 }
 0x3dc   : > { %8269 = vst [vmem:[#allocation96_spill] sm:$0xff] %v6232_v14  ;;  %8270 = vst [vmem:[#allocation97_spill] sm:$0xff] %v6234_v38  ;;  %v6250_v38 = vpop.f32.mrf.mxu0  ;;  %v6254_v14 = vpop.f32.mrf.mxu1 }
 0x3dd   : > { %8275 = vst [vmem:[#allocation102_spill] sm:$0xff] %v6250_v38  ;;  %8276 = vst [vmem:[#allocation103_spill] sm:$0xff] %v6254_v14 }
 0x3de   : > { %2267 = vmax.xlane.f32.xlu1 %v2266_v19  ;;  %2252 = vmax.xlane.f32.xlu0 %v2251_v34  ;;  %v2362_v34 = vsel %vm2007_vm4, %v6250_v38, -inf  ;;  %v2269_v38 = vsel %vm2007_vm4, %v6254_v14, -inf }
 0x3df   : > { %v6244_v10 = vpop.xlane.xlu1 %2057  ;;  %v6246_v29 = vpop.xlane.xlu0 %2066 }
 0x3e0   : > { %8273 = vst [vmem:[#allocation100_spill] sm:$0xff] %v6244_v10  ;;  %8274 = vst [vmem:[#allocation101_spill] sm:$0xff] %v6246_v29  ;;  %v6262_v29 = vpop.f32.mrf.mxu0  ;;  %v6266_v10 = vpop.f32.mrf.mxu1 }
 0x3e1   : > { %8279 = vst [vmem:[#allocation106_spill] sm:$0xff] %v6262_v29  ;;  %8280 = vst [vmem:[#allocation107_spill] sm:$0xff] %v6266_v10 }
 0x3e2   : > { %2261 = vmax.xlane.f32.xlu1 %v2260_v15  ;;  %2354 = vmax.xlane.f32.xlu0 %v2353_v55  ;;  %v2356_v55 = vsel %vm2007_vm4, %v6262_v29, -inf  ;;  %v2263_v29 = vsel %vm2007_vm4, %v6266_v10, -inf }
 0x3e3   : > { %v6256_v11 = vpop.xlane.xlu1 %2159  ;;  %v6258_v19 = vpop.xlane.xlu0 %2060 }
 0x3e4   : > { %8277 = vst [vmem:[#allocation104_spill] sm:$0xff] %v6256_v11  ;;  %8278 = vst [vmem:[#allocation105_spill] sm:$0xff] %v6258_v19  ;;  %v6274_v19 = vpop.f32.mrf.mxu1  ;;  %v6278_v11 = vpop.f32.mrf.mxu0 }
 0x3e5   : > { %8283 = vst [vmem:[#allocation110_spill] sm:$0xff] %v6274_v19  ;;  %8284 = vst [vmem:[#allocation111_spill] sm:$0xff] %v6278_v11 }
 0x3e6   : > { %2363 = vmax.xlane.f32.xlu1 %v2362_v34  ;;  %2348 = vmax.xlane.f32.xlu0 %v2347_v18  ;;  %v2278_v18 = vsel %vm2007_vm4, %v6274_v19, -inf  ;;  %v2365_v19 = vsel %vm2007_vm4, %v6278_v11, -inf }
 0x3e7   : > { %v6268_v15 = vpop.xlane.xlu1 %2153  ;;  %v6270_v26 = vpop.xlane.xlu0 %2162 }
 0x3e8   : > { %8281 = vst [vmem:[#allocation108_spill] sm:$0xff] %v6268_v15  ;;  %8282 = vst [vmem:[#allocation109_spill] sm:$0xff] %v6270_v26  ;;  %v6286_v26 = vpop.f32.mrf.mxu1  ;;  %v6290_v15 = vpop.f32.mrf.mxu0 }
 0x3e9   : > { %8287 = vst [vmem:[#allocation114_spill] sm:$0xff] %v6286_v26  ;;  %8288 = vst [vmem:[#allocation115_spill] sm:$0xff] %v6290_v15 }
 0x3ea   : > { %2357 = vmax.xlane.f32.xlu1 %v2356_v55  ;;  %2270 = vmax.xlane.f32.xlu0 %v2269_v38  ;;  %v2272_v38 = vsel %vm2007_vm4, %v6286_v26, -inf  ;;  %v2394_v26 = vsub.f32 %v5760_v20, %v6042_v33  ;;  %v2392_v20 = vsub.f32 %v5764_v22, %v6052_v2  ;;  %v2426_v22 = vsub.f32 %v5768_v24, %v6064_v39 }
 0x3eb   : > { %v6280_v47 = vpop.xlane.xlu1 %2075  ;;  %v6282_v34 = vpop.xlane.xlu0 %2156  ;;  %v2424_v39 = vsub.f32 %v5774_v27, %v6076_v21  ;;  %v2398_v21 = vsub.f32 %v5784_v32, %v6088_v40  ;;  %v2396_v40 = vsub.f32 %v5792_v37, %v6100_v59 }
 0x3ec   : > { %8285 = vst [vmem:[#allocation112_spill] sm:$0xff] %v6280_v47  ;;  %8286 = vst [vmem:[#allocation113_spill] sm:$0xff] %v6282_v34  ;;  %v6298_v34 = vpop.f32.mrf.mxu0  ;;  %v6302_v47 = vpop.f32.mrf.mxu1  ;;  %v2588_v24 = vmul.f32 1.442695, %v2426_v22 }
 0x3ed   : > { %8291 = vst [vmem:[#allocation118_spill] sm:$0xff] %v6298_v34  ;;  %8292 = vst [vmem:[#allocation119_spill] sm:$0xff] %v6302_v47  ;;  %v2281_v33 = vsel %vm2007_vm4, %v6302_v47, -inf  ;;  %v2584_v27 = vmul.f32 1.442695, %v2424_v39 }
 0x3ee   : > { %2279 = vmax.xlane.f32.xlu1 %v2278_v18  ;;  %2264 = vmax.xlane.f32.xlu0 %v2263_v29  ;;  %v2374_v29 = vsel %vm2007_vm4, %v6298_v34, -inf  ;;  %v6316_v11 = vpop.f32.mrf.mxu1  ;;  %v2532_v32 = vmul.f32 1.442695, %v2398_v21  ;;  %v2528_v59 = vmul.f32 1.442695, %v2396_v40 }
 0x3ef   : > { %v6292_v14 = vpop.xlane.xlu1 %2069  ;;  %v6294_v55 = vpop.xlane.xlu0 %2078  ;;  %8296 = vst [vmem:[#allocation123_spill] sm:$0xff] %v6316_v11  ;;  %v2275_v2 = vsel %vm2007_vm4, %v6316_v11, -inf }
 0x3f0   : > { %8289 = vst [vmem:[#allocation116_spill] sm:$0xff] %v6292_v14  ;;  %8290 = vst [vmem:[#allocation117_spill] sm:$0xff] %v6294_v55  ;;  %v6310_v55 = vpop.f32.mrf.mxu0  ;;  %v2359_v14 = vsel %vm2007_vm4, %v6290_v15, -inf  ;;  %v6324_v34 = vpop.f32.mrf.mxu1 }
 0x3f1   : > { %8295 = vst [vmem:[#allocation122_spill] sm:$0xff] %v6310_v55  ;;  %8298 = vst [vmem:[#allocation125_spill] sm:$0xff] %v6324_v34 }
 0x3f2   : > { %2273 = vmax.xlane.f32.xlu1 %v2272_v38  ;;  %2366 = vmax.xlane.f32.xlu0 %v2365_v19  ;;  %v6330_v15 = vpop.f32.mrf.mxu0 }
 0x3f3   : > { %v6304_v10 = vpop.xlane.xlu1 %2171  ;;  %v6306_v18 = vpop.xlane.xlu0 %2072 }
 0x3f4   : > { %8293 = vst [vmem:[#allocation120_spill] sm:$0xff] %v6304_v10  ;;  %8294 = vst [vmem:[#allocation121_spill] sm:$0xff] %v6306_v18  ;;  %v2368_v18 = vsel %vm2007_vm4, %v6310_v55, -inf  ;;  %v2524_v10 = vmul.f32 1.442695, %v2394_v26  ;;  %v2290_v55 = vsel %vm2007_vm4, %v6324_v34, -inf  ;;  %v6344_v47 = vpop.f32.mrf.mxu0 }
 0x3f5   : > { %v2520_v26 = vmul.f32 1.442695, %v2392_v20  ;;  %v2371_v22 = vsel %vm2007_vm4, %v6344_v47, -inf }
 0x3f6   : > { %2375 = vmax.xlane.f32.xlu1 %v2374_v29  ;;  %2360 = vmax.xlane.f32.xlu0 %v2359_v14  ;;  %4802 = vpow2.f32 %v2524_v10  ;;  %v2395_v10 = vsub.f32 %v5766_v23, %v6054_v35  ;;  %v6354_v20 = vpop.f32.mrf.mxu0  ;;  %v2393_v35 = vsub.f32 %v5776_v28, %v6066_v9 }
 0x3f7   : > { %v6318_v19 = vpop.xlane.xlu1 %2165  ;;  %v6320_v38 = vpop.xlane.xlu0 %2174  ;;  %4804 = vpow2.f32 %v2520_v26 }
 0x3f8   : > { %8297 = vst [vmem:[#allocation124_spill] sm:$0xff] %v6320_v38  ;;  %v6338_v38 = vpop.f32.mrf.mxu1  ;;  %v2526_v23 = vmul.f32 1.442695, %v2395_v10  ;;  %v6368_v26 = vpop.f32.mrf.mxu0  ;;  %4806 = vpow2.f32 %v2588_v24  ;;  %v2522_v9 = vmul.f32 1.442695, %v2393_v35  ;;  %v2427_v24 = vsub.f32 %v5782_v31, %v6078_v3 }
 0x3f9   : > { %8299 = vst [vmem:[#allocation126_spill] sm:$0xff] %v6338_v38  ;;  %v2284_v34 = vsel %vm2007_vm4, %v6338_v38, -inf  ;;  %v2386_v38 = vsel %vm2007_vm4, %v6354_v20, -inf  ;;  %8300 = vst [vmem:[#allocation127_spill] sm:$0xff] %v6368_v26  ;;  %v2380_v28 = vsel %vm2007_vm4, %v6368_v26, -inf  ;;  %v2425_v3 = vsub.f32 %v5790_v36, %v6090_v56 }
 0x3fa   : > { %2369 = vmax.xlane.f32.xlu1 %v2368_v18  ;;  %2282 = vmax.xlane.f32.xlu0 %v2281_v33  ;;  %4808 = vpow2.f32 %v2526_v23  ;;  %v2590_v31 = vmul.f32 1.442695, %v2427_v24  ;;  %v2430_v35 = vsub.f32 %v5800_v42, %v6112_v43  ;;  %v2399_v24 = vsub.f32 %v5798_v41, %v6102_v51 }
 0x3fb   : > { %v6332_v14 = vpop.xlane.xlu1 %2087  ;;  %v6334_v29 = vpop.xlane.xlu0 %2168  ;;  %4810 = vpow2.f32 %v2584_v27  ;;  %v2586_v56 = vmul.f32 1.442695, %v2425_v3  ;;  %v2397_v3 = vsub.f32 %v5806_v45, %v6114_v17 }
 0x3fc   : > { %4812 = vpow2.f32 %v2522_v9  ;;  %v6402_v27 = vpop.f32.mrf.mxu0  ;;  %v2596_v43 = vmul.f32 1.442695, %v2430_v35  ;;  %v2534_v51 = vmul.f32 1.442695, %v2399_v24  ;;  %v2402_v35 = vsub.f32 %v5816_v50, %v6136_v13 }
 0x3fd   : > { %4814 = vpow2.f32 %v2532_v32  ;;  %8303 = vst [vmem:[#allocation130_spill] sm:$0xff] %v6402_v27  ;;  %v2389_v42 = vsel %vm2007_vm4, %v6402_v27, -inf  ;;  %v2428_v32 = vsub.f32 %v5808_v46, %v6124_v12  ;;  %v2530_v17 = vmul.f32 1.442695, %v2397_v3 }
 0x3fe   : > { %2291 = vmax.xlane.f32.xlu1 %v2290_v55  ;;  %2276 = vmax.xlane.f32.xlu0 %v2275_v2  ;;  %v2377_v55 = vsel %vm2007_vm4, %v6330_v15, -inf  ;;  %4816 = vpow2.f32 %v2590_v31  ;;  %v6418_v40 = vpop.f32.mrf.mxu0  ;;  %v2431_v24 = vsub.f32 %v5814_v49, %v6126_v25  ;;  %v2540_v13 = vmul.f32 1.442695, %v2402_v35 }
 0x3ff   : > { %v6346_v18 = vpop.xlane.xlu1 %2081  ;;  %v6348_v33 = vpop.xlane.xlu0 %2090  ;;  %4818 = vpow2.f32 %v2528_v59  ;;  %8304 = vst [vmem:[#allocation131_spill] sm:$0xff] %v6418_v40  ;;  %v2383_v46 = vsel %vm2007_vm4, %v6418_v40, -inf  ;;  %v2592_v59 = vmul.f32 1.442695, %v2428_v32  ;;  %v2400_v32 = vsub.f32 %v5824_v54, %v6148_v4 }
 0x400   : > { %4820 = vpow2.f32 %v2586_v56  ;;  %v2598_v25 = vmul.f32 1.442695, %v2431_v24  ;;  %v2429_v3 = vsub.f32 %v5822_v53, %v6138_v0  ;;  %v2434_v35 = vsub.f32 %v5832_v58, %v6160_v60 }
 0x401   : > { %4822 = vpow2.f32 %v2596_v43  ;;  %v2536_v4 = vmul.f32 1.442695, %v2400_v32  ;;  %v2403_v24 = vsub.f32 %v5830_v57, %v6150_v48  ;;  %v2432_v32 = vsub.f32 %v5842_v63, %v6172_v16 }
 0x402   : > { %2285 = vmax.xlane.f32.xlu1 %v2284_v34  ;;  %2378 = vmax.xlane.f32.xlu0 %v2377_v55  ;;  %v6372_v34 = vpop.f32.mrf.mxu1  ;;  %4824 = vpow2.f32 %v2534_v51  ;;  %v2594_v0 = vmul.f32 1.442695, %v2429_v3  ;;  %v2604_v60 = vmul.f32 1.442695, %v2434_v35  ;;  %v2401_v3 = vsub.f32 %v5838_v61, %v6162_v30 }
 0x403   : > { %v6360_v2 = vpop.xlane.xlu1 %2183  ;;  %v6362_v11 = vpop.xlane.xlu0 %2084  ;;  %8301 = vst [vmem:[#allocation128_spill] sm:$0xff] %v6372_v34  ;;  %4826 = vpow2.f32 %v2592_v59  ;;  %v2542_v48 = vmul.f32 1.442695, %v2403_v24  ;;  %v2600_v16 = vmul.f32 1.442695, %v2432_v32  ;;  %v2406_v35 = vsub.f32 %v5846_v1, %v6174_v52 }
 0x404   : > { %v6386_v39 = vpop.f32.mrf.mxu1  ;;  %4828 = vpow2.f32 %v2530_v17  ;;  %v2538_v30 = vmul.f32 1.442695, %v2401_v3  ;;  %v2404_v24 = vsub.f32 %v5854_v6, %v6184_v44  ;;  %v2435_v32 = vsub.f32 %v5852_v5, %v6186_v8 }
 0x405   : > { %8302 = vst [vmem:[#allocation129_spill] sm:$0xff] %v6386_v39  ;;  %v2287_v37 = vsel %vm2007_vm4, %v6386_v39, -inf  ;;  %4830 = vpow2.f32 %v2540_v13  ;;  %v2548_v52 = vmul.f32 1.442695, %v2406_v35  ;;  %v2433_v3 = vsub.f32 %v5856_v7, %v6198_v62  ;;  %v8320_v35 = vld [vmem:[#allocation88_spill] sm:$0xff]  ;;  %v8324_v62 = vld [vmem:[#allocation85_spill] sm:$0xff] }
 0x406   : > { %2387 = vmax.xlane.f32.xlu1 %v2386_v38  ;;  %2372 = vmax.xlane.f32.xlu0 %v2371_v22  ;;  %v2293_v38 = vsel %vm2007_vm4, %v6372_v34, -inf  ;;  %v6390_v22 = vpop.eup %4802  ;;  %4832 = vpow2.f32 %v2598_v25  ;;  %v2544_v44 = vmul.f32 1.442695, %v2404_v24  ;;  %v2606_v8 = vmul.f32 1.442695, %v2435_v32  ;;  %v8325_v24 = vld [vmem:[#allocation13_spill] sm:$0xff] }
 0x407   : > { %v6376_v55 = vpop.xlane.xlu1 %2177  ;;  %v6378_v10 = vpop.xlane.xlu0 %2099  ;;  %v2782_v21 = vsel %vm2007_vm4, %v6390_v22, 0.0  ;;  %4834 = vpow2.f32 %v2536_v4  ;;  %v8366_v39 = vld [vmem:[#allocation28_spill] sm:$0xff] }
 0x40a   : > { %2381 = vmax.xlane.f32.xlu1 %v2380_v28  ;;  %2294 = vmax.xlane.f32.xlu0 %v2293_v38  ;;  %v6406_v28 = vpop.eup %4804  ;;  %4836 = vpow2.f32 %v2594_v0 }
 0x40b   : > { %v6392_v26 = vpop.xlane.xlu1 %2093  ;;  %v6394_v23 = vpop.xlane.xlu0 %2186  ;;  %v2776_v38 = vsel %vm2007_vm4, %v6406_v28, 0.0 }
 0x40e   : > { %2783 = vadd.xlane.f32.xlu1 %v2782_v21  ;;  %2288 = vmax.xlane.f32.xlu0 %v2287_v37  ;;  %v6422_v37 = vpop.eup %4806  ;;  %4838 = vpow2.f32 %v2604_v60 }
 0x40f   : > { %v6408_v9 = vpop.xlane.xlu1 %2195  ;;  %v6410_v36 = vpop.xlane.xlu0 %2180  ;;  %v2878_v21 = vsel %vm2007_vm4, %v6422_v37, 0.0 }
 0x410   : > { %v6432_v12 = vpop.eup %4808  ;;  %4840 = vpow2.f32 %v2542_v48 }
 0x411   : > { %v2785_v43 = vsel %vm2007_vm4, %v6432_v12, 0.0 }
 0x412   : > { %2777 = vadd.xlane.f32.xlu1 %v2776_v38  ;;  %2390 = vmax.xlane.f32.xlu0 %v2389_v42  ;;  %v6438_v42 = vpop.eup %4810  ;;  %4842 = vpow2.f32 %v2600_v16 }
 0x413   : > { %v6424_v31 = vpop.xlane.xlu1 %2189  ;;  %v6426_v41 = vpop.xlane.xlu0 %2102  ;;  %v2872_v38 = vsel %vm2007_vm4, %v6438_v42, 0.0 }
 0x414   : > { %v6448_v50 = vpop.eup %4812  ;;  %4844 = vpow2.f32 %v2538_v30 }
 0x415   : > { %v2779_v59 = vsel %vm2007_vm4, %v6448_v50, 0.0 }
 0x416   : > { %2879 = vadd.xlane.f32.xlu1 %v2878_v21  ;;  %2384 = vmax.xlane.f32.xlu0 %v2383_v46  ;;  %v6454_v46 = vpop.eup %4814  ;;  %4846 = vpow2.f32 %v2548_v52  ;;  %v2602_v52 = vmul.f32 1.442695, %v2433_v3 }
 0x417   : > { %v6440_v56 = vpop.xlane.xlu1 %2207  ;;  %v6442_v45 = vpop.xlane.xlu0 %2096  ;;  %8306 = vst [vmem:[#allocation133_spill] sm:$0xff] %v6454_v46  ;;  %v2794_v21 = vsel %vm2007_vm4, %v6454_v46, 0.0 }
 0x418   : > { %8305 = vst [vmem:[#allocation132_spill] sm:$0xff] %v6440_v56  ;;  %v6464_v54 = vpop.eup %4816  ;;  %4848 = vpow2.f32 %v2544_v44  ;;  %v8341_v56 = vld [vmem:[#allocation20_spill] sm:$0xff] }
 0x419   : > { %v2881_v13 = vsel %vm2007_vm4, %v6464_v54, 0.0 }
 0x41a   : > { %2873 = vadd.xlane.f32.xlu1 %v2872_v38  ;;  %2786 = vadd.xlane.f32.xlu0 %v2785_v43  ;;  %v6470_v43 = vpop.eup %4818  ;;  %4850 = vpow2.f32 %v2606_v8 }
 0x41b   : > { %v6456_v51 = vpop.xlane.xlu1 %2201  ;;  %v6458_v49 = vpop.xlane.xlu0 %2198  ;;  %8308 = vst [vmem:[#allocation135_spill] sm:$0xff] %v6470_v43  ;;  %v2788_v38 = vsel %vm2007_vm4, %v6470_v43, 0.0  ;;  %v8372_v43 = vld [vmem:[#allocation30_spill] sm:$0xff] }
 0x41c   : > { %8307 = vst [vmem:[#allocation134_spill] sm:$0xff] %v6456_v51  ;;  %v6480_v58 = vpop.eup %4820  ;;  %v8328_v51 = vld [vmem:[#allocation16_spill] sm:$0xff]  ;;  %4852 = vpow2.f32 %v2602_v52 }
 0x41d   : > { %v2875_v4 = vsel %vm2007_vm4, %v6480_v58, 0.0 }
 0x41e   : > { %2795 = vadd.xlane.f32.xlu1 %v2794_v21  ;;  %2780 = vadd.xlane.f32.xlu0 %v2779_v59  ;;  %v6486_v59 = vpop.eup %4822 }
 0x41f   : > { %v6472_v17 = vpop.xlane.xlu1 %2303  ;;  %v6474_v53 = vpop.xlane.xlu0 %2192  ;;  %8310 = vst [vmem:[#allocation137_spill] sm:$0xff] %v6486_v59  ;;  %v2890_v21 = vsel %vm2007_vm4, %v6486_v59, 0.0 }
 0x420   : > { %8309 = vst [vmem:[#allocation136_spill] sm:$0xff] %v6472_v17  ;;  %v6496_v63 = vpop.eup %4824  ;;  %v8334_v17 = vld [vmem:[#allocation96_spill] sm:$0xff] }
 0x421   : > { %8313 = vst [vmem:[#allocation140_spill] sm:$0xff] %v6496_v63  ;;  %v2797_v60 = vsel %vm2007_vm4, %v6496_v63, 0.0 }
 0x422   : > { %2789 = vadd.xlane.f32.xlu1 %v2788_v38  ;;  %2882 = vadd.xlane.f32.xlu0 %v2881_v13  ;;  %v6502_v13 = vpop.eup %4826 }
 0x423   : > { %v6488_v25 = vpop.xlane.xlu1 %2297  ;;  %v6490_v57 = vpop.xlane.xlu0 %2210  ;;  %8314 = vst [vmem:[#allocation141_spill] sm:$0xff] %v6502_v13  ;;  %v2884_v38 = vsel %vm2007_vm4, %v6502_v13, 0.0  ;;  %v8347_v13 = vld [vmem:[#allocation22_spill] sm:$0xff] }
 0x424   : > { %8311 = vst [vmem:[#allocation138_spill] sm:$0xff] %v6488_v25  ;;  %8312 = vst [vmem:[#allocation139_spill] sm:$0xff] %v6490_v57  ;;  %v6512_v1 = vpop.eup %4828  ;;  %v2407_v25 = vsub.f32 %v8325_v24, %v8324_v62  ;;  %v8331_v24 = vld [vmem:[#allocation89_spill] sm:$0xff] }
 0x425   : > { %8316 = vst [vmem:[#allocation143_spill] sm:$0xff] %v6512_v1  ;;  %v2791_v16 = vsel %vm2007_vm4, %v6512_v1, 0.0 }
 0x426   : > { %2891 = vadd.xlane.f32.xlu1 %v2890_v21  ;;  %2876 = vadd.xlane.f32.xlu0 %v2875_v4  ;;  %v6518_v4 = vpop.eup %4830  ;;  %v8321_v21 = vld [vmem:[#allocation14_spill] sm:$0xff]  ;;  %v2550_v62 = vmul.f32 1.442695, %v2407_v25 }
 0x427   : > { %v6504_v0 = vpop.xlane.xlu1 %2219  ;;  %v6506_v61 = vpop.xlane.xlu0 %2204  ;;  %8317 = vst [vmem:[#allocation144_spill] sm:$0xff] %v6518_v4 }
 0x428   : > { %8315 = vst [vmem:[#allocation142_spill] sm:$0xff] %v6506_v61  ;;  %v6528_v5 = vpop.eup %4832 }
 0x429   : > { %8319 = vst [vmem:[#allocation146_spill] sm:$0xff] %v6528_v5  ;;  %v6534_v61 = vpop.eup %4834  ;;  %v2893_v32 = vsel %vm2007_vm4, %v6528_v5, 0.0  ;;  %v8354_v5 = vld [vmem:[#allocation24_spill] sm:$0xff] }
 0x42a   : > { %2885 = vadd.xlane.f32.xlu1 %v2884_v38  ;;  %2798 = vadd.xlane.f32.xlu0 %v2797_v60  ;;  %v2438_v38 = vsub.f32 %v8321_v21, %v8320_v35  ;;  %v2806_v60 = vsel %vm2007_vm4, %v6518_v4, 0.0  ;;  %8322 = vst [vmem:[#allocation88_spill] sm:$0xff] %v6534_v61  ;;  %v6544_v35 = vpop.eup %4836  ;;  %v8338_v4 = vld [vmem:[#allocation17_spill] sm:$0xff] }
 0x42b   : > { %v6520_v48 = vpop.xlane.xlu1 %2213  ;;  %v6522_v6 = vpop.xlane.xlu0 %2306  ;;  %8326 = vst [vmem:[#allocation85_spill] sm:$0xff] %v6544_v35 }
 0x42c   : > { %8318 = vst [vmem:[#allocation145_spill] sm:$0xff] %v6522_v6  ;;  %v2612_v21 = vmul.f32 1.442695, %v2438_v38  ;;  %v8327_v6 = vld [vmem:[#allocation92_spill] sm:$0xff]  ;;  %v6550_v57 = vpop.eup %4838  ;;  %v2887_v38 = vsel %vm2007_vm4, %v6544_v35, 0.0 }
 0x42d   : > { %8329 = vst [vmem:[#allocation13_spill] sm:$0xff] %v6550_v57 }
 0x42e   : > { %2807 = vadd.xlane.f32.xlu1 %v2806_v60  ;;  %2792 = vadd.xlane.f32.xlu0 %v2791_v16  ;;  %v2436_v60 = vsub.f32 %v8328_v51, %v8327_v6  ;;  %v2800_v16 = vsel %vm2007_vm4, %v6534_v61, 0.0  ;;  %v6560_v51 = vpop.eup %4840  ;;  %4854 = vpow2.f32 %v2612_v21  ;;  %v8335_v61 = vld [vmem:[#allocation18_spill] sm:$0xff] }
 0x42f   : > { %v6536_v30 = vpop.xlane.xlu1 %2315  ;;  %v6538_v7 = vpop.xlane.xlu0 %2300  ;;  %8333 = vst [vmem:[#allocation16_spill] sm:$0xff] %v6560_v51  ;;  %4856 = vpow2.f32 %v2550_v62 }
 0x430   : > { %8323 = vst [vmem:[#allocation14_spill] sm:$0xff] %v6538_v7  ;;  %v8332_v7 = vld [vmem:[#allocation15_spill] sm:$0xff]  ;;  %v2608_v6 = vmul.f32 1.442695, %v2436_v60  ;;  %v6566_v40 = vpop.eup %4842  ;;  %v2809_v60 = vsel %vm2007_vm4, %v6560_v51, 0.0 }
 0x431   : > { %v2405_v8 = vsub.f32 %v8332_v7, %v8331_v24  ;;  %8336 = vst [vmem:[#allocation89_spill] sm:$0xff] %v6566_v40  ;;  %v8337_v24 = vld [vmem:[#allocation93_spill] sm:$0xff]  ;;  %v8344_v51 = vld [vmem:[#allocation19_spill] sm:$0xff] }
 0x432   : > { %2801 = vadd.xlane.f32.xlu1 %v2800_v16  ;;  %2894 = vadd.xlane.f32.xlu0 %v2893_v32  ;;  %v2410_v16 = vsub.f32 %v8335_v61, %v8334_v17  ;;  %v2902_v32 = vsel %vm2007_vm4, %v6550_v57, 0.0  ;;  %v2439_v21 = vsub.f32 %v8338_v4, %v8337_v24  ;;  %v6576_v17 = vpop.eup %4844  ;;  %4858 = vpow2.f32 %v2608_v6  ;;  %v8340_v57 = vld [vmem:[#allocation100_spill] sm:$0xff]  ;;  %v8343_v24 = vld [vmem:[#allocation97_spill] sm:$0xff] }
 0x433   : > { %v6552_v44 = vpop.xlane.xlu1 %2309  ;;  %v6554_v3 = vpop.xlane.xlu0 %2222  ;;  %v2546_v52 = vmul.f32 1.442695, %v2405_v8  ;;  %8339 = vst [vmem:[#allocation15_spill] sm:$0xff] %v6576_v17  ;;  %v2437_v6 = vsub.f32 %v8344_v51, %v8343_v24  ;;  %v8350_v24 = vld [vmem:[#allocation101_spill] sm:$0xff] }
 0x434   : > { %8330 = vst [vmem:[#allocation92_spill] sm:$0xff] %v6552_v44  ;;  %v2556_v61 = vmul.f32 1.442695, %v2410_v16  ;;  %v6582_v35 = vpop.eup %4846  ;;  %v2614_v8 = vmul.f32 1.442695, %v2439_v21  ;;  %v2803_v16 = vsel %vm2007_vm4, %v6576_v17, 0.0 }
 0x435   : > { %8342 = vst [vmem:[#allocation96_spill] sm:$0xff] %v6582_v35  ;;  %4860 = vpow2.f32 %v2546_v52  ;;  %v2610_v21 = vmul.f32 1.442695, %v2437_v6  ;;  %v8351_v17 = vld [vmem:[#allocation21_spill] sm:$0xff] }
 0x436   : > { %2903 = vadd.xlane.f32.xlu1 %v2902_v32  ;;  %2888 = vadd.xlane.f32.xlu0 %v2887_v38  ;;  %v2408_v32 = vsub.f32 %v8341_v56, %v8340_v57  ;;  %v2896_v38 = vsel %vm2007_vm4, %v6566_v40, 0.0  ;;  %v6592_v56 = vpop.eup %4848  ;;  %4862 = vpow2.f32 %v2556_v61  ;;  %v8346_v40 = vld [vmem:[#allocation104_spill] sm:$0xff]  ;;  %v2411_v61 = vsub.f32 %v8351_v17, %v8350_v24  ;;  %v8356_v24 = vld [vmem:[#allocation105_spill] sm:$0xff] }
 0x437   : > { %v6568_v25 = vpop.xlane.xlu1 %2231  ;;  %v6570_v7 = vpop.xlane.xlu0 %2216  ;;  %8345 = vst [vmem:[#allocation18_spill] sm:$0xff] %v6592_v56  ;;  %4864 = vpow2.f32 %v2614_v8 }
 0x438   : > { %v2552_v57 = vmul.f32 1.442695, %v2408_v32  ;;  %v6598_v27 = vpop.eup %4850  ;;  %v2812_v32 = vsel %vm2007_vm4, %v6592_v56, 0.0  ;;  %v2558_v6 = vmul.f32 1.442695, %v2411_v61  ;;  %v8357_v56 = vld [vmem:[#allocation23_spill] sm:$0xff] }
 0x439   : > { %8348 = vst [vmem:[#allocation93_spill] sm:$0xff] %v6598_v27 }
 0x43a   : > { %2897 = vadd.xlane.f32.xlu1 %v2896_v38  ;;  %2810 = vadd.xlane.f32.xlu0 %v2809_v60  ;;  %v2442_v38 = vsub.f32 %v8347_v13, %v8346_v40  ;;  %v2818_v60 = vsel %vm2007_vm4, %v6582_v35, 0.0  ;;  %v6608_v40 = vpop.eup %4852  ;;  %4866 = vpow2.f32 %v2552_v57  ;;  %v8353_v35 = vld [vmem:[#allocation108_spill] sm:$0xff]  ;;  %v2409_v57 = vsub.f32 %v8357_v56, %v8356_v24  ;;  %v8362_v24 = vld [vmem:[#allocation109_spill] sm:$0xff] }
 0x43b   : > { %v6584_v62 = vpop.xlane.xlu1 %2225  ;;  %v6586_v4 = vpop.xlane.xlu0 %2318  ;;  %8352 = vst [vmem:[#allocation100_spill] sm:$0xff] %v6608_v40  ;;  %4868 = vpow2.f32 %v2610_v21 }
 0x43c   : > { %v2620_v13 = vmul.f32 1.442695, %v2442_v38  ;;  %v6614_v59 = vpop.eup %4854  ;;  %v2899_v38 = vsel %vm2007_vm4, %v6608_v40, 0.0  ;;  %v2554_v61 = vmul.f32 1.442695, %v2409_v57  ;;  %v8363_v40 = vld [vmem:[#allocation25_spill] sm:$0xff] }
 0x43d   : > { %8355 = vst [vmem:[#allocation20_spill] sm:$0xff] %v6614_v59 }
 0x43e   : > { %2819 = vadd.xlane.f32.xlu1 %v2818_v60  ;;  %2804 = vadd.xlane.f32.xlu0 %v2803_v16  ;;  %v2440_v60 = vsub.f32 %v8354_v5, %v8353_v35  ;;  %v2905_v16 = vsel %vm2007_vm4, %v6598_v27, 0.0  ;;  %v6624_v5 = vpop.eup %4856  ;;  %4870 = vpow2.f32 %v2620_v13  ;;  %v8359_v27 = vld [vmem:[#allocation112_spill] sm:$0xff]  ;;  %v2443_v13 = vsub.f32 %v8363_v40, %v8362_v24  ;;  %v8368_v24 = vld [vmem:[#allocation113_spill] sm:$0xff] }
 0x43f   : > { %v6600_v52 = vpop.xlane.xlu1 %2327  ;;  %v6602_v51 = vpop.xlane.xlu0 %2312  ;;  %8358 = vst [vmem:[#allocation97_spill] sm:$0xff] %v6624_v5  ;;  %4872 = vpow2.f32 %v2558_v6 }
 0x440   : > { %8349 = vst [vmem:[#allocation17_spill] sm:$0xff] %v6602_v51  ;;  %v2616_v35 = vmul.f32 1.442695, %v2440_v60  ;;  %v8360_v51 = vld [vmem:[#allocation26_spill] sm:$0xff]  ;;  %v6630_v44 = vpop.eup %4858  ;;  %v2821_v60 = vsel %vm2007_vm4, %v6624_v5, 0.0  ;;  %v8369_v5 = vld [vmem:[#allocation27_spill] sm:$0xff] }
 0x441   : > { %8361 = vst [vmem:[#allocation19_spill] sm:$0xff] %v6630_v44  ;;  %v2622_v57 = vmul.f32 1.442695, %v2443_v13 }
 0x442   : > { %2813 = vadd.xlane.f32.xlu1 %v2812_v32  ;;  %2906 = vadd.xlane.f32.xlu0 %v2905_v16  ;;  %v2414_v32 = vsub.f32 %v8360_v51, %v8359_v27  ;;  %v2914_v16 = vsel %vm2007_vm4, %v6614_v59, 0.0  ;;  %v6640_v27 = vpop.eup %4860  ;;  %4874 = vpow2.f32 %v2616_v35  ;;  %v8365_v59 = vld [vmem:[#allocation116_spill] sm:$0xff]  ;;  %v2441_v35 = vsub.f32 %v8369_v5, %v8368_v24  ;;  %v8374_v24 = vld [vmem:[#allocation117_spill] sm:$0xff] }
 0x443   : > { %v6616_v8 = vpop.xlane.xlu1 %2321  ;;  %v6618_v17 = vpop.xlane.xlu0 %2234  ;;  %8364 = vst [vmem:[#allocation104_spill] sm:$0xff] %v6640_v27  ;;  %4876 = vpow2.f32 %v2554_v61 }
 0x444   : > { %v2564_v51 = vmul.f32 1.442695, %v2414_v32  ;;  %v6646_v1 = vpop.eup %4862  ;;  %v2815_v32 = vsel %vm2007_vm4, %v6640_v27, 0.0  ;;  %v2618_v13 = vmul.f32 1.442695, %v2441_v35  ;;  %v8375_v27 = vld [vmem:[#allocation29_spill] sm:$0xff] }
 0x445   : > { %8367 = vst [vmem:[#allocation22_spill] sm:$0xff] %v6646_v1 }
 0x446   : > { %2915 = vadd.xlane.f32.xlu1 %v2914_v16  ;;  %2900 = vadd.xlane.f32.xlu0 %v2899_v38  ;;  %v2412_v16 = vsub.f32 %v8366_v39, %v8365_v59  ;;  %v2908_v38 = vsel %vm2007_vm4, %v6630_v44, 0.0  ;;  %v6656_v39 = vpop.eup %4864  ;;  %4878 = vpow2.f32 %v2564_v51  ;;  %v8371_v44 = vld [vmem:[#allocation120_spill] sm:$0xff]  ;;  %v2415_v51 = vsub.f32 %v8375_v27, %v8374_v24  ;;  %v8379_v24 = vld [vmem:[#allocation121_spill] sm:$0xff] }
 0x447   : > { %v6632_v21 = vpop.xlane.xlu1 %2243  ;;  %v6634_v56 = vpop.xlane.xlu0 %2228  ;;  %8370 = vst [vmem:[#allocation101_spill] sm:$0xff] %v6656_v39  ;;  %4880 = vpow2.f32 %v2622_v57 }
 0x448   : > { %v2560_v59 = vmul.f32 1.442695, %v2412_v16  ;;  %v6662_v34 = vpop.eup %4866  ;;  %v2917_v16 = vsel %vm2007_vm4, %v6656_v39, 0.0  ;;  %v2566_v35 = vmul.f32 1.442695, %v2415_v51  ;;  %v8380_v39 = vld [vmem:[#allocation31_spill] sm:$0xff] }
 0x449   : > { %8373 = vst [vmem:[#allocation21_spill] sm:$0xff] %v6662_v34 }
 0x44a   : > { %2909 = vadd.xlane.f32.xlu1 %v2908_v38  ;;  %2822 = vadd.xlane.f32.xlu0 %v2821_v60  ;;  %v2446_v38 = vsub.f32 %v8372_v43, %v8371_v44  ;;  %v2830_v60 = vsel %vm2007_vm4, %v6646_v1, 0.0  ;;  %v6672_v43 = vpop.eup %4868  ;;  %4882 = vpow2.f32 %v2560_v59  ;;  %v8377_v1 = vld [vmem:[#allocation32_spill] sm:$0xff]  ;;  %v2413_v59 = vsub.f32 %v8380_v39, %v8379_v24 }
 0x44b   : > { %v6648_v6 = vpop.xlane.xlu1 %2237  ;;  %v6650_v40 = vpop.xlane.xlu0 %2330  ;;  %8376 = vst [vmem:[#allocation108_spill] sm:$0xff] %v6672_v43  ;;  %4884 = vpow2.f32 %v2618_v13  ;;  %v8385_v24 = vld [vmem:[#allocation124_spill] sm:$0xff] }
 0x44c   : > { %v2628_v44 = vmul.f32 1.442695, %v2446_v38  ;;  %v6678_v63 = vpop.eup %4870  ;;  %v2911_v38 = vsel %vm2007_vm4, %v6672_v43, 0.0  ;;  %v2562_v51 = vmul.f32 1.442695, %v2413_v59  ;;  %v8386_v43 = vld [vmem:[#allocation33_spill] sm:$0xff] }
 0x44d   : > { %8378 = vst [vmem:[#allocation24_spill] sm:$0xff] %v6678_v63 }
 0x44e   : > { %2831 = vadd.xlane.f32.xlu1 %v2830_v60  ;;  %2816 = vadd.xlane.f32.xlu0 %v2815_v32  ;;  %v2444_v60 = vsub.f32 %v8377_v1, %v6318_v19  ;;  %v2824_v32 = vsel %vm2007_vm4, %v6662_v34, 0.0  ;;  %v6688_v19 = vpop.eup %4872  ;;  %4886 = vpow2.f32 %v2628_v44  ;;  %v8382_v34 = vld [vmem:[#allocation34_spill] sm:$0xff]  ;;  %v2447_v44 = vsub.f32 %v8386_v43, %v8385_v24  ;;  %v8390_v24 = vld [vmem:[#allocation35_spill] sm:$0xff] }
 0x44f   : > { %v6664_v61 = vpop.xlane.xlu1 %2339  ;;  %v6666_v5 = vpop.xlane.xlu0 %2324  ;;  %8381 = vst [vmem:[#allocation105_spill] sm:$0xff] %v6688_v19  ;;  %4888 = vpow2.f32 %v2566_v35 }
 0x450   : > { %v2624_v1 = vmul.f32 1.442695, %v2444_v60  ;;  %v6694_v46 = vpop.eup %4874  ;;  %v2833_v60 = vsel %vm2007_vm4, %v6688_v19, 0.0  ;;  %v2630_v59 = vmul.f32 1.442695, %v2447_v44  ;;  %v8392_v19 = vld [vmem:[#allocation38_spill] sm:$0xff] }
 0x451   : > { %8383 = vst [vmem:[#allocation23_spill] sm:$0xff] %v6694_v46 }
 0x452   : > { %2825 = vadd.xlane.f32.xlu1 %v2824_v32  ;;  %2918 = vadd.xlane.f32.xlu0 %v2917_v16  ;;  %v2418_v32 = vsub.f32 %v8382_v34, %v6332_v14  ;;  %v2926_v16 = vsel %vm2007_vm4, %v6678_v63, 0.0  ;;  %v6704_v14 = vpop.eup %4876  ;;  %4890 = vpow2.f32 %v2624_v1  ;;  %v8388_v63 = vld [vmem:[#allocation36_spill] sm:$0xff]  ;;  %v2445_v1 = vsub.f32 %v8390_v24, %v6334_v29  ;;  %v8394_v24 = vld [vmem:[#allocation37_spill] sm:$0xff] }
 0x453   : > { %v6680_v57 = vpop.xlane.xlu1 %2333  ;;  %v6682_v27 = vpop.xlane.xlu0 %2246  ;;  %8387 = vst [vmem:[#allocation26_spill] sm:$0xff] %v6704_v14  ;;  %4892 = vpow2.f32 %v2562_v51 }
 0x454   : > { %v2572_v34 = vmul.f32 1.442695, %v2418_v32  ;;  %v2827_v32 = vsel %vm2007_vm4, %v6704_v14, 0.0  ;;  %v2626_v44 = vmul.f32 1.442695, %v2445_v1  ;;  %v8396_v14 = vld [vmem:[#allocation40_spill] sm:$0xff] }
 0x456   : > { %2927 = vadd.xlane.f32.xlu1 %v2926_v16  ;;  %2912 = vadd.xlane.f32.xlu0 %v2911_v38  ;;  %v2416_v16 = vsub.f32 %v8388_v63, %v6346_v18  ;;  %v2920_v38 = vsel %vm2007_vm4, %v6694_v46, 0.0  ;;  %4894 = vpow2.f32 %v2572_v34  ;;  %v2419_v34 = vsub.f32 %v8394_v24, %v6348_v33  ;;  %v8398_v24 = vld [vmem:[#allocation39_spill] sm:$0xff] }
 0x457   : > { %v6696_v13 = vpop.xlane.xlu1 %2255  ;;  %v6698_v39 = vpop.xlane.xlu0 %2240  ;;  %4896 = vpow2.f32 %v2630_v59 }
 0x458   : > { %8384 = vst [vmem:[#allocation112_spill] sm:$0xff] %v6696_v13  ;;  %v6710_v13 = vpop.eup %4878  ;;  %v2568_v63 = vmul.f32 1.442695, %v2416_v16  ;;  %v2574_v1 = vmul.f32 1.442695, %v2419_v34 }
 0x459   : > { %8389 = vst [vmem:[#allocation109_spill] sm:$0xff] %v6710_v13  ;;  %v6720_v18 = vpop.eup %4880 }
 0x45a   : > { %2921 = vadd.xlane.f32.xlu1 %v2920_v38  ;;  %2834 = vadd.xlane.f32.xlu0 %v2833_v60  ;;  %8391 = vst [vmem:[#allocation25_spill] sm:$0xff] %v6720_v18  ;;  %v2450_v38 = vsub.f32 %v8392_v19, %v6360_v2  ;;  %v2842_v60 = vsel %vm2007_vm4, %v6710_v13, 0.0  ;;  %v6726_v46 = vpop.eup %4882  ;;  %v2929_v16 = vsel %vm2007_vm4, %v6720_v18, 0.0  ;;  %4898 = vpow2.f32 %v2568_v63  ;;  %v8400_v18 = vld [vmem:[#allocation41_spill] sm:$0xff] }
 0x45b   : > { %v6712_v35 = vpop.xlane.xlu1 %2249  ;;  %v6714_v43 = vpop.xlane.xlu0 %2342  ;;  %8393 = vst [vmem:[#allocation116_spill] sm:$0xff] %v6726_v46  ;;  %4900 = vpow2.f32 %v2626_v44  ;;  %v2417_v63 = vsub.f32 %v8398_v24, %v6362_v11  ;;  %v8402_v24 = vld [vmem:[#allocation43_spill] sm:$0xff] }
 0x45c   : > { %v6736_v2 = vpop.eup %4884  ;;  %v2636_v19 = vmul.f32 1.442695, %v2450_v38 }
 0x45d   : > { %8395 = vst [vmem:[#allocation28_spill] sm:$0xff] %v6736_v2  ;;  %v6742_v13 = vpop.eup %4886  ;;  %v2923_v38 = vsel %vm2007_vm4, %v6736_v2, 0.0  ;;  %v2570_v34 = vmul.f32 1.442695, %v2417_v63 }
 0x45e   : > { %2843 = vadd.xlane.f32.xlu1 %v2842_v60  ;;  %2828 = vadd.xlane.f32.xlu0 %v2827_v32  ;;  %v2448_v60 = vsub.f32 %v8396_v14, %v6376_v55  ;;  %v2836_v32 = vsel %vm2007_vm4, %v6726_v46, 0.0  ;;  %8397 = vst [vmem:[#allocation113_spill] sm:$0xff] %v6742_v13  ;;  %v6752_v55 = vpop.eup %4888  ;;  %4902 = vpow2.f32 %v2636_v19  ;;  %v2420_v19 = vsub.f32 %v8402_v24, %v6392_v26  ;;  %v8406_v24 = vld [vmem:[#allocation45_spill] sm:$0xff] }
 0x45f   : > { %v6728_v51 = vpop.xlane.xlu1 %2351  ;;  %v6730_v29 = vpop.xlane.xlu0 %2336  ;;  %8399 = vst [vmem:[#allocation27_spill] sm:$0xff] %v6752_v55  ;;  %4904 = vpow2.f32 %v2574_v1 }
 0x460   : > { %v2632_v14 = vmul.f32 1.442695, %v2448_v60  ;;  %v6758_v46 = vpop.eup %4890  ;;  %v2845_v60 = vsel %vm2007_vm4, %v6752_v55, 0.0  ;;  %v2576_v63 = vmul.f32 1.442695, %v2420_v19 }
 0x461   : > { %8401 = vst [vmem:[#allocation120_spill] sm:$0xff] %v6758_v46 }
 0x462   : > { %2837 = vadd.xlane.f32.xlu1 %v2836_v32  ;;  %2930 = vadd.xlane.f32.xlu0 %v2929_v16  ;;  %v2422_v32 = vsub.f32 %v8400_v18, %v6378_v10  ;;  %v2938_v16 = vsel %vm2007_vm4, %v6742_v13, 0.0  ;;  %v6768_v10 = vpop.eup %4892  ;;  %4906 = vpow2.f32 %v2632_v14  ;;  %v8404_v13 = vld [vmem:[#allocation42_spill] sm:$0xff]  ;;  %v2454_v14 = vsub.f32 %v8406_v24, %v6408_v9  ;;  %v8411_v24 = vld [vmem:[#allocation47_spill] sm:$0xff] }
 0x463   : > { %v6744_v59 = vpop.xlane.xlu1 %2345  ;;  %v6746_v33 = vpop.xlane.xlu0 %2258  ;;  %8403 = vst [vmem:[#allocation30_spill] sm:$0xff] %v6768_v10  ;;  %4908 = vpow2.f32 %v2570_v34 }
 0x464   : > { %v2580_v18 = vmul.f32 1.442695, %v2422_v32  ;;  %v6774_v2 = vpop.eup %4894  ;;  %v2839_v32 = vsel %vm2007_vm4, %v6768_v10, 0.0  ;;  %v2644_v19 = vmul.f32 1.442695, %v2454_v14  ;;  %v8413_v10 = vld [vmem:[#allocation46_spill] sm:$0xff] }
 0x465   : > { %8405 = vst [vmem:[#allocation117_spill] sm:$0xff] %v6774_v2 }
 0x466   : > { %2939 = vadd.xlane.f32.xlu1 %v2938_v16  ;;  %2924 = vadd.xlane.f32.xlu0 %v2923_v38  ;;  %v2451_v16 = vsub.f32 %v8404_v13, %v6394_v23  ;;  %v2932_v38 = vsel %vm2007_vm4, %v6758_v46, 0.0  ;;  %v6784_v23 = vpop.eup %4896  ;;  %4910 = vpow2.f32 %v2580_v18  ;;  %v8408_v46 = vld [vmem:[#allocation44_spill] sm:$0xff]  ;;  %v2452_v18 = vsub.f32 %v8411_v24, %v6424_v31 }
 0x467   : > { %v6760_v44 = vpop.xlane.xlu1 %2267  ;;  %v6762_v11 = vpop.xlane.xlu0 %2252  ;;  %8407 = vst [vmem:[#allocation29_spill] sm:$0xff] %v6784_v23  ;;  %4912 = vpow2.f32 %v2576_v63  ;;  %v8415_v24 = vld [vmem:[#allocation48_spill] sm:$0xff] }
 0x468   : > { %v2638_v13 = vmul.f32 1.442695, %v2451_v16  ;;  %v6790_v55 = vpop.eup %4898  ;;  %v2941_v16 = vsel %vm2007_vm4, %v6784_v23, 0.0  ;;  %v2640_v14 = vmul.f32 1.442695, %v2452_v18  ;;  %v8417_v23 = vld [vmem:[#allocation57_spill] sm:$0xff] }
 0x469   : > { %8409 = vst [vmem:[#allocation32_spill] sm:$0xff] %v6790_v55 }
 0x46a   : > { %2933 = vadd.xlane.f32.xlu1 %v2932_v38  ;;  %2846 = vadd.xlane.f32.xlu0 %v2845_v60  ;;  %v2449_v38 = vsub.f32 %v8408_v46, %v6410_v36  ;;  %v2854_v60 = vsel %vm2007_vm4, %v6774_v2, 0.0  ;;  %v6800_v36 = vpop.eup %4900  ;;  %4914 = vpow2.f32 %v2638_v13  ;;  %v2421_v13 = vsub.f32 %v8415_v24, %v6442_v45  ;;  %v8419_v24 = vld [vmem:[#allocation50_spill] sm:$0xff] }
 0x46b   : > { %v6776_v1 = vpop.xlane.xlu1 %2261  ;;  %v6778_v26 = vpop.xlane.xlu0 %2354  ;;  %8412 = vst [vmem:[#allocation31_spill] sm:$0xff] %v6800_v36  ;;  %4916 = vpow2.f32 %v2644_v19 }
 0x46c   : > { %v2634_v46 = vmul.f32 1.442695, %v2449_v38  ;;  %v6806_v2 = vpop.eup %4902  ;;  %v2935_v38 = vsel %vm2007_vm4, %v6800_v36, 0.0  ;;  %v2578_v18 = vmul.f32 1.442695, %v2421_v13  ;;  %v8421_v36 = vld [vmem:[#allocation59_spill] sm:$0xff] }
 0x46d   : > { %8414 = vst [vmem:[#allocation34_spill] sm:$0xff] %v6806_v2 }
 0x46e   : > { %2855 = vadd.xlane.f32.xlu1 %v2854_v60  ;;  %2840 = vadd.xlane.f32.xlu0 %v2839_v32  ;;  %v2423_v60 = vsub.f32 %v8413_v10, %v6426_v41  ;;  %v2848_v32 = vsel %vm2007_vm4, %v6790_v55, 0.0  ;;  %v6816_v41 = vpop.eup %4904  ;;  %4918 = vpow2.f32 %v2634_v46  ;;  %v2455_v46 = vsub.f32 %v8419_v24, %v6458_v49  ;;  %v8423_v24 = vld [vmem:[#allocation52_spill] sm:$0xff] }
 0x46f   : > { %v6792_v34 = vpop.xlane.xlu1 %2363  ;;  %v6794_v9 = vpop.xlane.xlu0 %2348  ;;  %8416 = vst [vmem:[#allocation124_spill] sm:$0xff] %v6816_v41  ;;  %4920 = vpow2.f32 %v2640_v14 }
 0x470   : > { %8410 = vst [vmem:[#allocation121_spill] sm:$0xff] %v6794_v9  ;;  %v2582_v10 = vmul.f32 1.442695, %v2423_v60  ;;  %v6822_v55 = vpop.eup %4906  ;;  %v2857_v60 = vsel %vm2007_vm4, %v6816_v41, 0.0  ;;  %v2646_v13 = vmul.f32 1.442695, %v2455_v46 }
 0x471   : > { %8418 = vst [vmem:[#allocation33_spill] sm:$0xff] %v6822_v55 }
 0x472   : > { %2849 = vadd.xlane.f32.xlu1 %v2848_v32  ;;  %2942 = vadd.xlane.f32.xlu0 %v2941_v16  ;;  %v2462_v32 = vsub.f32 %v8417_v23, %v6504_v0  ;;  %v2950_v16 = vsel %vm2007_vm4, %v6806_v2, 0.0  ;;  %v6832_v0 = vpop.eup %4908  ;;  %4922 = vpow2.f32 %v2582_v10  ;;  %v2453_v10 = vsub.f32 %v8423_v24, %v6474_v53  ;;  %v8427_v24 = vld [vmem:[#allocation62_spill] sm:$0xff] }
 0x473   : > { %v6808_v63 = vpop.xlane.xlu1 %2357  ;;  %v6810_v31 = vpop.xlane.xlu0 %2270  ;;  %8420 = vst [vmem:[#allocation36_spill] sm:$0xff] %v6832_v0  ;;  %4924 = vpow2.f32 %v2578_v18 }
 0x474   : > { %v2660_v23 = vmul.f32 1.442695, %v2462_v32  ;;  %v6838_v2 = vpop.eup %4910  ;;  %v2851_v32 = vsel %vm2007_vm4, %v6832_v0, 0.0  ;;  %v2642_v46 = vmul.f32 1.442695, %v2453_v10  ;;  %v8429_v0 = vld [vmem:[#allocation65_spill] sm:$0xff] }
 0x475   : > { %8422 = vst [vmem:[#allocation35_spill] sm:$0xff] %v6838_v2 }
 0x476   : > { %2951 = vadd.xlane.f32.xlu1 %v2950_v16  ;;  %2936 = vadd.xlane.f32.xlu0 %v2935_v38  ;;  %v2460_v16 = vsub.f32 %v8421_v36, %v6520_v48  ;;  %v2944_v38 = vsel %vm2007_vm4, %v6822_v55, 0.0  ;;  %v6848_v48 = vpop.eup %4912  ;;  %4926 = vpow2.f32 %v2660_v23  ;;  %v8425_v55 = vld [vmem:[#allocation61_spill] sm:$0xff]  ;;  %v2463_v23 = vsub.f32 %v8427_v24, %v6554_v3  ;;  %v8431_v24 = vld [vmem:[#allocation64_spill] sm:$0xff] }
 0x477   : > { %v6824_v19 = vpop.xlane.xlu1 %2279  ;;  %v6826_v45 = vpop.xlane.xlu0 %2264  ;;  %8424 = vst [vmem:[#allocation38_spill] sm:$0xff] %v6848_v48  ;;  %4928 = vpow2.f32 %v2646_v13 }
 0x478   : > { %v2656_v36 = vmul.f32 1.442695, %v2460_v16  ;;  %v6854_v41 = vpop.eup %4914  ;;  %v2860_v16 = vsel %vm2007_vm4, %v6848_v48, 0.0  ;;  %v2662_v10 = vmul.f32 1.442695, %v2463_v23 }
 0x479   : > { %8426 = vst [vmem:[#allocation37_spill] sm:$0xff] %v6854_v41 }
 0x47a   : > { %2945 = vadd.xlane.f32.xlu1 %v2944_v38  ;;  %2858 = vadd.xlane.f32.xlu0 %v2857_v60  ;;  %v2494_v38 = vsub.f32 %v8425_v55, %v6536_v30  ;;  %v2866_v60 = vsel %vm2007_vm4, %v6838_v2, 0.0  ;;  %v6864_v30 = vpop.eup %4916  ;;  %4930 = vpow2.f32 %v2656_v36  ;;  %v2461_v36 = vsub.f32 %v8431_v24, %v6570_v7  ;;  %v8435_v24 = vld [vmem:[#allocation66_spill] sm:$0xff] }
 0x47b   : > { %v6840_v14 = vpop.xlane.xlu1 %2273  ;;  %v6842_v49 = vpop.xlane.xlu0 %2366  ;;  %8428 = vst [vmem:[#allocation40_spill] sm:$0xff] %v6864_v30  ;;  %4932 = vpow2.f32 %v2642_v46 }
 0x47c   : > { %v2724_v55 = vmul.f32 1.442695, %v2494_v38  ;;  %v6870_v2 = vpop.eup %4918  ;;  %v2962_v38 = vsel %vm2007_vm4, %v6864_v30, 0.0  ;;  %v2658_v23 = vmul.f32 1.442695, %v2461_v36 }
 0x47d   : > { %8430 = vst [vmem:[#allocation39_spill] sm:$0xff] %v6870_v2 }
 0x47e   : > { %2867 = vadd.xlane.f32.xlu1 %v2866_v60  ;;  %2852 = vadd.xlane.f32.xlu0 %v2851_v32  ;;  %v2466_v60 = vsub.f32 %v8429_v0, %v6568_v25  ;;  %v2953_v32 = vsel %vm2007_vm4, %v6854_v41, 0.0  ;;  %v6880_v25 = vpop.eup %4920  ;;  %4934 = vpow2.f32 %v2724_v55  ;;  %v8433_v41 = vld [vmem:[#allocation67_spill] sm:$0xff]  ;;  %v2495_v55 = vsub.f32 %v8435_v24, %v6586_v4 }
 0x47f   : > { %v6856_v18 = vpop.xlane.xlu1 %2375  ;;  %v6858_v53 = vpop.xlane.xlu0 %2360  ;;  %8432 = vst [vmem:[#allocation41_spill] sm:$0xff] %v6880_v25  ;;  %4936 = vpow2.f32 %v2662_v10  ;;  %v8439_v24 = vld [vmem:[#allocation71_spill] sm:$0xff] }
 0x480   : > { %v2668_v0 = vmul.f32 1.442695, %v2466_v60  ;;  %v6886_v48 = vpop.eup %4922  ;;  %v2956_v60 = vsel %vm2007_vm4, %v6880_v25, 0.0  ;;  %v2726_v36 = vmul.f32 1.442695, %v2495_v55  ;;  %v8441_v25 = vld [vmem:[#allocation70_spill] sm:$0xff] }
 0x481   : > { %8434 = vst [vmem:[#allocation43_spill] sm:$0xff] %v6886_v48 }
 0x482   : > { %2861 = vadd.xlane.f32.xlu1 %v2860_v16  ;;  %2954 = vadd.xlane.f32.xlu0 %v2953_v32  ;;  %v2464_v16 = vsub.f32 %v8433_v41, %v6584_v62  ;;  %v2947_v32 = vsel %vm2007_vm4, %v6870_v2, 0.0  ;;  %v6896_v62 = vpop.eup %4924  ;;  %4938 = vpow2.f32 %v2668_v0  ;;  %v8437_v2 = vld [vmem:[#allocation69_spill] sm:$0xff]  ;;  %v2496_v0 = vsub.f32 %v8439_v24, %v6616_v8 }
 0x483   : > { %v6872_v13 = vpop.xlane.xlu1 %2369  ;;  %v6874_v3 = vpop.xlane.xlu0 %2282  ;;  %8436 = vst [vmem:[#allocation42_spill] sm:$0xff] %v6896_v62  ;;  %4940 = vpow2.f32 %v2658_v23  ;;  %v8443_v24 = vld [vmem:[#allocation73_spill] sm:$0xff] }
 0x484   : > { %v2664_v41 = vmul.f32 1.442695, %v2464_v16  ;;  %v6902_v30 = vpop.eup %4926  ;;  %v2863_v16 = vsel %vm2007_vm4, %v6896_v62, 0.0  ;;  %v2728_v55 = vmul.f32 1.442695, %v2496_v0 }
 0x485   : > { %8438 = vst [vmem:[#allocation45_spill] sm:$0xff] %v6902_v30 }
 0x486   : > { %2963 = vadd.xlane.f32.xlu1 %v2962_v38  ;;  %2948 = vadd.xlane.f32.xlu0 %v2947_v32  ;;  %v2498_v38 = vsub.f32 %v8437_v2, %v6600_v52  ;;  %v2869_v32 = vsel %vm2007_vm4, %v6886_v48, 0.0  ;;  %v6912_v52 = vpop.eup %4928  ;;  %4942 = vpow2.f32 %v2664_v41  ;;  %v2470_v41 = vsub.f32 %v8443_v24, %v6632_v21  ;;  %v8447_v24 = vld [vmem:[#allocation75_spill] sm:$0xff] }
 0x487   : > { %v6888_v46 = vpop.xlane.xlu1 %2291  ;;  %v6890_v7 = vpop.xlane.xlu0 %2276  ;;  %8440 = vst [vmem:[#allocation44_spill] sm:$0xff] %v6912_v52  ;;  %4944 = vpow2.f32 %v2726_v36 }
 0x488   : > { %v2732_v2 = vmul.f32 1.442695, %v2498_v38  ;;  %v6918_v48 = vpop.eup %4930  ;;  %v2965_v38 = vsel %vm2007_vm4, %v6912_v52, 0.0  ;;  %v2676_v0 = vmul.f32 1.442695, %v2470_v41 }
 0x489   : > { %8442 = vst [vmem:[#allocation47_spill] sm:$0xff] %v6918_v48 }
 0x48a   : > { %2957 = vadd.xlane.f32.xlu1 %v2956_v60  ;;  %2870 = vadd.xlane.f32.xlu0 %v2869_v32  ;;  %v2467_v60 = vsub.f32 %v8441_v25, %v6618_v17  ;;  %v2986_v32 = vsel %vm2007_vm4, %v6902_v30, 0.0  ;;  %v6928_v17 = vpop.eup %4932  ;;  %4946 = vpow2.f32 %v2732_v2  ;;  %v8445_v30 = vld [vmem:[#allocation72_spill] sm:$0xff]  ;;  %v2468_v2 = vsub.f32 %v8447_v24, %v6648_v6 }
 0x48b   : > { %v6904_v10 = vpop.xlane.xlu1 %2285  ;;  %v6906_v4 = vpop.xlane.xlu0 %2378  ;;  %8444 = vst [vmem:[#allocation46_spill] sm:$0xff] %v6928_v17  ;;  %4948 = vpow2.f32 %v2728_v55  ;;  %v8451_v55 = vld [vmem:[#allocation77_spill] sm:$0xff] }
 0x48c   : > { %v2670_v25 = vmul.f32 1.442695, %v2467_v60  ;;  %v6934_v62 = vpop.eup %4934  ;;  %v2959_v60 = vsel %vm2007_vm4, %v6928_v17, 0.0  ;;  %v2502_v6 = vsub.f32 %v8451_v55, %v6664_v61  ;;  %v2672_v17 = vmul.f32 1.442695, %v2468_v2 }
 0x48d   : > { %8446 = vst [vmem:[#allocation48_spill] sm:$0xff] %v6934_v62 }
 0x48e   : > { %2987 = vadd.xlane.f32.xlu1 %v2986_v32  ;;  %2864 = vadd.xlane.f32.xlu0 %v2863_v16  ;;  %v2465_v32 = vsub.f32 %v8445_v30, %v6634_v56  ;;  %v2980_v16 = vsel %vm2007_vm4, %v6918_v48, 0.0  ;;  %v6944_v56 = vpop.eup %4936  ;;  %4950 = vpow2.f32 %v2670_v25  ;;  %v8449_v48 = vld [vmem:[#allocation74_spill] sm:$0xff]  ;;  %v8452_v25 = vld [vmem:[#allocation76_spill] sm:$0xff] }
 0x48f   : > { %v6920_v23 = vpop.xlane.xlu1 %2387  ;;  %v6922_v8 = vpop.xlane.xlu0 %2372  ;;  %8448 = vst [vmem:[#allocation57_spill] sm:$0xff] %v6944_v56  ;;  %4952 = vpow2.f32 %v2676_v0  ;;  %v8454_v0 = vld [vmem:[#allocation78_spill] sm:$0xff] }
 0x490   : > { %v2666_v30 = vmul.f32 1.442695, %v2465_v32  ;;  %v6950_v52 = vpop.eup %4938  ;;  %v2497_v32 = vsub.f32 %v8452_v25, %v6666_v5  ;;  %v2471_v2 = vsub.f32 %v8454_v0, %v6682_v27  ;;  %v2740_v5 = vmul.f32 1.442695, %v2502_v6  ;;  %v8455_v25 = vld [vmem:[#allocation80_spill] sm:$0xff]  ;;  %v8456_v27 = vld [vmem:[#allocation82_spill] sm:$0xff] }
 0x491   : > { %8450 = vst [vmem:[#allocation50_spill] sm:$0xff] %v6950_v52  ;;  %v2998_v61 = vsel %vm2007_vm4, %v6950_v52, 0.0 }
 0x492   : > { %2981 = vadd.xlane.f32.xlu1 %v2980_v16  ;;  %2966 = vadd.xlane.f32.xlu0 %v2965_v38  ;;  %v2499_v16 = vsub.f32 %v8449_v48, %v6650_v40  ;;  %v3082_v38 = vsel %vm2007_vm4, %v6934_v62, 0.0  ;;  %v2989_v40 = vsel %vm2007_vm4, %v6944_v56, 0.0  ;;  %v6960_v48 = vpop.eup %4940  ;;  %4954 = vpow2.f32 %v2666_v30 }
 0x493   : > { %v6936_v36 = vpop.xlane.xlu1 %2381  ;;  %v6938_v21 = vpop.xlane.xlu0 %2294  ;;  %v2469_v56 = vsub.f32 %v8455_v25, %v6698_v39  ;;  %4956 = vpow2.f32 %v2672_v17  ;;  %v2678_v39 = vmul.f32 1.442695, %v2471_v2 }
 0x494   : > { %v2734_v62 = vmul.f32 1.442695, %v2499_v16  ;;  %v6966_v55 = vpop.eup %4942  ;;  %v2730_v16 = vmul.f32 1.442695, %v2497_v32 }
 0x495   : > { %v2992_v6 = vsel %vm2007_vm4, %v6966_v55, 0.0  ;;  %v2674_v17 = vmul.f32 1.442695, %v2469_v56  ;;  %v8460_v56 = vld [vmem:[#allocation84_spill] sm:$0xff] }
 0x496   : > { %3083 = vadd.xlane.f32.xlu1 %v3082_v38  ;;  %2960 = vadd.xlane.f32.xlu0 %v2959_v60  ;;  %v8453_v60 = vld [vmem:[#allocation79_spill] sm:$0xff]  ;;  %4958 = vpow2.f32 %v2734_v62  ;;  %v8458_v62 = vld [vmem:[#allocation94_spill] sm:$0xff] }
 0x497   : > { %v2784_v41 = vpop.xlane.xlu1 %2783  ;;  %v6954_v24 = vpop.xlane.xlu0 %2288  ;;  %v2500_v38 = vsub.f32 %v8453_v60, %v6680_v57  ;;  %v2983_v57 = vsel %vm2007_vm4, %v6960_v48, 0.0  ;;  %4960 = vpow2.f32 %v2740_v5  ;;  %v2501_v5 = vsub.f32 %v8460_v56, %v6730_v29 }
 0x498   : > { %v6976_v60 = vpop.eup %4944  ;;  %4962 = vpow2.f32 %v2730_v16 }
 0x499   : > { %v2736_v52 = vmul.f32 1.442695, %v2500_v38  ;;  %v2478_v38 = vsub.f32 %v8458_v62, %v6760_v44  ;;  %v3085_v2 = vsel %vm2007_vm4, %v6976_v60, 0.0 }
 0x49a   : > { %2999 = vadd.xlane.f32.xlu1 %v2998_v61  ;;  %2990 = vadd.xlane.f32.xlu0 %v2989_v40  ;;  %v2503_v61 = vsub.f32 %v8456_v27, %v6714_v43  ;;  %v6982_v40 = vpop.eup %4946 }
 0x49b   : > { %v2778_v9 = vpop.xlane.xlu1 %2777  ;;  %v6972_v30 = vpop.xlane.xlu0 %2390  ;;  %8457 = vst [vmem:[#allocation59_spill] sm:$0xff] %v6982_v40  ;;  %4964 = vpow2.f32 %v2736_v52  ;;  %v3094_v27 = vsel %vm2007_vm4, %v6982_v40, 0.0  ;;  %v8461_v52 = vld [vmem:[#allocation98_spill] sm:$0xff] }
 0x49c   : > { %v6988_v25 = vpop.eup %4948  ;;  %v2742_v43 = vmul.f32 1.442695, %v2503_v61  ;;  %4966 = vpow2.f32 %v2678_v39  ;;  %v2476_v61 = vsub.f32 %v8461_v52, %v6776_v1 }
 0x49d   : > { %8459 = vst [vmem:[#allocation52_spill] sm:$0xff] %v6988_v25  ;;  %4968 = vpow2.f32 %v2674_v17  ;;  %v3088_v40 = vsel %vm2007_vm4, %v6988_v25, 0.0  ;;  %v8463_v17 = vld [vmem:[#allocation102_spill] sm:$0xff] }
 0x49e   : > { %2993 = vadd.xlane.f32.xlu1 %v2992_v6  ;;  %2984 = vadd.xlane.f32.xlu0 %v2983_v57  ;;  %v6994_v57 = vpop.eup %4950  ;;  %v2692_v6 = vmul.f32 1.442695, %v2478_v38  ;;  %4970 = vrcp.f32 %v2784_v41  ;;  %v2688_v38 = vmul.f32 1.442695, %v2476_v61 }
 0x49f   : > { %v2880_v32 = vpop.xlane.xlu1 %2879  ;;  %v6984_v0 = vpop.xlane.xlu0 %2384  ;;  %4972 = vpow2.f32 %v2742_v43  ;;  %v3001_v39 = vsel %vm2007_vm4, %v6994_v57, 0.0  ;;  %v8464_v43 = vld [vmem:[#allocation103_spill] sm:$0xff] }
 0x4a0   : > { %v7000_v62 = vpop.eup %4952  ;;  %v2479_v56 = vsub.f32 %v8464_v43, %v6810_v31 }
 0x4a1   : > { %8462 = vst [vmem:[#allocation61_spill] sm:$0xff] %v7000_v62  ;;  %v7006_v29 = vpop.eup %4954 }
 0x4a2   : > { %3095 = vadd.xlane.f32.xlu1 %v3094_v27  ;;  %3086 = vadd.xlane.f32.xlu0 %v3085_v2  ;;  %v2738_v27 = vmul.f32 1.442695, %v2501_v5  ;;  %v2510_v2 = vsub.f32 %v8463_v17, %v6792_v34  ;;  %v7012_v52 = vpop.eup %4956  ;;  %v3010_v5 = vsel %vm2007_vm4, %v7000_v62, 0.0  ;;  %v2995_v34 = vsel %vm2007_vm4, %v7006_v29, 0.0 }
 0x4a3   : > { %v2874_v44 = vpop.xlane.xlu1 %2873  ;;  %v2787_v16 = vpop.xlane.xlu0 %2786  ;;  %8465 = vst [vmem:[#allocation62_spill] sm:$0xff] %v7012_v52  ;;  %v2694_v17 = vmul.f32 1.442695, %v2479_v56  ;;  %v3004_v43 = vsel %vm2007_vm4, %v7012_v52, 0.0 }
 0x4a4   : > { %4974 = vrcp.f32 %v2787_v16  ;;  %v7018_v16 = vpop.eup %4958 }
 0x4a5   : > { %4976 = vrcp.f32 %v2778_v9  ;;  %v2756_v9 = vmul.f32 1.442695, %v2510_v2 }
 0x4a6   : > { %3089 = vadd.xlane.f32.xlu1 %v3088_v40  ;;  %3002 = vadd.xlane.f32.xlu0 %v3001_v39  ;;  %4978 = vpow2.f32 %v2692_v6  ;;  %v8466_v40 = vld [vmem:[#allocation110_spill] sm:$0xff]  ;;  %v7022_v39 = vpop.eup %4960 }
 0x4a7   : > { %v2796_v1 = vpop.xlane.xlu1 %2795  ;;  %v2781_v41 = vpop.xlane.xlu0 %2780  ;;  %v2482_v6 = vsub.f32 %v8466_v40, %v6824_v19  ;;  %8467 = vst [vmem:[#allocation65_spill] sm:$0xff] %v7022_v39 }
 0x4a8   : > { %4980 = vrcp.f32 %v2781_v41  ;;  %v7024_v41 = vpop.eup %4962 }
 0x4a9   : > { %4982 = vpow2.f32 %v2738_v27  ;;  %8468 = vst [vmem:[#allocation64_spill] sm:$0xff] %v7024_v41  ;;  %v3097_v27 = vsel %vm2007_vm4, %v7018_v16, 0.0  ;;  %v7030_v2 = vpop.eup %4964  ;;  %v2700_v19 = vmul.f32 1.442695, %v2482_v6 }
 0x4aa   : > { %3011 = vadd.xlane.f32.xlu1 %v3010_v5  ;;  %2996 = vadd.xlane.f32.xlu0 %v2995_v34  ;;  %4984 = vrcp.f32 %v2880_v32  ;;  %8469 = vst [vmem:[#allocation67_spill] sm:$0xff] %v7030_v2  ;;  %v8470_v32 = vld [vmem:[#allocation114_spill] sm:$0xff] }
 0x4ab   : > { %v2790_v31 = vpop.xlane.xlu1 %2789  ;;  %v2883_v61 = vpop.xlane.xlu0 %2882  ;;  %4986 = vpow2.f32 %v2688_v38  ;;  %v2480_v5 = vsub.f32 %v8470_v32, %v6840_v14  ;;  %v3091_v14 = vsel %vm2007_vm4, %v7024_v41, 0.0 }
 0x4ac   : > { %4988 = vrcp.f32 %v2883_v61  ;;  %v7034_v38 = vpop.eup %4966  ;;  %v8473_v61 = vld [vmem:[#allocation111_spill] sm:$0xff] }
 0x4ad   : > { %4990 = vpow2.f32 %v2756_v9  ;;  %8471 = vst [vmem:[#allocation66_spill] sm:$0xff] %v7034_v38  ;;  %v7036_v40 = vpop.eup %4968  ;;  %v2511_v52 = vsub.f32 %v8473_v61, %v6842_v49  ;;  %v3106_v9 = vsel %vm2007_vm4, %v7022_v39, 0.0  ;;  %v8476_v39 = vld [vmem:[#allocation119_spill] sm:$0xff] }
 0x4ae   : > { %3005 = vadd.xlane.f32.xlu1 %v3004_v43  ;;  %3098 = vadd.xlane.f32.xlu0 %v3097_v27  ;;  %4992 = vrcp.f32 %v2874_v44  ;;  %8472 = vst [vmem:[#allocation69_spill] sm:$0xff] %v7036_v40  ;;  %v4971_v62 = vpop.eup %4970  ;;  %v2696_v44 = vmul.f32 1.442695, %v2480_v5  ;;  %v8475_v43 = vld [vmem:[#allocation118_spill] sm:$0xff]  ;;  %v2483_v25 = vsub.f32 %v8476_v39, %v6874_v3 }
 0x4af   : > { %v2892_v56 = vpop.xlane.xlu1 %2891  ;;  %v2877_v34 = vpop.xlane.xlu0 %2876  ;;  %4994 = vpow2.f32 %v2694_v17  ;;  %v2514_v27 = vsub.f32 %v8475_v43, %v6856_v18  ;;  %v2758_v61 = vmul.f32 1.442695, %v2511_v52  ;;  %v7051_v41 = vmul.f32 %v4971_v62, %v6390_v22  ;;  %v8478_v3 = vld [vmem:[#allocation122_spill] sm:$0xff] }
 0x4b0   : > { %4996 = vrcp.f32 %v2877_v34  ;;  %v7044_v6 = vpop.eup %4972  ;;  %v3100_v18 = vsel %vm2007_vm4, %v7030_v2, 0.0  ;;  %v2512_v39 = vsub.f32 %v8478_v3, %v6872_v13  ;;  %v8482_v13 = vld [vmem:[#allocation123_spill] sm:$0xff] }
 0x4b1   : > { %8474 = vst [vmem:[#allocation71_spill] sm:$0xff] %v7044_v6  ;;  %4998 = vpow2.f32 %v2700_v19  ;;  %v4975_v17 = vpop.eup %4974  ;;  %v2764_v52 = vmul.f32 1.442695, %v2514_v27  ;;  %v2702_v27 = vmul.f32 1.442695, %v2483_v25  ;;  %v8484_v25 = vld [vmem:[#allocation125_spill] sm:$0xff] }
 0x4b2   : > { %3107 = vadd.xlane.f32.xlu1 %v3106_v9  ;;  %3092 = vadd.xlane.f32.xlu0 %v3091_v14  ;;  %5000 = vrcp.f32 %v2796_v1  ;;  %v4977_v34 = vpop.eup %4976  ;;  %v7054_v19 = vmul.f32 %v4975_v17, %v6432_v12  ;;  %v3013_v1 = vsel %vm2007_vm4, %v7034_v38, 0.0 }
 0x4b3   : > { %v2886_v49 = vpop.xlane.xlu1 %2885  ;;  %v2799_v32 = vpop.xlane.xlu0 %2798  ;;  %v7069_v43 = vmul.f32 %v4977_v34, %v6406_v28  ;;  %v2760_v34 = vmul.f32 1.442695, %v2512_v39  ;;  %v2515_v39 = vsub.f32 %v6330_v15, %v6906_v4 }
 0x4b4   : > { %v7056_v5 = vpop.eup %4978  ;;  %5002 = vrcp.f32 %v2799_v32  ;;  %v2481_v32 = vsub.f32 %v8482_v13, %v6890_v7 }
 0x4b5   : > { %8477 = vst [vmem:[#allocation70_spill] sm:$0xff] %v7056_v5  ;;  %v4981_v9 = vpop.eup %4980  ;;  %5004 = vpow2.f32 %v2696_v44  ;;  %8480 = vst [vmem:[#allocation72_spill] sm:$0xff] %v7069_v43 }
 0x4b6   : > { %3101 = vadd.xlane.f32.xlu1 %v3100_v18  ;;  %3014 = vadd.xlane.f32.xlu0 %v3013_v1  ;;  %v7066_v12 = vpop.eup %4982  ;;  %5006 = vrcp.f32 %v2790_v31  ;;  %v7072_v17 = vmul.f32 %v4981_v9, %v6448_v50  ;;  %v3034_v31 = vsel %vm2007_vm4, %v7056_v5, 0.0  ;;  %v3007_v1 = vsel %vm2007_vm4, %v7036_v40, 0.0 }
 0x4b7   : > { %8479 = vst [vmem:[#allocation73_spill] sm:$0xff] %v7066_v12  ;;  %v2808_v62 = vpop.xlane.xlu1 %2807  ;;  %v2793_v14 = vpop.xlane.xlu0 %2792  ;;  %5008 = vpow2.f32 %v2758_v61  ;;  %v2486_v61 = vsub.f32 %v8484_v25, %v6888_v46 }
 0x4b8   : > { %8481 = vst [vmem:[#allocation75_spill] sm:$0xff] %v7072_v17  ;;  %v4985_v44 = vpop.eup %4984  ;;  %5010 = vrcp.f32 %v2793_v14 }
 0x4b9   : > { %v7076_v18 = vpop.eup %4986  ;;  %5012 = vpow2.f32 %v2764_v52  ;;  %v7089_v14 = vmul.f32 %v4985_v44, %v6422_v37  ;;  %v2698_v52 = vmul.f32 1.442695, %v2481_v32  ;;  %v2708_v44 = vmul.f32 1.442695, %v2486_v61 }
 0x4ba   : > { %8483 = vst [vmem:[#allocation74_spill] sm:$0xff] %v7076_v18  ;;  %v4989_v50 = vpop.eup %4988  ;;  %3035 = vadd.xlane.f32.xlu1 %v3034_v31  ;;  %3008 = vadd.xlane.f32.xlu0 %v3007_v1  ;;  %5014 = vrcp.f32 %v2892_v56  ;;  %v3028_v56 = vsel %vm2007_vm4, %v7076_v18, 0.0  ;;  %v3109_v31 = vsel %vm2007_vm4, %v7044_v6, 0.0  ;;  %v2513_v61 = vsub.f32 %v6344_v47, %v6922_v8 }
 0x4bb   : > { %v7086_v7 = vpop.eup %4990  ;;  %v2802_v9 = vpop.xlane.xlu1 %2801  ;;  %8486 = vst [vmem:[#allocation76_spill] sm:$0xff] %v7089_v14  ;;  %v7092_v13 = vmul.f32 %v4989_v50, %v6464_v54  ;;  %5016 = vpow2.f32 %v2702_v27  ;;  %v8489_v27 = vld [vmem:[#allocation126_spill] sm:$0xff]  ;;  %v8566_v14 = vld [vmem:[#allocation55_spill] sm:$0xff] }
 0x4bc   : > { %8485 = vst [vmem:[#allocation77_spill] sm:$0xff] %v7086_v7  ;;  %v2895_v3 = vpop.xlane.xlu0 %2894  ;;  %v4993_v28 = vpop.eup %4992  ;;  %v2484_v32 = vsub.f32 %v8489_v27, %v6904_v10  ;;  %v3130_v10 = vsel %vm2007_vm4, %v7086_v7, 0.0  ;;  %v8508_v7 = vld [vmem:[#allocation146_spill] sm:$0xff] }
 0x4bd   : > { %8487 = vst [vmem:[#allocation79_spill] sm:$0xff] %v7092_v13  ;;  %v7096_v46 = vpop.eup %4994  ;;  %5018 = vrcp.f32 %v2895_v3  ;;  %v7109_v50 = vmul.f32 %v4993_v28, %v6438_v42 }
 0x4be   : > { %8488 = vst [vmem:[#allocation78_spill] sm:$0xff] %v7096_v46  ;;  %v4997_v54 = vpop.eup %4996  ;;  %5020 = vpow2.f32 %v2760_v34  ;;  %3029 = vadd.xlane.f32.xlu1 %v3028_v56  ;;  %3110 = vadd.xlane.f32.xlu0 %v3109_v31  ;;  %v2766_v34 = vmul.f32 1.442695, %v2515_v39  ;;  %v8494_v56 = vld [vmem:[#allocation133_spill] sm:$0xff] }
 0x4bf   : > { %v7106_v15 = vpop.eup %4998  ;;  %5022 = vrcp.f32 %v2886_v49  ;;  %v2904_v4 = vpop.xlane.xlu1 %2903  ;;  %8491 = vst [vmem:[#allocation82_spill] sm:$0xff] %v7109_v50  ;;  %v7112_v25 = vmul.f32 %v4997_v54, %v6480_v58  ;;  %v3103_v49 = vsel %vm2007_vm4, %v7066_v12, 0.0  ;;  %v2704_v58 = vmul.f32 1.442695, %v2484_v32  ;;  %v8495_v54 = vld [vmem:[#allocation140_spill] sm:$0xff] }
 0x4c0   : > { %8490 = vst [vmem:[#allocation80_spill] sm:$0xff] %v7106_v15  ;;  %v2889_v1 = vpop.xlane.xlu0 %2888  ;;  %v5001_v3 = vpop.eup %5000  ;;  %5024 = vpow2.f32 %v2698_v52  ;;  %v2518_v52 = vsub.f32 %v6354_v20, %v6920_v23  ;;  %v8496_v32 = vld [vmem:[#allocation128_spill] sm:$0xff]  ;;  %v3046_v23 = vsel %vm2007_vm4, %v7106_v15, 0.0 }
 0x4c1   : > { %8492 = vst [vmem:[#allocation94_spill] sm:$0xff] %v7112_v25  ;;  %5026 = vrcp.f32 %v2889_v1  ;;  %v5003_v28 = vpop.eup %5002  ;;  %v7127_v31 = vmul.f32 %v5001_v3, %v8494_v56  ;;  %v2487_v42 = vsub.f32 %v8496_v32, %v6938_v21  ;;  %v8500_v56 = vld [vmem:[#allocation135_spill] sm:$0xff]  ;;  %v8537_v12 = vld [vmem:[#allocation136_spill] sm:$0xff] }
 0x4c2   : > { %5028 = vpow2.f32 %v2708_v44  ;;  %3131 = vadd.xlane.f32.xlu1 %v3130_v10  ;;  %3104 = vadd.xlane.f32.xlu0 %v3103_v49  ;;  %v7124_v39 = vpop.eup %5004  ;;  %v7130_v27 = vmul.f32 %v5003_v28, %v8495_v54  ;;  %v2762_v44 = vmul.f32 1.442695, %v2513_v61  ;;  %v2772_v49 = vmul.f32 1.442695, %v2518_v52  ;;  %v8501_v32 = vld [vmem:[#allocation143_spill] sm:$0xff]  ;;  %v8502_v52 = vld [vmem:[#allocation129_spill] sm:$0xff] }
 0x4c3   : > { %8493 = vst [vmem:[#allocation84_spill] sm:$0xff] %v7124_v39  ;;  %5030 = vrcp.f32 %v2808_v62  ;;  %v2898_v47 = vpop.xlane.xlu1 %2897  ;;  %v5007_v1 = vpop.eup %5006  ;;  %v3037_v62 = vsel %vm2007_vm4, %v7096_v46, 0.0  ;;  %v2485_v3 = vsub.f32 %v8502_v52, %v6954_v24  ;;  %v8560_v25 = vld [vmem:[#allocation83_spill] sm:$0xff] }
 0x4c4   : > { %v2811_v8 = vpop.xlane.xlu0 %2810  ;;  %5032 = vpow2.f32 %v2766_v34  ;;  %v7134_v20 = vpop.eup %5008  ;;  %v8498_v34 = vld [vmem:[#allocation127_spill] sm:$0xff]  ;;  %v7147_v54 = vmul.f32 %v5007_v1, %v8500_v56 }
 0x4c5   : > { %8497 = vst [vmem:[#allocation98_spill] sm:$0xff] %v7134_v20  ;;  %5034 = vrcp.f32 %v2811_v8  ;;  %v5011_v10 = vpop.eup %5010  ;;  %v2516_v61 = vsub.f32 %v8498_v34, %v6936_v36  ;;  %v8505_v34 = vld [vmem:[#allocation63_spill] sm:$0xff] }
 0x4c6   : > { %5036 = vpow2.f32 %v2704_v58  ;;  %3047 = vadd.xlane.f32.xlu1 %v3046_v23  ;;  %3038 = vadd.xlane.f32.xlu0 %v3037_v62  ;;  %v7144_v21 = vpop.eup %5012  ;;  %v7150_v37 = vmul.f32 %v5011_v10, %v8501_v32  ;;  %v2710_v58 = vmul.f32 1.442695, %v2487_v42  ;;  %v3133_v23 = vsel %vm2007_vm4, %v7134_v20, 0.0  ;;  %v8504_v10 = vld [vmem:[#allocation92_spill] sm:$0xff]  ;;  %v8507_v32 = vld [vmem:[#allocation137_spill] sm:$0xff] }
 0x4c7   : > { %8499 = vst [vmem:[#allocation102_spill] sm:$0xff] %v7144_v21  ;;  %5038 = vrcp.f32 %v2802_v9  ;;  %v2820_v28 = vpop.xlane.xlu1 %2819  ;;  %v5015_v22 = vpop.eup %5014  ;;  %v3040_v9 = vsel %vm2007_vm4, %v7124_v39, 0.0  ;;  %v2768_v42 = vmul.f32 1.442695, %v2516_v61  ;;  %v2706_v20 = vmul.f32 1.442695, %v2485_v3 }
 0x4c8   : > { %v2805_v8 = vpop.xlane.xlu0 %2804  ;;  %5040 = vpow2.f32 %v2762_v44  ;;  %v7154_v36 = vpop.eup %5016  ;;  %v2492_v44 = vsub.f32 %v8505_v34, %v8504_v10  ;;  %v7167_v52 = vmul.f32 %v5015_v22, %v8507_v32  ;;  %v8509_v10 = vld [vmem:[#allocation130_spill] sm:$0xff] }
 0x4c9   : > { %8503 = vst [vmem:[#allocation103_spill] sm:$0xff] %v7154_v36  ;;  %5042 = vrcp.f32 %v2805_v8 }
 0x4ca   : > { %v5019_v62 = vpop.eup %5018  ;;  %5044 = vpow2.f32 %v2772_v49  ;;  %3041 = vadd.xlane.f32.xlu1 %v3040_v9  ;;  %3134 = vadd.xlane.f32.xlu0 %v3133_v23  ;;  %v2519_v49 = vsub.f32 %v8509_v10, %v6972_v30  ;;  %v3049_v9 = vsel %vm2007_vm4, %v7154_v36, 0.0  ;;  %v2720_v23 = vmul.f32 1.442695, %v2492_v44  ;;  %v8515_v10 = vld [vmem:[#allocation85_spill] sm:$0xff]  ;;  %v8517_v44 = vld [vmem:[#allocation107_spill] sm:$0xff]  ;;  %v8545_v36 = vld [vmem:[#allocation100_spill] sm:$0xff] }
 0x4cb   : > { %v7164_v24 = vpop.eup %5020  ;;  %5046 = vrcp.f32 %v2904_v4  ;;  %v2814_v8 = vpop.xlane.xlu1 %2813  ;;  %v7170_v18 = vmul.f32 %v5019_v62, %v8508_v7  ;;  %v3142_v4 = vsel %vm2007_vm4, %v7144_v21, 0.0  ;;  %v2477_v46 = vsub.f32 %v8517_v44, %v6826_v45 }
 0x4cc   : > { %8506 = vst [vmem:[#allocation110_spill] sm:$0xff] %v7164_v24  ;;  %v2907_v56 = vpop.xlane.xlu0 %2906  ;;  %v5023_v1 = vpop.eup %5022  ;;  %5048 = vpow2.f32 %v2710_v58  ;;  %v8511_v58 = vld [vmem:[#allocation106_spill] sm:$0xff] }
 0x4cd   : > { %v7174_v61 = vpop.eup %5024  ;;  %5050 = vrcp.f32 %v2907_v56  ;;  %v2508_v3 = vsub.f32 %v8511_v58, %v6808_v63  ;;  %v8513_v56 = vld [vmem:[#allocation141_spill] sm:$0xff]  ;;  %v2774_v63 = vmul.f32 1.442695, %v2519_v49  ;;  %v2690_v39 = vmul.f32 1.442695, %v2477_v46 }
 0x4ce   : > { %8510 = vst [vmem:[#allocation114_spill] sm:$0xff] %v7174_v61  ;;  %v5027_v7 = vpop.eup %5026  ;;  %5052 = vpow2.f32 %v2768_v42  ;;  %3143 = vadd.xlane.f32.xlu1 %v3142_v4  ;;  %3050 = vadd.xlane.f32.xlu0 %v3049_v9  ;;  %v7187_v32 = vmul.f32 %v5023_v1, %v8513_v56  ;;  %v3043_v4 = vsel %vm2007_vm4, %v7174_v61, 0.0  ;;  %v8520_v58 = vld [vmem:[#allocation49_spill] sm:$0xff] }
 0x4cf   : > { %v7184_v30 = vpop.eup %5028  ;;  %5054 = vrcp.f32 %v2898_v47  ;;  %v2916_v62 = vpop.xlane.xlu1 %2915  ;;  %v7190_v5 = vmul.f32 %v5027_v7, %v8515_v10  ;;  %v3136_v47 = vsel %vm2007_vm4, %v7164_v24, 0.0  ;;  %v8519_v7 = vld [vmem:[#allocation132_spill] sm:$0xff]  ;;  %v2752_v45 = vmul.f32 1.442695, %v2508_v3 }
 0x4d0   : > { %8512 = vst [vmem:[#allocation111_spill] sm:$0xff] %v7184_v30  ;;  %v2901_v34 = vpop.xlane.xlu0 %2900  ;;  %8514 = vst [vmem:[#allocation118_spill] sm:$0xff] %v7187_v32  ;;  %v5031_v22 = vpop.eup %5030  ;;  %5056 = vpow2.f32 %v2706_v20  ;;  %v2458_v56 = vsub.f32 %v8520_v58, %v8519_v7  ;;  %v8522_v10 = vld [vmem:[#allocation144_spill] sm:$0xff] }
 0x4d1   : > { %8516 = vst [vmem:[#allocation119_spill] sm:$0xff] %v7190_v5  ;;  %v7194_v42 = vpop.eup %5032  ;;  %5058 = vrcp.f32 %v2901_v34  ;;  %v7209_v44 = vmul.f32 %v5031_v22, %v8522_v10  ;;  %v8523_v24 = vld [vmem:[#allocation16_spill] sm:$0xff]  ;;  %v8600_v5 = vld [vmem:[#allocation42_spill] sm:$0xff] }
 0x4d2   : > { %8518 = vst [vmem:[#allocation122_spill] sm:$0xff] %v7194_v42  ;;  %v5035_v9 = vpop.eup %5034  ;;  %5060 = vpow2.f32 %v2720_v23  ;;  %3137 = vadd.xlane.f32.xlu1 %v3136_v47  ;;  %3044 = vadd.xlane.f32.xlu0 %v3043_v4  ;;  %v8524_v23 = vld [vmem:[#allocation131_spill] sm:$0xff]  ;;  %v3145_v4 = vsel %vm2007_vm4, %v7194_v42, 0.0  ;;  %v8529_v10 = vld [vmem:[#allocation88_spill] sm:$0xff] }
 0x4d3   : > { %v7204_v20 = vpop.eup %5036  ;;  %5062 = vrcp.f32 %v2820_v28  ;;  %v7206_v49 = vpop.xlane.xlu1 %2909  ;;  %v7212_v21 = vmul.f32 %v5035_v9, %v8523_v24  ;;  %v2517_v3 = vsub.f32 %v8524_v23, %v6984_v0  ;;  %v3058_v28 = vsel %vm2007_vm4, %v7184_v30, 0.0  ;;  %v8527_v0 = vld [vmem:[#allocation17_spill] sm:$0xff]  ;;  %v8530_v42 = vld [vmem:[#allocation15_spill] sm:$0xff] }
 0x4d4   : > { %8521 = vst [vmem:[#allocation123_spill] sm:$0xff] %v7204_v20  ;;  %v2823_v34 = vpop.xlane.xlu0 %2822  ;;  %v5039_v1 = vpop.eup %5038  ;;  %5064 = vpow2.f32 %v2774_v63  ;;  %v2652_v9 = vmul.f32 1.442695, %v2458_v56  ;;  %v8528_v63 = vld [vmem:[#allocation68_spill] sm:$0xff] }
 0x4d5   : > { %v7216_v47 = vpop.eup %5040  ;;  %5066 = vrcp.f32 %v2823_v34  ;;  %v2493_v7 = vsub.f32 %v8528_v63, %v8527_v0  ;;  %v7231_v23 = vmul.f32 %v5039_v1, %v8529_v10  ;;  %v8531_v56 = vld [vmem:[#allocation112_spill] sm:$0xff]  ;;  %v8538_v1 = vld [vmem:[#allocation53_spill] sm:$0xff] }
 0x4d6   : > { %8525 = vst [vmem:[#allocation125_spill] sm:$0xff] %v7216_v47  ;;  %v5043_v24 = vpop.eup %5042  ;;  %5068 = vpow2.f32 %v2752_v45  ;;  %3059 = vadd.xlane.f32.xlu1 %v3058_v28  ;;  %3146 = vadd.xlane.f32.xlu0 %v3145_v4  ;;  %v8532_v45 = vld [vmem:[#allocation81_spill] sm:$0xff]  ;;  %v2770_v4 = vmul.f32 1.442695, %v2517_v3  ;;  %v3139_v0 = vsel %vm2007_vm4, %v7216_v47, 0.0  ;;  %v2490_v15 = vsub.f32 %v8538_v1, %v8537_v12 }
 0x4d7   : > { %v7224_v46 = vpop.eup %5044  ;;  %5070 = vrcp.f32 %v2814_v8  ;;  %v7228_v58 = vpop.xlane.xlu1 %2831  ;;  %v7234_v61 = vmul.f32 %v5043_v24, %v8530_v42  ;;  %v2474_v28 = vsub.f32 %v8532_v45, %v8531_v56  ;;  %v3052_v8 = vsel %vm2007_vm4, %v7204_v20, 0.0  ;;  %v8536_v56 = vld [vmem:[#allocation93_spill] sm:$0xff] }
 0x4d8   : > { %8526 = vst [vmem:[#allocation126_spill] sm:$0xff] %v7224_v46  ;;  %v2817_v34 = vpop.xlane.xlu0 %2816  ;;  %v5047_v22 = vpop.eup %5046  ;;  %5072 = vpow2.f32 %v2690_v39  ;;  %v2722_v39 = vmul.f32 1.442695, %v2493_v7  ;;  %v2716_v20 = vmul.f32 1.442695, %v2490_v15 }
 0x4d9   : > { %v7238_v2 = vpop.eup %5048  ;;  %5074 = vrcp.f32 %v2817_v34  ;;  %v8535_v34 = vld [vmem:[#allocation13_spill] sm:$0xff] }
 0x4da   : > { %8533 = vst [vmem:[#allocation133_spill] sm:$0xff] %v7238_v2  ;;  %v5051_v42 = vpop.eup %5050  ;;  %5076 = vpow2.f32 %v2652_v9  ;;  %3053 = vadd.xlane.f32.xlu1 %v3052_v8  ;;  %3140 = vadd.xlane.f32.xlu0 %v3139_v0  ;;  %v7251_v10 = vmul.f32 %v5047_v22, %v8535_v34  ;;  %v2684_v9 = vmul.f32 1.442695, %v2474_v28  ;;  %v8539_v8 = vld [vmem:[#allocation115_spill] sm:$0xff]  ;;  %v3061_v22 = vsel %vm2007_vm4, %v7238_v2, 0.0 }
 0x4db   : > { %v7246_v24 = vpop.eup %5052  ;;  %5078 = vrcp.f32 %v2916_v62  ;;  %v7248_v3 = vpop.xlane.xlu1 %2825  ;;  %v7254_v45 = vmul.f32 %v5051_v42, %v8536_v56  ;;  %v2509_v0 = vsub.f32 %v8539_v8, %v6858_v53  ;;  %v3154_v62 = vsel %vm2007_vm4, %v7224_v46, 0.0  ;;  %v8542_v28 = vld [vmem:[#allocation139_spill] sm:$0xff]  ;;  %v8543_v53 = vld [vmem:[#allocation54_spill] sm:$0xff]  ;;  %v8544_v56 = vld [vmem:[#allocation89_spill] sm:$0xff] }
 0x4dc   : > { %8534 = vst [vmem:[#allocation140_spill] sm:$0xff] %v7246_v24  ;;  %v2919_v63 = vpop.xlane.xlu0 %2918  ;;  %v5055_v47 = vpop.eup %5054  ;;  %5080 = vpow2.f32 %v2770_v4  ;;  %v2459_v4 = vsub.f32 %v8543_v53, %v8542_v28  ;;  %v8552_v2 = vld [vmem:[#allocation51_spill] sm:$0xff] }
 0x4dd   : > { %v7260_v7 = vpop.eup %5056  ;;  %5082 = vrcp.f32 %v2919_v63  ;;  %v7277_v8 = vmul.f32 %v5055_v47, %v8544_v56  ;;  %v2754_v28 = vmul.f32 1.442695, %v2509_v0  ;;  %v8549_v56 = vld [vmem:[#allocation96_spill] sm:$0xff] }
 0x4de   : > { %8540 = vst [vmem:[#allocation128_spill] sm:$0xff] %v7260_v7  ;;  %v5059_v34 = vpop.eup %5058  ;;  %3155 = vadd.xlane.f32.xlu1 %v3154_v62  ;;  %3062 = vadd.xlane.f32.xlu0 %v3061_v22  ;;  %5084 = vpow2.f32 %v2722_v39  ;;  %v8546_v62 = vld [vmem:[#allocation86_spill] sm:$0xff]  ;;  %v3148_v39 = vsel %vm2007_vm4, %v7246_v24, 0.0  ;;  %v3055_v53 = vsel %vm2007_vm4, %v7260_v7, 0.0 }
 0x4df   : > { %v7268_v12 = vpop.eup %5060  ;;  %v7272_v1 = vpop.xlane.xlu1 %2927  ;;  %v7280_v46 = vmul.f32 %v5059_v34, %v8545_v36  ;;  %5086 = vpow2.f32 %v2684_v9  ;;  %v2506_v22 = vsub.f32 %v8546_v62, %v6728_v51  ;;  %v2654_v9 = vmul.f32 1.442695, %v2459_v4  ;;  %v8550_v62 = vld [vmem:[#allocation97_spill] sm:$0xff]  ;;  %v8551_v7 = vld [vmem:[#allocation134_spill] sm:$0xff]  ;;  %v8554_v4 = vld [vmem:[#allocation87_spill] sm:$0xff] }
 0x4e0   : > { %8541 = vst [vmem:[#allocation127_spill] sm:$0xff] %v7268_v12  ;;  %v7274_v63 = vpop.xlane.xlu0 %2912  ;;  %v5063_v42 = vpop.eup %5062  ;;  %v2456_v30 = vsub.f32 %v8552_v2, %v8551_v7  ;;  %5088 = vpow2.f32 %v2716_v20  ;;  %v2475_v38 = vsub.f32 %v8554_v4, %v6746_v33  ;;  %v8556_v2 = vld [vmem:[#allocation58_spill] sm:$0xff]  ;;  %v8559_v4 = vld [vmem:[#allocation104_spill] sm:$0xff] }
 0x4e1   : > { %v7284_v6 = vpop.eup %5064  ;;  %v7297_v0 = vmul.f32 %v5063_v42, %v8549_v56  ;;  %v2748_v47 = vmul.f32 1.442695, %v2506_v22  ;;  %5090 = vpow2.f32 %v2754_v28  ;;  %v8558_v33 = vld [vmem:[#allocation18_spill] sm:$0xff] }
 0x4e2   : > { %8547 = vst [vmem:[#allocation135_spill] sm:$0xff] %v7284_v6  ;;  %v5067_v36 = vpop.eup %5066  ;;  %3149 = vadd.xlane.f32.xlu1 %v3148_v39  ;;  %3056 = vadd.xlane.f32.xlu0 %v3055_v53  ;;  %v3076_v39 = vsel %vm2007_vm4, %v7268_v12, 0.0  ;;  %v3157_v42 = vsel %vm2007_vm4, %v7284_v6, 0.0  ;;  %5092 = vpow2.f32 %v2654_v9  ;;  %v2648_v50 = vmul.f32 1.442695, %v2456_v30 }
 0x4e3   : > { %v7292_v15 = vpop.eup %5068  ;;  %v2922_v34 = vpop.xlane.xlu1 %2921  ;;  %v7300_v24 = vmul.f32 %v5067_v36, %v8550_v62  ;;  %v8555_v62 = vld [vmem:[#allocation145_spill] sm:$0xff]  ;;  %5094 = vpow2.f32 %v2748_v47 }
 0x4e4   : > { %8548 = vst [vmem:[#allocation143_spill] sm:$0xff] %v7292_v15  ;;  %v7294_v51 = vpop.xlane.xlu0 %2834  ;;  %v5071_v40 = vpop.eup %5070  ;;  %v2491_v20 = vsub.f32 %v8556_v2, %v8555_v62  ;;  %v2472_v62 = vsub.f32 %v8560_v25, %v6712_v35  ;;  %v3124_v9 = vsel %vm2007_vm4, %v7292_v15, 0.0  ;;  %v8562_v25 = vld [vmem:[#allocation20_spill] sm:$0xff]  ;;  %5096 = vpow2.f32 %v2648_v50 }
 0x4e5   : > { %v7306_v53 = vpop.eup %5072  ;;  %v7323_v28 = vmul.f32 %v5071_v40, %v8558_v33 }
 0x4e6   : > { %8553 = vst [vmem:[#allocation129_spill] sm:$0xff] %v7306_v53  ;;  %v5075_v56 = vpop.eup %5074  ;;  %3077 = vadd.xlane.f32.xlu1 %v3076_v39  ;;  %3158 = vadd.xlane.f32.xlu0 %v3157_v42  ;;  %v2686_v42 = vmul.f32 1.442695, %v2475_v38  ;;  %v3031_v2 = vsel %vm2007_vm4, %v7306_v53, 0.0  ;;  %v2718_v33 = vmul.f32 1.442695, %v2491_v20 }
 0x4e7   : > { %v7316_v7 = vpop.eup %5076  ;;  %v7318_v22 = vpop.xlane.xlu1 %2843  ;;  %v7326_v6 = vmul.f32 %v5075_v56, %v8559_v4  ;;  %v8563_v38 = vld [vmem:[#allocation101_spill] sm:$0xff]  ;;  %v8565_v53 = vld [vmem:[#allocation138_spill] sm:$0xff]  ;;  %v2680_v13 = vmul.f32 1.442695, %v2472_v62 }
 0x4e8   : > { %8557 = vst [vmem:[#allocation92_spill] sm:$0xff] %v7316_v7  ;;  %v7320_v12 = vpop.xlane.xlu0 %2828  ;;  %v5079_v36 = vpop.eup %5078  ;;  %v2488_v40 = vsub.f32 %v8566_v14, %v8565_v53  ;;  %v2974_v20 = vsel %vm2007_vm4, %v7316_v7, 0.0  ;;  %5098 = vpow2.f32 %v2686_v42  ;;  %v8569_v62 = vld [vmem:[#allocation142_spill] sm:$0xff] }
 0x4e9   : > { %v7330_v39 = vpop.eup %5080  ;;  %v7343_v47 = vmul.f32 %v5079_v36, %v8562_v25  ;;  %5100 = vpow2.f32 %v2718_v33  ;;  %v8572_v7 = vld [vmem:[#allocation90_spill] sm:$0xff] }
 0x4ea   : > { %8561 = vst [vmem:[#allocation63_spill] sm:$0xff] %v7330_v39  ;;  %v5083_v56 = vpop.eup %5082  ;;  %3125 = vadd.xlane.f32.xlu1 %v3124_v9  ;;  %3032 = vadd.xlane.f32.xlu0 %v3031_v2  ;;  %v8568_v2 = vld [vmem:[#allocation95_spill] sm:$0xff]  ;;  %5102 = vrcp.f32 %v2922_v34  ;;  %v2712_v53 = vmul.f32 1.442695, %v2488_v40  ;;  %v2504_v25 = vsub.f32 %v8572_v7, %v6744_v59 }
 0x4eb   : > { %v7338_v30 = vpop.xlane.xlu1 %2837  ;;  %v7346_v4 = vmul.f32 %v5083_v56, %v8563_v38  ;;  %v7348_v15 = vpop.eup %5084  ;;  %v2507_v36 = vsub.f32 %v8568_v2, %v6778_v26  ;;  %v3151_v56 = vsel %vm2007_vm4, %v7330_v39, 0.0  ;;  %v8570_v38 = vld [vmem:[#allocation56_spill] sm:$0xff]  ;;  %5104 = vpow2.f32 %v2680_v13 }
 0x4ec   : > { %v7340_v35 = vpop.xlane.xlu0 %2930  ;;  %8564 = vst [vmem:[#allocation137_spill] sm:$0xff] %v7348_v15  ;;  %v7354_v9 = vpop.eup %5086  ;;  %v2457_v42 = vsub.f32 %v8570_v38, %v8569_v62  ;;  %v3079_v26 = vsel %vm2007_vm4, %v7348_v15, 0.0 }
 0x4ed   : > { %8567 = vst [vmem:[#allocation146_spill] sm:$0xff] %v7354_v9  ;;  %v7368_v2 = vpop.eup %5088  ;;  %v2750_v33 = vmul.f32 1.442695, %v2507_v36  ;;  %v3022_v34 = vsel %vm2007_vm4, %v7354_v9, 0.0  ;;  %v2744_v36 = vmul.f32 1.442695, %v2504_v25 }
 0x4ee   : > { %2975 = vadd.xlane.f32.xlu1 %v2974_v20  ;;  %3152 = vadd.xlane.f32.xlu0 %v3151_v56  ;;  %8571 = vst [vmem:[#allocation130_spill] sm:$0xff] %v7368_v2  ;;  %v7374_v20 = vpop.eup %5090  ;;  %v2650_v62 = vmul.f32 1.442695, %v2457_v42  ;;  %v3070_v59 = vsel %vm2007_vm4, %v7368_v2, 0.0  ;;  %v8578_v42 = vld [vmem:[#allocation60_spill] sm:$0xff] }
 0x4ef   : > { %v7362_v14 = vpop.xlane.xlu1 %2939  ;;  %8573 = vst [vmem:[#allocation106_spill] sm:$0xff] %v7374_v20  ;;  %v7380_v56 = vpop.eup %5092 }
 0x4f0   : > { %v2925_v50 = vpop.xlane.xlu0 %2924  ;;  %8574 = vst [vmem:[#allocation141_spill] sm:$0xff] %v7380_v56  ;;  %v7384_v7 = vpop.eup %5094 }
 0x4f1   : > { %5106 = vrcp.f32 %v2925_v50  ;;  %8575 = vst [vmem:[#allocation85_spill] sm:$0xff] %v7384_v7  ;;  %v8576_v50 = vld [vmem:[#allocation91_spill] sm:$0xff]  ;;  %v7396_v9 = vpop.eup %5096 }
 0x4f2   : > { %3023 = vadd.xlane.f32.xlu1 %v3022_v34  ;;  %3080 = vadd.xlane.f32.xlu0 %v3079_v26  ;;  %5108 = vpow2.f32 %v2712_v53  ;;  %v2473_v38 = vsub.f32 %v8576_v50, %v6762_v11  ;;  %v3127_v26 = vsel %vm2007_vm4, %v7374_v20, 0.0  ;;  %v8577_v53 = vld [vmem:[#allocation14_spill] sm:$0xff]  ;;  %8579 = vst [vmem:[#allocation107_spill] sm:$0xff] %v7396_v9  ;;  %v3118_v11 = vsel %vm2007_vm4, %v7384_v7, 0.0  ;;  %v8584_v7 = vld [vmem:[#allocation99_spill] sm:$0xff] }
 0x4f3   : > { %v7376_v40 = vpop.xlane.xlu1 %2933  ;;  %5110 = vpow2.f32 %v2750_v33  ;;  %v2489_v2 = vsub.f32 %v8578_v42, %v8577_v53  ;;  %v2977_v33 = vsel %vm2007_vm4, %v7380_v56, 0.0  ;;  %v2968_v56 = vsel %vm2007_vm4, %v7396_v9, 0.0 }
 0x4f4   : > { %v7378_v13 = vpop.xlane.xlu0 %2846  ;;  %5112 = vpow2.f32 %v2650_v62  ;;  %v2682_v25 = vmul.f32 1.442695, %v2473_v38  ;;  %v8583_v38 = vld [vmem:[#allocation121_spill] sm:$0xff] }
 0x4f5   : > { %5114 = vpow2.f32 %v2744_v36  ;;  %v2714_v42 = vmul.f32 1.442695, %v2489_v2  ;;  %v2505_v20 = vsub.f32 %v8584_v7, %v8583_v38  ;;  %v8585_v2 = vld [vmem:[#allocation23_spill] sm:$0xff] }
 0x4f6   : > { %3071 = vadd.xlane.f32.xlu1 %v3070_v59  ;;  %3128 = vadd.xlane.f32.xlu0 %v3127_v26  ;;  %v7402_v59 = vpop.eup %5098  ;;  %5116 = vpow2.f32 %v2682_v25  ;;  %v8587_v25 = vld [vmem:[#allocation28_spill] sm:$0xff] }
 0x4f7   : > { %v7390_v34 = vpop.xlane.xlu1 %2855  ;;  %8580 = vst [vmem:[#allocation132_spill] sm:$0xff] %v7402_v59  ;;  %v7404_v50 = vpop.eup %5100  ;;  %5118 = vpow2.f32 %v2714_v42  ;;  %v2746_v38 = vmul.f32 1.442695, %v2505_v20 }
 0x4f8   : > { %v7392_v15 = vpop.xlane.xlu0 %2840  ;;  %8581 = vst [vmem:[#allocation49_spill] sm:$0xff] %v7404_v50  ;;  %v5103_v53 = vpop.eup %5102 }
 0x4f9   : > { %v7410_v36 = vpop.eup %5104  ;;  %v7423_v17 = vmul.f32 %v5103_v53, %v8585_v2  ;;  %5120 = vpow2.f32 %v2746_v38 }
 0x4fa   : > { %3119 = vadd.xlane.f32.xlu1 %v3118_v11  ;;  %2978 = vadd.xlane.f32.xlu0 %v2977_v33  ;;  %8582 = vst [vmem:[#allocation144_spill] sm:$0xff] %v7410_v36  ;;  %v3025_v11 = vsel %vm2007_vm4, %v7402_v59, 0.0  ;;  %v3016_v9 = vsel %vm2007_vm4, %v7410_v36, 0.0 }
 0x4fb   : > { %v7406_v62 = vpop.xlane.xlu1 %2849  ;;  %8586 = vst [vmem:[#allocation16_spill] sm:$0xff] %v7423_v17 }
 0x4fc   : > { %v7408_v26 = vpop.xlane.xlu0 %2942 }
 0x4fe   : > { %v5107_v33 = vpop.eup %5106  ;;  %2969 = vadd.xlane.f32.xlu1 %v2968_v56  ;;  %3026 = vadd.xlane.f32.xlu0 %v3025_v11  ;;  %v3073_v56 = vsel %vm2007_vm4, %v7404_v50, 0.0 }
 0x4ff   : > { %v7418_v39 = vpop.xlane.xlu1 %2951  ;;  %v7426_v32 = vmul.f32 %v5107_v33, %v8587_v25  ;;  %v7428_v7 = vpop.eup %5108 }
 0x500   : > { %v7420_v43 = vpop.xlane.xlu0 %2936  ;;  %8589 = vst [vmem:[#allocation17_spill] sm:$0xff] %v7428_v7  ;;  %v7436_v59 = vpop.eup %5110  ;;  %v3064_v20 = vsel %vm2007_vm4, %v7428_v7, 0.0 }
 0x501   : > { %8588 = vst [vmem:[#allocation131_spill] sm:$0xff] %v7426_v32  ;;  %8590 = vst [vmem:[#allocation68_spill] sm:$0xff] %v7436_v59  ;;  %v7440_v42 = vpop.eup %5112  ;;  %v3121_v2 = vsel %vm2007_vm4, %v7436_v59, 0.0 }
 0x502   : > { %3017 = vadd.xlane.f32.xlu1 %v3016_v9  ;;  %3074 = vadd.xlane.f32.xlu0 %v3073_v56  ;;  %8591 = vst [vmem:[#allocation88_spill] sm:$0xff] %v7440_v42  ;;  %v7446_v25 = vpop.eup %5114  ;;  %v2971_v56 = vsel %vm2007_vm4, %v7440_v42, 0.0 }
 0x503   : > { %v7438_v53 = vpop.xlane.xlu1 %2945  ;;  %8592 = vst [vmem:[#allocation15_spill] sm:$0xff] %v7446_v25  ;;  %v3112_v9 = vsel %vm2007_vm4, %v7446_v25, 0.0  ;;  %v7452_v36 = vpop.eup %5116 }
 0x504   : > { %v2859_v33 = vpop.xlane.xlu0 %2858  ;;  %8593 = vst [vmem:[#allocation112_spill] sm:$0xff] %v7452_v36  ;;  %v7454_v17 = vpop.eup %5118 }
 0x505   : > { %8594 = vst [vmem:[#allocation81_spill] sm:$0xff] %v7454_v17  ;;  %v3067_v25 = vsel %vm2007_vm4, %v7454_v17, 0.0  ;;  %v690_v17 = vld [vmem:[%s7946_s8 + $0x30] sm:$0xff] }
 0x506   : > { %3065 = vadd.xlane.f32.xlu1 %v3064_v20  ;;  %3122 = vadd.xlane.f32.xlu0 %v3121_v2  ;;  %v3019_v20 = vsel %vm2007_vm4, %v7452_v36, 0.0  ;;  %v7462_v32 = vpop.eup %5120 }
 0x507   : > { %v2868_v11 = vpop.xlane.xlu1 %2867  ;;  %8595 = vst [vmem:[#allocation13_spill] sm:$0xff] %v7462_v32  ;;  %v3115_v42 = vsel %vm2007_vm4, %v7462_v32, 0.0 }
 0x508   : > { %v2853_v50 = vpop.xlane.xlu0 %2852  ;;  %5122 = vrcp.f32 %v2868_v11 }
 0x50a   : > { %3113 = vadd.xlane.f32.xlu1 %v3112_v9  ;;  %2972 = vadd.xlane.f32.xlu0 %v2971_v56 }
 0x50b   : > { %v2862_v38 = vpop.xlane.xlu1 %2861 }
 0x50c   : > { %v2955_v7 = vpop.xlane.xlu0 %2954 }
 0x50e   : > { %3020 = vadd.xlane.f32.xlu0 %v3019_v20 }
 0x50f   : > { %v2964_v2 = vpop.xlane.xlu1 %2963 }
 0x510   : > { %v7458_v59 = vpop.xlane.xlu0 %2948 }
 0x512   : > { %3068 = vadd.xlane.f32.xlu0 %v3067_v25 }
 0x513   : > { %v2958_v9 = vpop.xlane.xlu1 %2957 }
 0x514   : > { %v2871_v56 = vpop.xlane.xlu0 %2870 }
 0x515   : > { %5124 = vrcp.f32 %v2871_v56  ;;  %v8597_v56 = vld [vmem:[#allocation43_spill] sm:$0xff] }
 0x516   : > { %5126 = vrcp.f32 %v7206_v49  ;;  %3116 = vadd.xlane.f32.xlu0 %v3115_v42  ;;  %v3988_v49 = vld [vmem:[%s7948_s10] sm:$0xff] }
 0x517   : > { %5128 = vrcp.f32 %v2862_v38  ;;  %v2988_v20 = vpop.xlane.xlu1 %2987  ;;  %v5123_v38 = vpop.eup %5122 }
 0x518   : > { %v2865_v36 = vpop.xlane.xlu0 %2864  ;;  %5130 = vrcp.f32 %v7274_v63 }
 0x519   : > { %5132 = vrcp.f32 %v2865_v36 }
 0x51a   : > { %5134 = vrcp.f32 %v2859_v33 }
 0x51b   : > { %5136 = vrcp.f32 %v2964_v2  ;;  %724 = vperm.xlu1 %4771, %v690_v17   ;;  %v2982_v11 = vpop.xlane.xlu1 %2981  ;;  %v3989_v17 = vld [vmem:[%s7948_s10 + $0x8] sm:$0xff] }
 0x51c   : > { %v2967_v25 = vpop.xlane.xlu0 %2966  ;;  %5138 = vrcp.f32 %v7390_v34 }
 0x51d   : > { %5140 = vrcp.f32 %v2967_v25 }
 0x51e   : > { %5142 = vrcp.f32 %v7406_v62  ;;  %v8596_v62 = vld [vmem:[#allocation35_spill] sm:$0xff] }
 0x51f   : > { %5144 = vrcp.f32 %v2958_v9  ;;  %3994 = vperm.xlu1 %4771, %v3988_v49   ;;  %v3084_v63 = vpop.xlane.xlu1 %3083  ;;  %v3446_v9 = vmul.f32 %v5123_v38, %v8596_v62  ;;  %v8599_v62 = vld [vmem:[#allocation38_spill] sm:$0xff] }
 0x520   : > { %v2961_v42 = vpop.xlane.xlu0 %2960  ;;  %5146 = vrcp.f32 %v2853_v50  ;;  %v3991_v50 = vld [vmem:[%s7948_s10 + $0x18] sm:$0xff] }
 0x521   : > { %5148 = vrcp.f32 %v2961_v42 }
 0x522   : > { %v5125_v36 = vpop.eup %5124  ;;  %5150 = vrcp.f32 %v2955_v7 }
 0x523   : > { %v7479_v34 = vpop.eup %5126  ;;  %5152 = vrcp.f32 %v2988_v20  ;;  %3999 = vperm.xlu1 %4771, %v3989_v17   ;;  %v3000_v33 = vpop.xlane.xlu1 %2999  ;;  %v3447_v25 = vmul.f32 %v5125_v36, %v8597_v56  ;;  %v8598_v17 = vpack.c.bf16 %v7300_v24, %v7297_v0 }
 0x524   : > { %v2991_v2 = vpop.xlane.xlu0 %2990  ;;  %v5129_v49 = vpop.eup %5128  ;;  %5154 = vrcp.f32 %v7418_v39 }
 0x525   : > { %v5131_v42 = vpop.eup %5130  ;;  %5156 = vrcp.f32 %v2991_v2  ;;  %v3563_v7 = vpack.c.bf16 %v3447_v25, %v3446_v9  ;;  %v3637_v39 = vsel %vm2007_vm4, %v8598_v17, 0  ;;  %v3444_v56 = vmul.f32 %v5129_v49, %v8599_v62  ;;  %v691_v25 = vld [vmem:[%s7946_s8 + $0x38] sm:$0xff]  ;;  %v8603_v17 = vld [vmem:[#allocation124_spill] sm:$0xff] }
 0x526   : > { %v5133_v32 = vpop.eup %5132  ;;  %5158 = vrcp.f32 %v7318_v22 }
 0x527   : > { %v5135_v20 = vpop.eup %5134  ;;  %5160 = vrcp.f32 %v2982_v11  ;;  %4680 = vmatprep.subr.msk.bf16.mxu1 %vm2007_vm4, %v3563_v7  ;;  %4009 = vperm.xlu1 %4771, %v3991_v50   ;;  %v2994_v38 = vpop.xlane.xlu1 %2993  ;;  %v3445_v2 = vmul.f32 %v5133_v32, %v8600_v5  ;;  %v8601_v32 = vld [vmem:[#allocation40_spill] sm:$0xff] }
 0x528   : > { %v2985_v36 = vpop.xlane.xlu0 %2984  ;;  %v5137_v9 = vpop.eup %5136  ;;  %5162 = vrcp.f32 %v7378_v13  ;;  %4457 = vmatpush3.bf16.xpose.msra.mxu1 %v3637_v39  ;;  %v8602_v13 = vld [vmem:[#allocation44_spill] sm:$0xff]  ;;  %v3443_v39 = vmul.f32 %v5135_v20, %v8603_v17  ;;  %v8606_v20 = vpack.c.bf16 %v7346_v4, %v7343_v47  ;;  %v8610_v4 = vld [vmem:[#allocation19_spill] sm:$0xff] }
 0x529   : > { %v5139_v22 = vpop.eup %5138  ;;  %5164 = vrcp.f32 %v2985_v36  ;;  %v3562_v11 = vpack.c.bf16 %v3445_v2, %v3444_v56  ;;  %v3478_v49 = vmul.f32 %v5137_v9, %v8601_v32  ;;  %v3460_v17 = vmul.f32 %v7479_v34, %v8610_v4  ;;  %v8612_v34 = vld [vmem:[#allocation37_spill] sm:$0xff] }
 0x52a   : > { %v5141_v50 = vpop.eup %5140  ;;  %5166 = vrcp.f32 %v7458_v59  ;;  %v8604_v59 = vld [vmem:[#allocation117_spill] sm:$0xff] }
 0x52b   : > { %v5143_v24 = vpop.eup %5142  ;;  %5168 = vrcp.f32 %v3084_v63  ;;  %4681 = vmatprep.subr.msk.bf16.mxu1 %vm2007_vm4, %v3562_v11  ;;  %v3096_v0 = vpop.xlane.xlu1 %3095  ;;  %v3479_v7 = vmul.f32 %v5141_v50, %v8602_v13  ;;  %v3442_v2 = vmul.f32 %v5139_v22, %v8604_v59  ;;  %v8605_v11 = vpack.c.bf16 %v7326_v6, %v7323_v28  ;;  %v8608_v28 = vld [vmem:[#allocation41_spill] sm:$0xff]  ;;  %v8609_v13 = vld [vmem:[#allocation46_spill] sm:$0xff] }
 0x52c   : > { %v3087_v5 = vpop.xlane.xlu0 %3086  ;;  %v5145_v36 = vpop.eup %5144  ;;  %5170 = vrcp.f32 %v7438_v53  ;;  %729 = vperm.xlu0 %4770, %v691_v25   ;;  %v3729_v50 = vsel %vm2007_vm4, %v8606_v20, 0  ;;  %v3990_v53 = vld [vmem:[%s7948_s10 + $0x10] sm:$0xff]  ;;  %v8607_v25 = vld [vmem:[#allocation108_spill] sm:$0xff] }
 0x52d   : > { %v5147_v62 = vpop.eup %5146  ;;  %5172 = vrcp.f32 %v3087_v5  ;;  %v3579_v56 = vpack.c.bf16 %v3479_v7, %v3478_v49  ;;  %v3634_v9 = vsel %vm2007_vm4, %v8605_v11, 0  ;;  %v3461_v5 = vmul.f32 %v5131_v42, %v8607_v25 }
 0x52e   : > { %v5149_v63 = vpop.eup %5148  ;;  %5174 = vrcp.f32 %v7338_v30  ;;  %v3561_v6 = vpack.c.bf16 %v3443_v39, %v3442_v2  ;;  %v3476_v49 = vmul.f32 %v5145_v36, %v8608_v28  ;;  %v8611_v36 = vld [vmem:[#allocation36_spill] sm:$0xff] }
 0x52f   : > { %v5151_v22 = vpop.eup %5150  ;;  %5176 = vrcp.f32 %v3000_v33  ;;  %4688 = vmatprep.subr.msk.bf16.mxu0 %vm2007_vm4, %v3579_v56  ;;  %v3090_v30 = vpop.xlane.xlu1 %3089  ;;  %v3477_v7 = vmul.f32 %v5149_v63, %v8609_v13  ;;  %v3570_v39 = vpack.c.bf16 %v3461_v5, %v3460_v17  ;;  %v3441_v59 = vmul.f32 %v5147_v62, %v8611_v36  ;;  %v8618_v17 = vld [vmem:[#allocation47_spill] sm:$0xff] }
 0x530   : > { %v3003_v32 = vpop.xlane.xlu0 %3002  ;;  %v5153_v47 = vpop.eup %5152  ;;  %5178 = vrcp.f32 %v7392_v15  ;;  %4459 = vmatpush3.bf16.xpose.msra.mxu1 %v3634_v9  ;;  %4475 = vmatpush3.bf16.xpose.msra.mxu0 %v3729_v50  ;;  %v3475_v11 = vmul.f32 %v5151_v22, %v8612_v34  ;;  %v8613_v9 = vld [vmem:[#allocation45_spill] sm:$0xff]  ;;  %v8617_v22 = vpack.c.bf16 %v7212_v21, %v7209_v44  ;;  %v8621_v34 = vld [vmem:[#allocation48_spill] sm:$0xff] }
 0x531   : > { %v5155_v42 = vpop.eup %5154  ;;  %5180 = vrcp.f32 %v3003_v32  ;;  %4004 = vperm.xlu0 %4770, %v3990_v53   ;;  %4682 = vmatprep.subr.msk.bf16.mxu1 %vm2007_vm4, %v3561_v6  ;;  %v3578_v33 = vpack.c.bf16 %v3477_v7, %v3476_v49  ;;  %v7533_v20 = vmul.f32 %v5153_v47, %v8613_v9  ;;  %v8614_v50 = vld [vmem:[#allocation57_spill] sm:$0xff]  ;;  %v3726_v13 = vsel %vm2007_vm4, %v3570_v39, 0 }
 0x532   : > { %v5157_v56 = vpop.eup %5156  ;;  %5182 = vrcp.f32 %v7408_v26  ;;  %v8615_v26 = vld [vmem:[#allocation32_spill] sm:$0xff]  ;;  %v3631_v49 = vsel %vm2007_vm4, %v8617_v22, 0 }
 0x533   : > { %v5159_v2 = vpop.eup %5158  ;;  %5184 = vrcp.f32 %v2994_v38  ;;  %4689 = vmatprep.subr.msk.bf16.mxu0 %vm2007_vm4, %v3578_v33  ;;  %v7529_v15 = vpop.xlane.xlu1 %3011  ;;  %v7536_v53 = vmul.f32 %v5157_v56, %v8614_v50  ;;  %v3440_v62 = vmul.f32 %v5143_v24, %v8615_v26  ;;  %v8616_v38 = vld [vmem:[#allocation34_spill] sm:$0xff]  ;;  %v8619_v56 = vld [vmem:[#allocation27_spill] sm:$0xff] }
 0x534   : > { %v2997_v63 = vpop.xlane.xlu0 %2996  ;;  %v5161_v25 = vpop.eup %5160  ;;  %5186 = vrcp.f32 %v7362_v14  ;;  %v3474_v32 = vmul.f32 %v5155_v42, %v8616_v38 }
 0x535   : > { %v5163_v5 = vpop.eup %5162  ;;  %5188 = vrcp.f32 %v2997_v63  ;;  %v3583_v6 = vpack.c.bf16 %v7536_v53, %v7533_v20  ;;  %v3560_v14 = vpack.c.bf16 %v3441_v59, %v3440_v62  ;;  %v7552_v42 = vmul.f32 %v5161_v25, %v8618_v17  ;;  %v8620_v59 = vld [vmem:[#allocation39_spill] sm:$0xff]  ;;  %v8623_v62 = vld [vmem:[#allocation33_spill] sm:$0xff] }
 0x536   : > { %v5165_v28 = vpop.eup %5164  ;;  %5190 = vrcp.f32 %v7228_v58  ;;  %v3577_v4 = vpack.c.bf16 %v3475_v11, %v3474_v32  ;;  %v8624_v32 = vpack.c.bf16 %v7234_v61, %v7231_v23 }
 0x537   : > { %v5167_v7 = vpop.eup %5166  ;;  %5192 = vrcp.f32 %v3096_v0  ;;  %v7549_v24 = vpop.xlane.xlu1 %3005  ;;  %v7555_v33 = vmul.f32 %v5165_v28, %v6960_v48  ;;  %v3439_v48 = vmul.f32 %v5163_v5, %v8619_v56  ;;  %v8628_v56 = vld [vmem:[#allocation29_spill] sm:$0xff] }
 0x538   : > { %v3099_v47 = vpop.xlane.xlu0 %3098  ;;  %v5169_v58 = vpop.eup %5168  ;;  %5194 = vrcp.f32 %v7294_v51  ;;  %4461 = vmatpush3.bf16.xpose.msra.mxu1 %v3631_v49  ;;  %4477 = vmatpush3.bf16.xpose.msra.mxu0 %v3726_v13  ;;  %v3473_v63 = vmul.f32 %v5167_v7, %v8620_v59  ;;  %v3628_v28 = vsel %vm2007_vm4, %v8624_v32, 0  ;;  %v8626_v7 = vld [vmem:[#allocation50_spill] sm:$0xff] }
 0x539   : > { %v5171_v21 = vpop.eup %5170  ;;  %5196 = vrcp.f32 %v3099_v47  ;;  %4683 = vmatprep.subr.msk.bf16.mxu1 %vm2007_vm4, %v3560_v14  ;;  %4690 = vmatprep.subr.msk.bf16.mxu0 %vm2007_vm4, %v3577_v4  ;;  %v3582_v44 = vpack.c.bf16 %v7555_v33, %v7552_v42  ;;  %v7568_v11 = vmul.f32 %v5169_v58, %v8621_v34 }
 0x53a   : > { %v5173_v0 = vpop.eup %5172  ;;  %5198 = vrcp.f32 %v7420_v43  ;;  %v8622_v43 = vld [vmem:[#allocation109_spill] sm:$0xff] }
 0x53b   : > { %v5175_v39 = vpop.eup %5174  ;;  %5200 = vrcp.f32 %v3090_v30  ;;  %v7564_v36 = vpop.xlane.xlu1 %3107  ;;  %v7571_v9 = vmul.f32 %v5173_v0, %v6976_v60  ;;  %v3438_v26 = vmul.f32 %v5159_v2, %v8622_v43  ;;  %v3472_v30 = vmul.f32 %v5171_v21, %v8623_v62  ;;  %v8627_v21 = vld [vmem:[#allocation30_spill] sm:$0xff] }
 0x53c   : > { %v3093_v51 = vpop.xlane.xlu0 %3092  ;;  %v5177_v50 = vpop.eup %5176  ;;  %5202 = vrcp.f32 %v7376_v40  ;;  %v8625_v60 = vpack.c.bf16 %v7254_v45, %v7251_v10  ;;  %v8632_v62 = vpack.c.bf16 %v7280_v46, %v7277_v8 }
 0x53d   : > { %v5179_v25 = vpop.eup %5178  ;;  %5204 = vrcp.f32 %v3093_v51  ;;  %v3599_v5 = vpack.c.bf16 %v7571_v9, %v7568_v11  ;;  %v3559_v13 = vpack.c.bf16 %v3439_v48, %v3438_v26  ;;  %v3576_v14 = vpack.c.bf16 %v3473_v63, %v3472_v30 }
 0x53e   : > { %v5181_v38 = vpop.eup %5180  ;;  %v3723_v40 = vsel %vm2007_vm4, %v8625_v60, 0  ;;  %v7591_v47 = vmul.f32 %v5177_v50, %v8626_v7  ;;  %5206 = vrcp.f32 %v7320_v12  ;;  %v3437_v0 = vmul.f32 %v5179_v25, %v8627_v21  ;;  %v8630_v50 = vld [vmem:[#allocation113_spill] sm:$0xff]  ;;  %v8637_v21 = vld [vmem:[#allocation64_spill] sm:$0xff] }
 0x53f   : > { %v5183_v22 = vpop.eup %5182  ;;  %v7586_v49 = vpop.xlane.xlu1 %3101  ;;  %v7594_v4 = vmul.f32 %v5181_v38, %v6994_v57  ;;  %5208 = vrcp.f32 %v7340_v35  ;;  %v8629_v35 = vld [vmem:[#allocation116_spill] sm:$0xff] }
 0x540   : > { %v7588_v2 = vpop.xlane.xlu0 %3014  ;;  %v5185_v61 = vpop.eup %5184  ;;  %4463 = vmatpush3.bf16.xpose.msra.mxu1 %v3628_v28  ;;  %4479 = vmatpush3.bf16.xpose.msra.mxu0 %v3723_v40  ;;  %v3471_v48 = vmul.f32 %v5183_v22, %v8628_v56  ;;  %5210 = vrcp.f32 %v7248_v3  ;;  %v3436_v34 = vmul.f32 %v5175_v39, %v8629_v35  ;;  %v3720_v3 = vsel %vm2007_vm4, %v8632_v62, 0  ;;  %v8633_v28 = vld [vmem:[#allocation59_spill] sm:$0xff]  ;;  %v8638_v56 = vld [vmem:[#allocation22_spill] sm:$0xff] }
 0x541   : > { %v5187_v23 = vpop.eup %5186  ;;  %4684 = vmatprep.subr.msk.bf16.mxu1 %vm2007_vm4, %v3559_v13  ;;  %4691 = vmatprep.subr.msk.bf16.mxu0 %vm2007_vm4, %v3576_v14  ;;  %v3585_v10 = vpack.c.bf16 %v7594_v4, %v7591_v47  ;;  %v7609_v12 = vmul.f32 %v5185_v61, %v6966_v55  ;;  %5212 = vrcp.f32 %v7272_v1  ;;  %v8631_v55 = vpack.c.bf16 %v7130_v27, %v7127_v31  ;;  %v8634_v14 = vld [vmem:[#allocation105_spill] sm:$0xff] }
 0x542   : > { %v5189_v45 = vpop.eup %5188  ;;  %v3470_v43 = vmul.f32 %v5187_v23, %v8630_v50  ;;  %v3558_v38 = vpack.c.bf16 %v3437_v0, %v3436_v34  ;;  %v8636_v23 = vld [vmem:[#allocation52_spill] sm:$0xff]  ;;  %5214 = vrcp.f32 %v7588_v2  ;;  %v5315_v2 = vld [vmem:[#allocation3 + $0x4] sm:$0xf] }
 0x543   : > { %v5191_v17 = vpop.eup %5190  ;;  %v7602_v58 = vpop.xlane.xlu1 %3035  ;;  %v7612_v51 = vmul.f32 %v5189_v45, %v7006_v29  ;;  %v3625_v29 = vsel %vm2007_vm4, %v8631_v55, 0  ;;  %5216 = vrcp.f32 %v7529_v15 }
 0x544   : > { %v7604_v57 = vpop.xlane.xlu0 %3008  ;;  %v5193_v59 = vpop.eup %5192  ;;  %v3575_v32 = vpack.c.bf16 %v3471_v48, %v3470_v43  ;;  %v3434_v48 = vmul.f32 %v5191_v17, %v8638_v56  ;;  %v8648_v56 = vld [vmem:[#allocation118_spill] sm:$0xff]  ;;  %5218 = vrcp.f32 %v7549_v24 }
 0x545   : > { %v5195_v63 = vpop.eup %5194  ;;  %v3584_v25 = vpack.c.bf16 %v7612_v51, %v7609_v12  ;;  %v7633_v60 = vmul.f32 %v5193_v59, %v8633_v28  ;;  %v8639_v59 = vld [vmem:[#allocation120_spill] sm:$0xff]  ;;  %v8642_v28 = vld [vmem:[#allocation26_spill] sm:$0xff] }
 0x546   : > { %v5197_v26 = vpop.eup %5196  ;;  %v3435_v7 = vmul.f32 %v5195_v63, %v8634_v14  ;;  %v8640_v63 = vpack.c.bf16 %v7150_v37, %v7147_v54  ;;  %v8645_v14 = vld [vmem:[#allocation24_spill] sm:$0xff] }
 0x547   : > { %v5199_v30 = vpop.eup %5198  ;;  %v7628_v1 = vpop.xlane.xlu1 %3029  ;;  %v7636_v40 = vmul.f32 %v5197_v26, %v7018_v16  ;;  %v8635_v16 = vld [vmem:[#allocation31_spill] sm:$0xff] }
 0x548   : > { %v7630_v39 = vpop.xlane.xlu0 %3110  ;;  %v5201_v31 = vpop.eup %5200  ;;  %4465 = vmatpush3.bf16.xpose.msra.mxu1 %v3625_v29  ;;  %4481 = vmatpush3.bf16.xpose.msra.mxu0 %v3720_v3  ;;  %v3469_v61 = vmul.f32 %v5199_v30, %v8635_v16  ;;  %v3622_v55 = vsel %vm2007_vm4, %v8640_v63, 0  ;;  %v8641_v29 = vpack.c.bf16 %v7170_v18, %v7167_v52  ;;  %v3557_v3 = vpack.c.bf16 %v3435_v7, %v3434_v48  ;;  %v8643_v18 = vld [vmem:[#allocation25_spill] sm:$0xff] }
 0x549   : > { %v5203_v27 = vpop.eup %5202  ;;  %4685 = vmatprep.subr.msk.bf16.mxu1 %vm2007_vm4, %v3558_v38  ;;  %4692 = vmatprep.subr.msk.bf16.mxu0 %vm2007_vm4, %v3575_v32  ;;  %v3601_v46 = vpack.c.bf16 %v7636_v40, %v7633_v60  ;;  %v7649_v45 = vmul.f32 %v5201_v31, %v8636_v23  ;;  %v8688_v40 = vld [vmem:[#allocation129_spill] sm:$0xff] }
 0x54a   : > { %v5205_v8 = vpop.eup %5204  ;;  %v3468_v35 = vmul.f32 %v5203_v27, %v8639_v59  ;;  %v3717_v62 = vsel %vm2007_vm4, %v8641_v29, 0  ;;  %v8644_v27 = vld [vmem:[#allocation21_spill] sm:$0xff]  ;;  %v8651_v29 = vld [vmem:[#allocation72_spill] sm:$0xff] }
 0x54b   : > { %v7642_v22 = vpop.xlane.xlu1 %3131  ;;  %v7652_v0 = vmul.f32 %v5205_v8, %v8637_v21  ;;  %v5207_v50 = vpop.eup %5206  ;;  %v8647_v21 = vld [vmem:[#allocation119_spill] sm:$0xff] }
 0x54c   : > { %v7644_v13 = vpop.xlane.xlu0 %3104  ;;  %v5209_v43 = vpop.eup %5208  ;;  %v3574_v30 = vpack.c.bf16 %v3469_v61, %v3468_v35  ;;  %v3433_v31 = vmul.f32 %v5207_v50, %v8642_v28  ;;  %v8646_v61 = vpack.c.bf16 %v7054_v19, %v7051_v41  ;;  %v8649_v48 = vpack.c.bf16 %v8647_v21, %v8648_v56  ;;  %v8650_v19 = vld [vmem:[#allocation75_spill] sm:$0xff]  ;;  %v8660_v21 = vld [vmem:[#allocation82_spill] sm:$0xff] }
 0x54d   : > { %v3600_v34 = vpack.c.bf16 %v7652_v0, %v7649_v45  ;;  %v5211_v38 = vpop.eup %5210  ;;  %v3467_v52 = vmul.f32 %v5209_v43, %v8643_v18  ;;  %v8656_v18 = vld [vmem:[#allocation131_spill] sm:$0xff]  ;;  %v8693_v0 = vld [vmem:[#allocation132_spill] sm:$0xff] }
 0x54e   : > { %v5213_v32 = vpop.eup %5212  ;;  %v3432_v8 = vmul.f32 %v5211_v38, %v8644_v27  ;;  %v3619_v23 = vsel %vm2007_vm4, %v8646_v61, 0  ;;  %v3714_v59 = vsel %vm2007_vm4, %v8649_v48, 0  ;;  %v8654_v38 = vld [vmem:[#allocation76_spill] sm:$0xff] }
 0x54f   : > { %v7658_v26 = vpop.xlane.xlu1 %3047  ;;  %v3466_v7 = vmul.f32 %v5213_v32, %v8645_v14 }
 0x550   : > { %v7668_v17 = vpop.xlane.xlu0 %3038  ;;  %4467 = vmatpush3.bf16.xpose.msra.mxu1 %v3622_v55  ;;  %4483 = vmatpush3.bf16.xpose.msra.mxu0 %v3717_v62  ;;  %v3556_v50 = vpack.c.bf16 %v3433_v31, %v3432_v8  ;;  %v8652_v62 = vpack.c.bf16 %v8650_v19, %v8651_v29  ;;  %v8662_v19 = vld [vmem:[#allocation66_spill] sm:$0xff] }
 0x551   : > { %4686 = vmatprep.subr.msk.bf16.mxu1 %vm2007_vm4, %v3557_v3  ;;  %4693 = vmatprep.subr.msk.bf16.mxu0 %vm2007_vm4, %v3574_v30  ;;  %v3573_v63 = vpack.c.bf16 %v3467_v52, %v3466_v7  ;;  %v8653_v30 = vld [vmem:[#allocation79_spill] sm:$0xff]  ;;  %v8657_v52 = vld [vmem:[#allocation16_spill] sm:$0xff]  ;;  %v5314_v7 = vld [vmem:[#allocation3] sm:$0xf] }
 0x552   : > { %v3616_v3 = vsel %vm2007_vm4, %v8652_v62, 0  ;;  %v8655_v32 = vpack.c.bf16 %v8653_v30, %v8654_v38  ;;  %v8658_v27 = vpack.c.bf16 %v8656_v18, %v8657_v52  ;;  %v8663_v30 = vld [vmem:[#allocation61_spill] sm:$0xff] }
 0x553   : > { %v3042_v37 = vpop.xlane.xlu1 %3041  ;;  %v8665_v52 = vld [vmem:[#allocation133_spill] sm:$0xff] }
 0x554   : > { %v7672_v54 = vpop.xlane.xlu0 %3134  ;;  %v3711_v28 = vsel %vm2007_vm4, %v8655_v32, 0 }
 0x557   : > { %v7678_v16 = vpop.xlane.xlu1 %3143 }
 0x558   : > { %v3051_v35 = vpop.xlane.xlu0 %3050  ;;  %4469 = vmatpush3.bf16.xpose.msra.mxu1 %v3619_v23  ;;  %4485 = vmatpush3.bf16.xpose.msra.mxu0 %v3714_v59  ;;  %v8659_v23 = vld [vmem:[#allocation94_spill] sm:$0xff] }
 0x559   : > { %4687 = vmatprep.subr.msk.bf16.mxu1 %vm2007_vm4, %v3556_v50  ;;  %4694 = vmatprep.subr.msk.bf16.mxu0 %vm2007_vm4, %v3573_v63  ;;  %v8661_v56 = vpack.c.bf16 %v8659_v23, %v8660_v21  ;;  %v8666_v23 = vld [vmem:[#allocation69_spill] sm:$0xff] }
 0x55b   : > { %v7690_v43 = vpop.xlane.xlu1 %3137  ;;  %v3708_v48 = vsel %vm2007_vm4, %v8661_v56, 0 }
 0x55c   : > { %v3045_v55 = vpop.xlane.xlu0 %3044 }
 0x55f   : > { %v3060_v41 = vpop.xlane.xlu1 %3059 }
 0x560   : > { %v3147_v31 = vpop.xlane.xlu0 %3146  ;;  %4471 = vmatpush3.bf16.xpose.msra.mxu1 %v3616_v3  ;;  %4487 = vmatpush3.bf16.xpose.msra.mxu0 %v3711_v28  ;;  %5220 = vrcp.f32 %v3060_v41  ;;  %v5215_v41 = vpop.eup %5214 }
 0x561   : > { %4695 = vmatprep.subr.msk.bf16.mxu0 %vm2007_vm4, %v8658_v27  ;;  %5222 = vrcp.f32 %v7604_v57  ;;  %v5217_v57 = vpop.eup %5216  ;;  %v3495_v29 = vmul.f32 %v5215_v41, %v8662_v19  ;;  %v8670_v19 = vld [vmem:[#allocation62_spill] sm:$0xff] }
 0x562   : > { %v3494_v38 = vmul.f32 %v5217_v57, %v8663_v30 }
 0x563   : > { %v3054_v8 = vpop.xlane.xlu1 %3053 }
 0x564   : > { %v7705_v14 = vpop.xlane.xlu0 %3140 }
 0x567   : > { %4473 = vmatmul.mubr.msk.bf16.vlgmr.msra.gmra.mxu1 %vm2007_vm4, %v5314_v7  ;;  %v3156_v61 = vpop.xlane.xlu1 %3155 }
 0x568   : > { %v3063_v59 = vpop.xlane.xlu0 %3062  ;;  %4489 = vmatpush3.bf16.xpose.msra.mxu0 %v3708_v48 }
 0x569   : > { %5224 = vrcp.f32 %v3063_v59 }
 0x56a   : > { %5226 = vrcp.f32 %v7630_v39  ;;  %v5219_v39 = vpop.eup %5218 }
 0x56b   : > { %5228 = vrcp.f32 %v3054_v8  ;;  %v3150_v15 = vpop.xlane.xlu1 %3149  ;;  %v3587_v8 = vpack.c.bf16 %v3495_v29, %v3494_v38  ;;  %v3492_v29 = vmul.f32 %v5219_v39, %v8670_v19  ;;  %v8673_v39 = vld [vmem:[#allocation135_spill] sm:$0xff] }
 0x56c   : > { %v3057_v24 = vpop.xlane.xlu0 %3056  ;;  %5230 = vrcp.f32 %v7564_v36 }
 0x56d   : > { %5232 = vrcp.f32 %v3057_v24  ;;  %v5221_v62 = vpop.eup %5220 }
 0x56e   : > { %5234 = vrcp.f32 %v3051_v35  ;;  %v5223_v3 = vpop.eup %5222 }
 0x56f   : > { %5236 = vrcp.f32 %v3156_v61  ;;  %4491 = vmatmul.mubr.msk.bf16.vlgmr.msra.gmra.mxu0 %vm2007_vm4, %v5315_v2  ;;  %v7718_v50 = vpop.xlane.xlu1 %3077  ;;  %v3493_v21 = vmul.f32 %v5223_v3, %v8666_v23  ;;  %v8668_v2 = vld [vmem:[#allocation123_spill] sm:$0xff] }
 0x570   : > { %v3159_v63 = vpop.xlane.xlu0 %3158  ;;  %5238 = vrcp.f32 %v7658_v26 }
 0x571   : > { %5240 = vrcp.f32 %v3159_v63 }
 0x572   : > { %5242 = vrcp.f32 %v7644_v13 }
 0x573   : > { %5244 = vrcp.f32 %v7586_v49  ;;  %v7723_v36 = vpop.xlane.xlu1 %3125  ;;  %v8664_v49 = vld [vmem:[#allocation111_spill] sm:$0xff] }
 0x574   : > { %v7725_v35 = vpop.xlane.xlu0 %3032  ;;  %5246 = vrcp.f32 %v3042_v37  ;;  %v3510_v18 = vmul.f32 %v5221_v62, %v8664_v49  ;;  %v8671_v62 = vld [vmem:[#allocation65_spill] sm:$0xff] }
 0x575   : > { %5248 = vrcp.f32 %v3045_v55 }
 0x576   : > { %v5225_v26 = vpop.eup %5224  ;;  %5250 = vrcp.f32 %v3147_v31  ;;  %v8667_v31 = vld [vmem:[#allocation71_spill] sm:$0xff] }
 0x577   : > { %v5227_v32 = vpop.eup %5226  ;;  %5252 = vrcp.f32 %v3150_v15  ;;  %v7729_v13 = vpop.xlane.xlu1 %2975  ;;  %v3511_v27 = vmul.f32 %v5225_v26, %v8665_v52  ;;  %v3821_v15 = vsel %vm2007_vm4, %v3587_v8, 0 }
 0x578   : > { %v3153_v28 = vpop.xlane.xlu0 %3152  ;;  %v5229_v7 = vpop.eup %5228  ;;  %5254 = vrcp.f32 %v7678_v16  ;;  %v3527_v56 = vmul.f32 %v5227_v32, %v8667_v31  ;;  %v8669_v16 = vld [vmem:[#allocation128_spill] sm:$0xff]  ;;  %v3586_v32 = vpack.c.bf16 %v3493_v21, %v3492_v29 }
 0x579   : > { %v5231_v37 = vpop.eup %5230  ;;  %5256 = vrcp.f32 %v3153_v28  ;;  %v3595_v55 = vpack.c.bf16 %v3511_v27, %v3510_v18  ;;  %v3508_v63 = vmul.f32 %v5229_v7, %v8668_v2  ;;  %v8672_v27 = vld [vmem:[#allocation126_spill] sm:$0xff]  ;;  %v8675_v21 = vld [vmem:[#allocation80_spill] sm:$0xff] }
 0x57a   : > { %v5233_v61 = vpop.eup %5232  ;;  %v3526_v3 = vmul.f32 %v5231_v37, %v8671_v62  ;;  %5258 = vrcp.f32 %v7668_v17  ;;  %v8674_v37 = vld [vmem:[#allocation103_spill] sm:$0xff] }
 0x57b   : > { %v5235_v48 = vpop.eup %5234  ;;  %4696 = vmatprep.subr.msk.bf16.mxu1 %vm2007_vm4, %v3595_v55  ;;  %v7737_v59 = vpop.xlane.xlu1 %3023  ;;  %v3509_v41 = vmul.f32 %v5233_v61, %v8669_v16  ;;  %5260 = vrcp.f32 %v7705_v14  ;;  %v3818_v16 = vsel %vm2007_vm4, %v3586_v32, 0 }
 0x57c   : > { %v7740_v24 = vpop.xlane.xlu0 %3080  ;;  %v5237_v57 = vpop.eup %5236  ;;  %4493 = vmatpush3.bf16.xpose.msra.mxu1 %v3821_v15  ;;  %v3603_v28 = vpack.c.bf16 %v3527_v56, %v3526_v3  ;;  %v3507_v55 = vmul.f32 %v5235_v48, %v8674_v37  ;;  %5262 = vrcp.f32 %v7602_v58  ;;  %v8676_v56 = vld [vmem:[#allocation73_spill] sm:$0xff] }
 0x57d   : > { %v5239_v30 = vpop.eup %5238  ;;  %v3594_v38 = vpack.c.bf16 %v3509_v41, %v3508_v63  ;;  %v3542_v8 = vmul.f32 %v5237_v57, %v8672_v27  ;;  %5264 = vrcp.f32 %v7690_v43  ;;  %v8677_v43 = vld [vmem:[#allocation67_spill] sm:$0xff] }
 0x57e   : > { %v5241_v26 = vpop.eup %5240  ;;  %v3506_v14 = vmul.f32 %v5239_v30, %v8675_v21  ;;  %v3913_v48 = vsel %vm2007_vm4, %v3603_v28, 0  ;;  %5266 = vrcp.f32 %v7672_v54  ;;  %v8678_v30 = vld [vmem:[#allocation114_spill] sm:$0xff]  ;;  %v8679_v28 = vld [vmem:[#allocation140_spill] sm:$0xff]  ;;  %v8680_v27 = vld [vmem:[#allocation63_spill] sm:$0xff] }
 0x57f   : > { %v5243_v49 = vpop.eup %5242  ;;  %4697 = vmatprep.subr.msk.bf16.mxu1 %vm2007_vm4, %v3594_v38  ;;  %v7749_v18 = vpop.xlane.xlu1 %3071  ;;  %v3543_v7 = vmul.f32 %v5241_v26, %v8673_v39  ;;  %5268 = vrcp.f32 %v7725_v35  ;;  %v8681_v39 = vld [vmem:[#allocation122_spill] sm:$0xff]  ;;  %v8682_v54 = vld [vmem:[#allocation84_spill] sm:$0xff] }
 0x580   : > { %v3129_v52 = vpop.xlane.xlu0 %3128  ;;  %v5245_v61 = vpop.eup %5244  ;;  %v3525_v15 = vmul.f32 %v5243_v49, %v8676_v56  ;;  %v3593_v58 = vpack.c.bf16 %v3507_v55, %v3506_v14  ;;  %5270 = vrcp.f32 %v7628_v1  ;;  %v3815_v14 = vsel %vm2007_vm4, %v3585_v10, 0  ;;  %v8684_v10 = vld [vmem:[#allocation78_spill] sm:$0xff] }
 0x581   : > { %v5247_v17 = vpop.eup %5246  ;;  %v3611_v23 = vpack.c.bf16 %v3543_v7, %v3542_v8  ;;  %v3524_v19 = vmul.f32 %v5245_v61, %v8677_v43  ;;  %5272 = vrcp.f32 %v7642_v22  ;;  %v8683_v61 = vld [vmem:[#allocation102_spill] sm:$0xff] }
 0x582   : > { %v5249_v31 = vpop.eup %5248  ;;  %v3504_v55 = vmul.f32 %v5247_v17, %v8682_v54  ;;  %5274 = vrcp.f32 %v7723_v36  ;;  %v8687_v43 = vld [vmem:[#allocation110_spill] sm:$0xff]  ;;  %v3904_v54 = vsel %vm2007_vm4, %v3600_v34, 0 }
 0x583   : > { %v5251_v2 = vpop.eup %5250  ;;  %4704 = vmatprep.subr.msk.bf16.mxu0 %vm2007_vm4, %v3611_v23  ;;  %v7759_v63 = vpop.xlane.xlu1 %3119  ;;  %v3602_v3 = vpack.c.bf16 %v3525_v15, %v3524_v19  ;;  %v3505_v38 = vmul.f32 %v5249_v31, %v8678_v30  ;;  %5276 = vrcp.f32 %v7737_v59  ;;  %v3812_v59 = vsel %vm2007_vm4, %v3584_v25, 0 }
 0x584   : > { %v2979_v41 = vpop.xlane.xlu0 %2978  ;;  %v5253_v57 = vpop.eup %5252  ;;  %4495 = vmatpush3.bf16.xpose.msra.mxu1 %v3818_v16  ;;  %4511 = vmatpush3.bf16.xpose.msra.mxu0 %v3913_v48  ;;  %v3539_v7 = vmul.f32 %v5251_v2, %v8681_v39  ;;  %v8685_v48 = vld [vmem:[#allocation125_spill] sm:$0xff] }
 0x585   : > { %v5255_v29 = vpop.eup %5254  ;;  %4698 = vmatprep.subr.msk.bf16.mxu1 %vm2007_vm4, %v3593_v58  ;;  %v3540_v49 = vmul.f32 %v5253_v57, %v8679_v28  ;;  %v3910_v31 = vsel %vm2007_vm4, %v3602_v3, 0  ;;  %v3592_v1 = vpack.c.bf16 %v3505_v38, %v3504_v55  ;;  %v8686_v57 = vld [vmem:[#allocation70_spill] sm:$0xff] }
 0x586   : > { %v5257_v62 = vpop.eup %5256  ;;  %v3538_v23 = vmul.f32 %v5255_v29, %v8683_v61 }
 0x587   : > { %v7768_v26 = vpop.xlane.xlu1 %2969  ;;  %v3541_v8 = vmul.f32 %v5257_v62, %v8680_v27  ;;  %v5259_v21 = vpop.eup %5258  ;;  %v8692_v27 = vld [vmem:[#allocation77_spill] sm:$0xff] }
 0x588   : > { %v3027_v32 = vpop.xlane.xlu0 %3026  ;;  %v3609_v15 = vpack.c.bf16 %v3539_v7, %v3538_v23  ;;  %v5261_v22 = vpop.eup %5260  ;;  %v3503_v16 = vmul.f32 %v5259_v21, %v8684_v10 }
 0x589   : > { %v3610_v37 = vpack.c.bf16 %v3541_v8, %v3540_v49  ;;  %v5263_v17 = vpop.eup %5262  ;;  %5278 = vrcp.f32 %v3027_v32  ;;  %v3537_v58 = vmul.f32 %v5261_v22, %v8685_v48  ;;  %v8690_v32 = vld [vmem:[#allocation11_spill] sm:$0xff]  ;;  %v3901_v48 = vsel %vm2007_vm4, %v3599_v5, 0  ;;  %v8701_v5 = vld [vmem:[#allocation112_spill] sm:$0xff] }
 0x58a   : > { %v5265_v2 = vpop.eup %5264  ;;  %5280 = vrcp.f32 %v3129_v52  ;;  %v3502_v36 = vmul.f32 %v5263_v17, %v8686_v57  ;;  %v3907_v52 = vsel %vm2007_vm4, %v3601_v46, 0 }
 0x58b   : > { %4705 = vmatprep.subr.msk.bf16.mxu0 %vm2007_vm4, %v3610_v37  ;;  %v3018_v35 = vpop.xlane.xlu1 %3017  ;;  %5282 = vrcp.f32 %v7740_v24  ;;  %v3536_v19 = vmul.f32 %v5265_v2, %v8687_v43  ;;  %v5267_v29 = vpop.eup %5266  ;;  %v8698_v2 = vld [vmem:[#allocation137_spill] sm:$0xff] }
 0x58c   : > { %v3075_v56 = vpop.xlane.xlu0 %3074  ;;  %4497 = vmatpush3.bf16.xpose.msra.mxu1 %v3815_v14  ;;  %4513 = vmatpush3.bf16.xpose.msra.mxu0 %v3910_v31  ;;  %5284 = vrcp.f32 %v2979_v41  ;;  %v3591_v3 = vpack.c.bf16 %v3503_v16, %v3502_v36  ;;  %v5269_v38 = vpop.eup %5268  ;;  %v8694_v14 = vld [vmem:[#allocation106_spill] sm:$0xff]  ;;  %v3806_v16 = vsel %vm2007_vm4, %v3582_v44, 0 }
 0x58d   : > { %4699 = vmatprep.subr.msk.bf16.mxu1 %vm2007_vm4, %v3592_v1  ;;  %4706 = vmatprep.subr.msk.bf16.mxu0 %vm2007_vm4, %v3609_v15  ;;  %5286 = vrcp.f32 %v7718_v50  ;;  %v3608_v30 = vpack.c.bf16 %v3537_v58, %v3536_v19  ;;  %v5271_v12 = vpop.eup %5270  ;;  %v3501_v46 = vmul.f32 %v5269_v38, %v8688_v40  ;;  %v8689_v50 = vld [vmem:[#allocation98_spill] sm:$0xff]  ;;  %v8696_v15 = vld [vmem:[#allocation143_spill] sm:$0xff]  ;;  %v8699_v19 = vld [vmem:[#allocation92_spill] sm:$0xff] }
 0x58e   : > { %5288 = vrcp.f32 %v7729_v13  ;;  %v5273_v51 = vpop.eup %5272  ;;  %v3535_v41 = vmul.f32 %v5267_v29, %v8689_v50  ;;  %v8691_v13 = vld [vmem:[#allocation74_spill] sm:$0xff]  ;;  %v8700_v29 = vld [vmem:[#allocation127_spill] sm:$0xff]  ;;  %v8705_v40 = vld [vmem:[#allocation85_spill] sm:$0xff] }
 0x58f   : > { %v7787_v47 = vpop.xlane.xlu1 %3065  ;;  %5290 = vrcp.f32 %v7759_v63  ;;  %v3500_v49 = vmul.f32 %v5271_v12, %v8691_v13  ;;  %v3534_v8 = vmul.f32 %v5273_v51, %v8692_v27  ;;  %v5275_v39 = vpop.eup %5274  ;;  %v3809_v63 = vsel %vm2007_vm4, %v3583_v6, 0  ;;  %v8703_v12 = vld [vmem:[#allocation12_spill] sm:$0xff] }
 0x590   : > { %v3123_v4 = vpop.xlane.xlu0 %3122  ;;  %v5277_v37 = vpop.eup %5276  ;;  %v3532_v22 = vmul.f32 %v5275_v39, %v8696_v15  ;;  %v8706_v27 = vld [vmem:[#allocation88_spill] sm:$0xff]  ;;  %v8707_v39 = vld [vmem:[#allocation49_spill] sm:$0xff] }
 0x591   : > { %5292 = vrcp.f32 %v3123_v4  ;;  %v3590_v61 = vpack.c.bf16 %v3501_v46, %v3500_v49  ;;  %v3607_v23 = vpack.c.bf16 %v3535_v41, %v3534_v8 }
 0x593   : > { %v3114_v62 = vpop.xlane.xlu1 %3113 }
 0x594   : > { %v2973_v24 = vpop.xlane.xlu0 %2972  ;;  %4499 = vmatpush3.bf16.xpose.msra.mxu1 %v3812_v59  ;;  %4515 = vmatpush3.bf16.xpose.msra.mxu0 %v3907_v52 }
 0x595   : > { %4700 = vmatprep.subr.msk.bf16.mxu1 %vm2007_vm4, %v3591_v3  ;;  %4707 = vmatprep.subr.msk.bf16.mxu0 %vm2007_vm4, %v3608_v30  ;;  %v8702_v3 = vld [vmem:[#allocation68_spill] sm:$0xff] }
 0x596   : > { %v5279_v21 = vpop.eup %5278 }
 0x597   : > { %v725_v25 = vpop.permute.xlu1 %724  ;;  %v5281_v20 = vpop.eup %5280  ;;  %v3499_v34 = vmul.f32 %v5279_v21, %v8693_v0  ;;  %v8711_v0 = vld [vmem:[#allocation15_spill] sm:$0xff] }
 0x598   : > { %v3021_v60 = vpop.xlane.xlu0 %3020  ;;  %v824_v28 = vadd.f32 %v8690_v32, %v725_v25  ;;  %v5283_v53 = vpop.eup %5282 }
 0x599   : > { %5294 = vrcp.f32 %v3021_v60  ;;  %v5285_v6 = vpop.eup %5284  ;;  %v3517_v4 = vmul.f32 %v5283_v53, %v8698_v2  ;;  %v8710_v53 = vld [vmem:[#allocation13_spill] sm:$0xff] }
 0x59a   : > { %5296 = vrcp.f32 %v3018_v35  ;;  %v4343_v7 = vpack.c.bf16 %v824_v28, %v824_v28  ;;  %v5287_v35 = vpop.eup %5286 }
 0x59b   : > { %5298 = vrcp.f32 %v3075_v56  ;;  %v5289_v31 = vpop.eup %5288  ;;  %v8695_v56 = vld [vmem:[#allocation146_spill] sm:$0xff] }
 0x59c   : > { %5300 = vrcp.f32 %v2973_v24  ;;  %v3069_v55 = vpop.xlane.xlu0 %3068  ;;  %869 = vst.msk [vmem:[#allocation3 + $0x8] sm:$0xf] %vm848_vm1, %v4343_v7  ;;  %4501 = vmatpush3.bf16.xpose.msra.mxu1 %v3809_v63  ;;  %4517 = vmatpush3.bf16.xpose.msra.mxu0 %v3904_v54  ;;  %v3498_v1 = vmul.f32 %v5277_v37, %v8695_v56  ;;  %v5291_v10 = vpop.eup %5290  ;;  %v3482_v59 = vmul.f32 %v5289_v31, %v8699_v19  ;;  %v8708_v37 = vld [vmem:[#allocation107_spill] sm:$0xff] }
 0x59d   : > { %5302 = vrcp.f32 %v7749_v18  ;;  %4701 = vmatprep.subr.msk.bf16.mxu1 %vm2007_vm4, %v3590_v61  ;;  %4708 = vmatprep.subr.msk.bf16.mxu0 %vm2007_vm4, %v3607_v23  ;;  %v3533_v18 = vmul.f32 %v5281_v20, %v8694_v14  ;;  %v3530_v46 = vmul.f32 %v5291_v10, %v8705_v40 }
 0x59e   : > { %5304 = vrcp.f32 %v7768_v26  ;;  %v8697_v26 = vld [vmem:[#allocation141_spill] sm:$0xff]  ;;  %v3589_v58 = vpack.c.bf16 %v3499_v34, %v3498_v1  ;;  %v5293_v36 = vpop.eup %5292 }
 0x59f   : > { %v3483_v17 = vmul.f32 %v5285_v6, %v8697_v26  ;;  %v3606_v43 = vpack.c.bf16 %v3533_v18, %v3532_v22  ;;  %v3531_v30 = vmul.f32 %v5293_v36, %v8702_v3  ;;  %v8712_v1 = vld [vmem:[#allocation81_spill] sm:$0xff] }
 0x5a0   : > { %v3117_v45 = vpop.xlane.xlu0 %3116  ;;  %v8713_v22 = vld [vmem:[#allocation17_spill] sm:$0xff] }
 0x5a1   : > { %5306 = vrcp.f32 %v3117_v45  ;;  %v3581_v33 = vpack.c.bf16 %v3483_v17, %v3482_v59  ;;  %v3605_v49 = vpack.c.bf16 %v3531_v30, %v3530_v46  ;;  %v4800_v30 = vld [vmem:[%s7947_s9] sm:$0xff]  }
 0x5a2   : > { %5308 = vrcp.f32 %v3114_v62  ;;  %v3516_v62 = vmul.f32 %v5287_v35, %v8700_v29 }
 0x5a3   : > { %5310 = vrcp.f32 %v3069_v55  ;;  %v3546_v57 = vld [vmem:[#allocation3 + $0x8] sm:$0xf]  ;;  %v3803_v32 = vsel %vm2007_vm4, %v3581_v33, 0 }
 0x5a4   : > { %4503 = vmatpush3.bf16.xpose.msra.mxu1 %v3806_v16  ;;  %4519 = vmatpush3.bf16.xpose.msra.mxu0 %v3901_v48  ;;  %5312 = vrcp.f32 %v7787_v47  ;;  %v3598_v44 = vpack.c.bf16 %v3517_v4, %v3516_v62  ;;  %v8704_v47 = vld [vmem:[#allocation144_spill] sm:$0xff]  ;;  %v8709_v55 = vld [vmem:[#allocation130_spill] sm:$0xff]  ;;  %v8714_v4 = vmov 0  }
 0x5a5   : > { %4702 = vmatprep.subr.msk.bf16.mxu1 %vm2007_vm4, %v3589_v58  ;;  %4508 = vmatprep.mubr.msk.bf16.mxu1 %vm2007_vm4, %v3546_v57 }
 0x5a6   : > { %v5295_v52 = vpop.eup %5294  ;;  %4709 = vmatprep.subr.msk.bf16.mxu0 %vm2007_vm4, %v3606_v43  ;;  %v3898_v28 = vsel %vm2007_vm4, %v3598_v44, 0 }
 0x5a7   : > { %v5297_v42 = vpop.eup %5296  ;;  %v730_v9 = vpop.permute.xlu0 %729  ;;  %v3497_v24 = vmul.f32 %v5295_v52, %v8701_v5 }
 0x5a8   : > { %v5299_v11 = vpop.eup %5298  ;;  %v827_v51 = vadd.f32 %v8703_v12, %v730_v9  ;;  %v3496_v60 = vmul.f32 %v5297_v42, %v8704_v47  ;;  %v3995_v12 = vpop.permute.xlu1 %3994 }
 0x5a9   : > { %v5301_v38 = vpop.eup %5300  ;;  %v3515_v7 = vmul.f32 %v5299_v11, %v8707_v39 }
 0x5aa   : > { %v5303_v25 = vpop.eup %5302  ;;  %v4344_v41 = vpack.c.bf16 %v827_v51, %v827_v51  ;;  %v3588_v13 = vpack.c.bf16 %v3497_v24, %v3496_v60  ;;  %v3481_v8 = vmul.f32 %v5301_v38, %v8706_v27  ;;  %v4801_v38 = vld [vmem:[%s7947_s9 + $0x8] sm:$0xff]  }
 0x5ab   : > { %v5305_v50 = vpop.eup %5304  ;;  %v3514_v61 = vmul.f32 %v5303_v25, %v8709_v55 }
 0x5ac   : > { %870 = vst.msk [vmem:[#allocation3 + $0xc] sm:$0xf] %vm848_vm1, %v4344_v41  ;;  %4505 = vmatpush3.bf16.xpose.msra.mxu1 %v3803_v32  ;;  %4521 = vmatpush3.bf16.xpose.msra.mxu0 %v3898_v28  ;;  %v3480_v54 = vmul.f32 %v5305_v50, %v8708_v37  ;;  %v4000_v40 = vpop.permute.xlu1 %3999  ;;  %v4005_v28 = vpop.permute.xlu0 %4004 }
 0x5ad   : > { %4703 = vmatprep.subr.msk.bf16.mxu1 %vm2007_vm4, %v3588_v13  ;;  %4710 = vmatprep.subr.msk.bf16.mxu0 %vm2007_vm4, %v3605_v49  ;;  %v3597_v20 = vpack.c.bf16 %v3515_v7, %v3514_v61 }
 0x5ae   : > { %v5307_v63 = vpop.eup %5306  ;;  %v3580_v21 = vpack.c.bf16 %v3481_v8, %v3480_v54 }
 0x5af   : > { %v5309_v23 = vpop.eup %5308  ;;  %v3529_v6 = vmul.f32 %v5307_v63, %v8710_v53  ;;  %v3895_v18 = vsel %vm2007_vm4, %v3597_v20, 0 }
 0x5b0   : > { %v5311_v45 = vpop.eup %5310  ;;  %v3528_v34 = vmul.f32 %v5309_v23, %v8711_v0  ;;  %v3800_v14 = vsel %vm2007_vm4, %v3580_v21, 0  ;;  %v4010_v39 = vpop.permute.xlu1 %4009 }
 0x5b1   : > { %v5313_v35 = vpop.eup %5312  ;;  %v3513_v15 = vmul.f32 %v5311_v45, %v8712_v1 }
 0x5b2   : > { %v3604_v31 = vpack.c.bf16 %v3529_v6, %v3528_v34  ;;  %v3512_v26 = vmul.f32 %v5313_v35, %v8713_v22 }
 0x5b3   : > { %v3547_v56 = vld [vmem:[#allocation3 + $0xc] sm:$0xf] }
 0x5b4   : > { %4507 = vmatpush3.bf16.xpose.msra.mxu1 %v3800_v14  ;;  %4523 = vmatpush3.bf16.xpose.msra.mxu0 %v3895_v18  ;;  %v3596_v17 = vpack.c.bf16 %v3513_v15, %v3512_v26 }
 0x5b5   : > { %4711 = vmatprep.subr.msk.bf16.mxu0 %vm2007_vm4, %v3604_v31  ;;  %4526 = vmatprep.mubr.msk.bf16.mxu0 %vm2007_vm4, %v3547_v56 }
 0x5b6   : > { %v3892_v2 = vsel %vm2007_vm4, %v3596_v17, 0 }
 0x5bb   : > { %4509 = vmatmul.mubr.msk.bf16.vlgmr.msra.gmra.mxu1 %vm2007_vm4, %v3546_v57 }
 0x5bc   : > { %4525 = vmatpush3.bf16.xpose.msra.mxu0 %v3892_v2  ;;  %4060 = vmatprep.mubr.bf16.mxu1 %v8714_v4 }
 0x5c3   : > { %4527 = vmatmul.mubr.msk.bf16.vlgmr.msra.gmra.mxu0 %vm2007_vm4, %v3547_v56 }
 0x627   : > { %v3697_v10 = vpop.f32.mrf.mxu1 }
 0x629   : > { %v3699_v16 = vpop.f32.mrf.mxu1 }
 0x62b   : > { %v3701_v48 = vpop.f32.mrf.mxu1 }
 0x62d   : > { %v3702_v58 = vpop.f32.mrf.mxu1 }
 0x62f   : > { %v3789_v36 = vpop.f32.mrf.mxu0 }
 0x630   : > { %v3980_v43 = vpack.c.bf16 %v3789_v36, %v3697_v10 }
 0x631   : > { %v3791_v19 = vpop.f32.mrf.mxu0 }
 0x632   : > { %v3981_v59 = vpack.c.bf16 %v3791_v19, %v3699_v16 }
 0x633   : > { %v3793_v29 = vpop.f32.mrf.mxu0 }
 0x635   : > { %v3794_v62 = vpop.f32.mrf.mxu0 }
 0x67b   : > { %v3881_v52 = vpop.f32.mrf.mxu1 }
 0x67d   : > { %v3883_v42 = vpop.f32.mrf.mxu1 }
 0x67f   : > { %v3885_v57 = vpop.f32.mrf.mxu1 }
 0x681   : > { %v3886_v33 = vpop.f32.mrf.mxu1 }
 0x683   : > { %v3973_v44 = vpop.f32.mrf.mxu0 }
 0x684   : > { %v3982_v5 = vpack.c.bf16 %v3973_v44, %v3881_v52 }
 0x685   : > { %v3975_v11 = vpop.f32.mrf.mxu0 }
 0x686   : > { %v3983_v9 = vpack.c.bf16 %v3975_v11, %v3883_v42 }
 0x687   : > { %v3977_v24 = vpop.f32.mrf.mxu0 }
 0x688   : > { %4040 = vmatprep.subr.bf16.mxu1 %v3983_v9 }
 0x689   : > { %v3978_v3 = vpop.f32.mrf.mxu0  ;;  %4041 = vmatpush1.bf16.msra.mxu1 %v3982_v5 }
 0x68a   : > { %4042 = vmatprep.subr.bf16.mxu1 %v3981_v59 }
 0x68d   : > { %4043 = vmatpush1.bf16.msra.mxu1 %v3980_v43 }
 0x690   : > { %4328 = vmatmul.mubr.msk.bf16.vlgmr.msra.gmra.mxu1 %vm752_vm0, %v4800_v30 }
 0x691   : > { %4070 = vmatprep.mubr.bf16.mxu1 %v8714_v4 }
 0x698   : > { %4329 = vmatmul.mubr.msk.bf16.gmra.mxu1 %vm752_vm0, %v4801_v38 }
 0x750   : > { %v4062_v51 = vpop.f32.mrf.mxu1 }
 0x751   : > { %v4063_v25 = vadd.f32 %v4062_v51, %v3995_v12 }
 0x752   : > { %v4064_v47 = vpop.f32.mrf.mxu1 }
 0x753   : > { %4081 = vst [vmem:[%s419_s16] sm:$0xff] %v4063_v25  ;;  %v4065_v60 = vadd.f32 %v4064_v47, %v3995_v12 }
 0x754   : > { %v4066_v46 = vpop.f32.mrf.mxu1 }
 0x755   : > { %4082 = vst [vmem:[%s419_s16 + $0x8] sm:$0xff] %v4065_v60  ;;  %v4067_v50 = vadd.f32 %v4066_v46, %v4000_v40 }
 0x756   : > { %v4068_v41 = vpop.f32.mrf.mxu1 }
 0x757   : > { %4083 = vst [vmem:[%s419_s16 + $0x10] sm:$0xff] %v4067_v50  ;;  %v4069_v32 = vadd.f32 %v4068_v41, %v4000_v40 }
 0x758   : > { %v4072_v13 = vpop.f32.mrf.mxu1 }
 0x759   : > { %4084 = vst [vmem:[%s419_s16 + $0x18] sm:$0xff] %v4069_v32  ;;  %v4073_v49 = vadd.f32 %v4072_v13, %v4005_v28 }
 0x75a   : > { %v4074_v27 = vpop.f32.mrf.mxu1 }
 0x75b   : > { %4085 = vst [vmem:[%s419_s16 + $0x20] sm:$0xff] %v4073_v49  ;;  %v4075_v8 = vadd.f32 %v4074_v27, %v4005_v28 }
 0x75c   : > { %v4076_v7 = vpop.f32.mrf.mxu1 }
 0x75d   : > { %4086 = vst [vmem:[%s419_s16 + $0x28] sm:$0xff] %v4075_v8  ;;  %v4077_v63 = vadd.f32 %v4076_v7, %v4010_v39 }
 0x75e   : > { %v4078_v37 = vpop.f32.mrf.mxu1 }
 0x75f   : > { %4087 = vst [vmem:[%s419_s16 + $0x30] sm:$0xff] %v4077_v63  ;;  %v4079_v54 = vadd.f32 %v4078_v37, %v4010_v39 }
 0x761   : > { %4088 = vst [vmem:[%s419_s16 + $0x38] sm:$0xff] %v4079_v54 }
 0x762   : > { %5329 = shalt.err (!%p5326_p5)
}
 0x763   : > { %s5330_s15 = scalar_lea.hbm %s7887_s12, 1024  ;;  %s5334_s16 = scalar_lea.hbm %s7949_s11, 2048 }
 0x764   : > { %p5331_p6 = scmp.ne.s32.totalorder %s7887_s12, %s5330_s15  ;;  %p5335_p10 = scmp.lt.s32.totalorder %s7887_s12, %s7949_s11 }
 0x765   : > { %p5336_p11 = scmp.lt.s32.totalorder %s5334_s16, %s5330_s15 }
 0x766   : > { %p5332_p7 = pnand %p5331_p6, %p5498_p4 }
 0x767   : > { %p5337_p12 = por %p5336_p11, %p5335_p10 }
 0x768   : > { %p5333_p9 = pneg %p5332_p7 }
 0x76a   : > { %p5338_p13 = pnand %p5337_p12, %p5333_p9 }
 0x76c   : > { %5341 = shalt.err (!%p5338_p13)
}
 0x76d   : > { %s5396_s28 = smov 256   ;;  %s5397_s19 = smov 16  }
 0x76e   : > { %4712 = dma.vmem_to_hbm [thread:$0]  (%p5498_p4), %s7889_s25, 1024, %s7887_s12, %s7893_s20, %s5396_s28, %s5396_s28, %s5397_s19  }
 0x76f PF: > { %p4718_p0 = scmp.ge.s32.totalorder %s5392_s22, 2  ;;  %s4120_s21 = sand.u32 1, %s5372_s17  }
 0x770   : > { %s4121_s30 = scalar_lea.sflag [#allocation5], %s4120_s21 }
 0x771   : > { %p4715_p1 = pnand %p4718_p0, %p5505_p8 }
 0x773   : > { %p4716_p2 = pneg %p4715_p1 }
 0x775   : > { %5367 = dma.done.wait (%p4716_p2), %s4121_s30, 1024  }
 0x776   : > { %5369 = vsyncadd (%p4716_p2), %s4121_s30, 4294966272  ;;  %s24_s22 = sadd.s32 1, %s5392_s22   ;;  %s8715_s14 = sld [smem:[#allocation7_spill]] }
 0x777   : > { %p21_p3 = scmp.ge.s32.totalorder %s24_s22, 4   ;;  %s8716_s19 = sld [smem:[#allocation10_spill]] }
 0x778   : > { %s8717_s20 = sld [smem:[#allocation8_spill]]  ;;  %s8719_s17 = smov %s5376_s18 }
 0x779   : > { %s8718_s21 = sld [smem:[#allocation9_spill]]  ;;  %23 = sbr.rel (!%p21_p3) target bundleno = 4 (0x4), region = 106 }
 0x77c   : > { %s8720_s18 = smov %s8715_s14 }
 0x77e   :  { %4126 = vsyncpa [#allocation5], 1 }
 0x77f   :  { %4128 = vsyncpa [#allocation5 + $0x1], 1 }

</bundles_post_ra>
